<compile_context>
chip_gen: v7x
topology: tpu7x:2x2x1
jax: 0.10.0
libtpu: 0.0.40
codegen_flags: <defaults>
</compile_context>

<pallas_src>
import functools
import numpy as np
import jax
import jax.numpy as jnp
from jax.experimental import pallas as pl
from jax.experimental.pallas import tpu as pltpu


_NEG = -1e30  # finite stand-in for -inf (see performance/correctness review)


# ----------------------------------------------------------------------------
# helpers
# ----------------------------------------------------------------------------
def xavier_uniform(key, shape):
    fan_out, fan_in = shape[0], shape[1]
    bound = float(np.sqrt(6.0 / (fan_in + fan_out)))
    return jax.random.uniform(key, shape, jnp.float32, -bound, bound)


def _vmem_specs(n):
    return [pl.BlockSpec(memory_space=pltpu.MemorySpace.VMEM) for _ in range(n)]


def _pad128(n):
    return int(np.ceil(n / 128.0)) * 128


# ----------------------------------------------------------------------------
# Fused agent-step kernel: multi-layer LSTM + scoring + masked log_softmax
# ----------------------------------------------------------------------------
def _make_fused_step_kernel(num_layers, rpad):
    def kernel(*refs):
        x_ref, h_ref, c_ref, cand_ref, rel_ref = refs[:5]
        wrefs = refs[5:5 + 2 * num_layers]
        h_out_ref, c_out_ref, scores_ref, logsm_ref = refs[5 + 2 * num_layers:]

        Hp = h_ref.shape[-1]                      # padded hidden (multiple of 128)
        x = x_ref[...]                            # [B, Xp] (lane-padded state)
        for l in range(num_layers):
            w = wrefs[2 * l][...]                 # [Xp_l + Hp, 4*Hp] fused weights
            b = wrefs[2 * l + 1][...]             # [1, 4*Hp]
            h = h_ref[l]                          # [B, Hp]
            c = c_ref[l]                          # [B, Hp]
            # single fused matmul for input + recurrent contributions
            xh = jnp.concatenate([x, h], axis=-1)
            gates = jnp.dot(xh, w, preferred_element_type=jnp.float32) + b
            # 128-aligned gate slices (each gate block zero-padded to Hp lanes)
            i_g = jax.nn.sigmoid(gates[:, 0 * Hp:1 * Hp])
            f_g = jax.nn.sigmoid(gates[:, 1 * Hp:2 * Hp])
            g_g = jnp.tanh(gates[:, 2 * Hp:3 * Hp])
            o_g = jax.nn.sigmoid(gates[:, 3 * Hp:4 * Hp])
            c_new = f_g * c + i_g * g_g
            h_new = o_g * jnp.tanh(c_new)         # padded lanes stay exactly 0
            h_out_ref[l] = h_new
            c_out_ref[l] = c_new
            x = h_new

        # candidate-action scoring with the last layer's output (lane-padded)
        cand = cand_ref[...]                      # [B, A, Hp], zero-padded on D
        s = jnp.sum(cand * x[:, None, :], axis=-1)   # [B, A]
        mask = rel_ref[...] == rpad
        s = jnp.where(mask, _NEG, s)
        m = jnp.max(s, axis=-1, keepdims=True)
        lse = jnp.log(jnp.sum(jnp.exp(s - m), axis=-1, keepdims=True)) + m
        scores_ref[...] = s
        logsm_ref[...] = s - lse

    return kernel


@functools.lru_cache(maxsize=None)
def _get_fused_step_call(num_layers, B, A, Hp, rpad):
    kern = _make_fused_step_kernel(num_layers, rpad)
    n_in = 5 + 2 * num_layers
    return pl.pallas_call(
        kern,
        out_shape=(jax.ShapeDtypeStruct((num_layers, B, Hp), jnp.float32),
                   jax.ShapeDtypeStruct((num_layers, B, Hp), jnp.float32),
                   jax.ShapeDtypeStruct((B, A), jnp.float32),
                   jax.ShapeDtypeStruct((B, A), jnp.float32)),
        in_specs=_vmem_specs(n_in),
        out_specs=tuple(_vmem_specs(4)),
    )


def fused_policy_step(x, h, c, cand, rel_ids, layer_weights, rpad):
    L, B, Hp = h.shape
    A = rel_ids.shape[1]
    call = _get_fused_step_call(L, B, A, Hp, int(rpad))
    flat_w = [t for pair in layer_weights for t in pair]
    return call(x, h, c, cand, rel_ids, *flat_w)


# ----------------------------------------------------------------------------
# Judge kernels: fused dense+ReLU + 1-logit head; standalone 1-logit projection
# ----------------------------------------------------------------------------
def _classify_kernel(x_ref, w1_ref, b1_ref, wl_ref, bl_ref, rep_ref, logit_ref):
    rep = jnp.dot(x_ref[...], w1_ref[...], preferred_element_type=jnp.float32)
    rep = jnp.maximum(rep + b1_ref[...], 0.0)                  # [B, hidden]
    rep_ref[...] = rep
    # 1-logit head as VPU reduction (avoids an N=1 MXU matmul)
    logit_ref[...] = jnp.sum(rep * wl_ref[...], axis=-1, keepdims=True) + bl_ref[...]


def classify_fused(x, w1, b1, w_logit, b_logit):
    B = x.shape[0]
    Hh = w1.shape[1]
    rep, logit = pl.pallas_call(
        _classify_kernel,
        out_shape=(jax.ShapeDtypeStruct((B, Hh), jnp.float32),
                   jax.ShapeDtypeStruct((B, 1), jnp.float32)),
        in_specs=_vmem_specs(5),
        out_specs=tuple(_vmem_specs(2)),
    )(x, w1, b1, w_logit, b_logit)
    return logit, rep


def _proj1_kernel(x_ref, w_ref, b_ref, o_ref):
    o_ref[...] = jnp.sum(x_ref[...] * w_ref[...], axis=-1, keepdims=True) + b_ref[...]


def proj1(x, w_row, b):
    B = x.shape[0]
    return pl.pallas_call(
        _proj1_kernel,
        out_shape=jax.ShapeDtypeStruct((B, 1), jnp.float32),
        in_specs=_vmem_specs(3),
        out_specs=pl.BlockSpec(memory_space=pltpu.MemorySpace.VMEM),
    )(x, w_row, b)


# ----------------------------------------------------------------------------
# Judge (synthetic re-implementation of the external Judge interface)
# ----------------------------------------------------------------------------
class PallasJudge:
    # TODO(synk): the real Judge lives in a separate module; this is a minimal
    # synthetic judge with matching interfaces so Agent.forward runs end to end.
    def __init__(self, params, key):
        self.rPAD = params['relation_vocab']['PAD']
        self.path_length = params['path_length']
        self.embedding_size = params['embedding_size']
        self.use_entity_embeddings = params['use_entity_embeddings']
        self.m = 2 if self.use_entity_embeddings else 1
        E = self.embedding_size
        R = len(params['relation_vocab'])
        Ne = len(params['entity_vocab'])
        self.hidden = 64
        keys = jax.random.split(key, 5)
        self.rel_table = xavier_uniform(keys[0], (R, E))
        if self.use_entity_embeddings:
            self.ent_table = xavier_uniform(keys[1], (Ne, E))
        else:
            self.ent_table = jnp.zeros((Ne, E), jnp.float32)
        in_dim = self.path_length * self.m * E + 3 * E
        self.W1 = xavier_uniform(keys[2], (in_dim, self.hidden))
        self.b1 = jnp.zeros((1, self.hidden), jnp.float32)
        self.w_logit = xavier_uniform(keys[3], (1, self.hidden))
        self.b_logit = jnp.zeros((1, 1), jnp.float32)
        self.w_final = xavier_uniform(keys[4], (1, self.hidden))
        self.b_final = jnp.zeros((1, 1), jnp.float32)

    def set_query_embeddings(self, qs, qr, qo):
        self.q_subj = self.ent_table[qs]
        self.q_rel = self.rel_table[qr]
        self.q_obj = self.ent_table[qo]

    def set_labels(self, labels):
        self.labels = labels

    def action_encoder_judge(self, rel_ids, ent_ids):
        rel_emb = self.rel_table[rel_ids]
        ent_emb = self.ent_table[ent_ids]
        if self.use_entity_embeddings:
            return jnp.concatenate([rel_emb, ent_emb], axis=-1)
        return rel_emb

    def extend_argument(self, argument, t, action_idx, rel_seq, ent_seq, batch_indices):
        chosen_rel = rel_seq[batch_indices, action_idx]
        chosen_ent = ent_seq[batch_indices, action_idx]
        enc = self.action_encoder_judge(chosen_rel, chosen_ent)
        if t % self.path_length == 0:
            return enc
        return jnp.concatenate([argument, enc], axis=-1)

    def classify_argument(self, argument):
        x = jnp.concatenate([argument, self.q_subj, self.q_rel, self.q_obj], axis=-1)
        logits, rep = classify_fused(x, self.W1, self.b1, self.w_logit, self.b_logit)
        return logits, rep

    def final_loss(self, arguments_representations):
        avg = jnp.mean(jnp.stack(arguments_representations, axis=0), axis=0)
        final_logit = proj1(avg, self.w_final, self.b_final)
        z, y = final_logit, self.labels
        # BCEWithLogits
        loss = jnp.mean(jnp.maximum(z, 0.0) - z * y + jnp.log1p(jnp.exp(-jnp.abs(z))))
        return loss, final_logit


# ----------------------------------------------------------------------------
# Agent
# ----------------------------------------------------------------------------
class PallasAgent:
    def __init__(self, params, judge, key):
        self.judge = judge
        self.action_vocab_size = len(params['relation_vocab'])
        self.entity_vocab_size = len(params['entity_vocab'])
        self.embedding_size = params['embedding_size']
        self.ePAD = params['entity_vocab']['PAD']
        self.rPAD = params['relation_vocab']['PAD']
        self.test_rollouts = params['test_rollouts']
        self.path_length = params['path_length']
        self.batch_size = (params['batch_size']
                           * (1 + params['false_facts_train'])
                           * params['num_rollouts'])
        self.hidden_layers = params['layers_agent']
        self.custom_baseline = params['custom_baseline']
        self.use_entity_embeddings = params['use_entity_embeddings']
        self.m = 2 if self.use_entity_embeddings else 1
        E = self.embedding_size
        self.dummy_start_label = jnp.full(
            (self.batch_size,), params['relation_vocab']['DUMMY_START_RELATION'],
            dtype=jnp.int32)

        keys = jax.random.split(key, 8)
        # embeddings: xavier for relations; entities xavier iff use_entity_embeddings
        self.rel_table = [xavier_uniform(keys[0], (self.action_vocab_size, E)),
                          xavier_uniform(keys[1], (self.action_vocab_size, E))]
        if self.use_entity_embeddings:
            self.ent_table = [xavier_uniform(keys[2], (self.entity_vocab_size, E)),
                              xavier_uniform(keys[3], (self.entity_vocab_size, E))]
        else:
            self.ent_table = [jnp.zeros((self.entity_vocab_size, E), jnp.float32),
                              jnp.zeros((self.entity_vocab_size, E), jnp.float32)]

        # LSTM policy weights (PyTorch LSTM init: U(-1/sqrt(H), 1/sqrt(H)))
        H = self.m * E
        self.hidden_size = H
        self.hidden_pad = _pad128(H)          # Hp: gate block / state lane width
        # TODO(synk): the reference declares nn.LSTM(input_size=m*E, ...) but step()
        # feeds a state of size (m+3)*E to the first layer; we size the first
        # layer's input weights to (m+3)*E so the forward pass is runnable.
        in0 = (self.m + 3) * E
        self.in0 = in0
        self.in0_pad = _pad128(in0)
        bound = 1.0 / float(np.sqrt(H))
        Hp = self.hidden_pad

        def _lstm_params(k, in_dim):
            k1, k2, k3, k4 = jax.random.split(k, 4)
            w_ih = jax.random.uniform(k1, (in_dim, 4 * H), jnp.float32, -bound, bound)
            w_hh = jax.random.uniform(k2, (H, 4 * H), jnp.float32, -bound, bound)
            b = (jax.random.uniform(k3, (1, 4 * H), jnp.float32, -bound, bound)
                 + jax.random.uniform(k4, (1, 4 * H), jnp.float32, -bound, bound))
            return w_ih, w_hh, b

        def _fuse_pad(w_ih, w_hh, b, x_pad):
            # stack [W_ih; W_hh] and zero-pad each gate block to Hp lanes so
            # the kernel only does one matmul and 128-aligned gate slices.
            in_dim = w_ih.shape[0]
            W = jnp.zeros((x_pad + Hp, 4 * Hp), jnp.float32)
            bp = jnp.zeros((1, 4 * Hp), jnp.float32)
            for g in range(4):
                W = W.at[:in_dim, g * Hp:g * Hp + H].set(w_ih[:, g * H:(g + 1) * H])
                W = W.at[x_pad:x_pad + H, g * Hp:g * Hp + H].set(w_hh[:, g * H:(g + 1) * H])
                bp = bp.at[:, g * Hp:g * Hp + H].set(b[:, g * H:(g + 1) * H])
            return W, bp

        self.policy_params = []   # [agent][layer] -> (W_fused, b_fused)
        for a in range(2):
            layer_keys = jax.random.split(keys[4 + a], self.hidden_layers)
            layers = []
            for l in range(self.hidden_layers):
                in_dim = in0 if l == 0 else H
                x_pad = self.in0_pad if l == 0 else Hp
                w_ih, w_hh, b = _lstm_params(layer_keys[l], in_dim)
                layers.append(_fuse_pad(w_ih, w_hh, b, x_pad))
            self.policy_params.append(layers)

    # ---------------------------------------------------------------- helpers
    def init_hidden(self, B):
        Hp = self.hidden_pad
        L = self.hidden_layers
        z = lambda: jnp.zeros((L, B, Hp), jnp.float32)
        return ((z(), z()), (z(), z()))

    def set_query_embeddings(self, query_subject, query_relation, query_object):
        self.query_subject_embedding = [self.ent_table[0][query_subject],
                                        self.ent_table[1][query_subject]]
        self.query_relation_embedding = [self.rel_table[0][query_relation],
                                         self.rel_table[1][query_relation]]
        self.query_object_embedding = [self.ent_table[0][query_object],
                                       self.ent_table[1][query_object]]

    def action_encoder_agent(self, next_relations, current_entities, which_agent):
        a = 0 if which_agent == 0 else 1
        rel_emb = self.rel_table[a][next_relations]
        ent_emb = self.ent_table[a][current_entities]
        if self.use_entity_embeddings:
            return jnp.concatenate([rel_emb, ent_emb], axis=-1)
        return rel_emb

    def step(self, next_relations, next_entities, hidden_states, prev_relation,
             current_entities, which_agent, random_flag, key):
        B = next_relations.shape[0]
        a = 0 if which_agent == 0 else 1
        prev_entity = self.ent_table[a][current_entities]
        prev_relation_emb = self.rel_table[a][prev_relation]
        q_s = self.query_subject_embedding[a]
        q_r = self.query_relation_embedding[a]
        q_o = self.query_object_embedding[a]
        if self.use_entity_embeddings:
            state = jnp.concatenate([prev_relation_emb, prev_entity], axis=-1)
        else:
            state = prev_relation_emb
        state = jnp.concatenate([state, q_s, q_r, q_o], axis=-1)
        state = jnp.pad(state, ((0, 0), (0, self.in0_pad - state.shape[-1])))

        candidate_actions = self.action_encoder_agent(next_relations, next_entities,
                                                      which_agent)
        candidate_actions = jnp.pad(
            candidate_actions,
            ((0, 0), (0, 0), (0, self.hidden_pad - candidate_actions.shape[-1])))

        (h1, c1), (h2, c2) = hidden_states
        h_cur, c_cur = (h1, c1) if a == 0 else (h2, c2)

        # One fused Pallas kernel: all LSTM layers + scoring + masked log_softmax.
        h_new, c_new, scores, log_probs = fused_policy_step(
            state, h_cur, c_cur, candidate_actions,
            next_relations.astype(jnp.int32), self.policy_params[a], self.rPAD)

        if a == 0:
            new_hidden = ((h_new, c_new), (h2, c2))
        else:
            new_hidden = ((h1, c1), (h_new, c_new))

        if random_flag:
            mask = next_relations == self.rPAD
            sample_logits = jnp.where(mask, jnp.float32(_NEG), jnp.float32(0.0))
            sample_logsm = jax.nn.log_softmax(sample_logits, axis=-1)
        else:
            sample_logits = scores
            sample_logsm = log_probs

        action = jax.random.categorical(key, sample_logits, axis=-1)
        batch_indices = jnp.arange(B)
        loss = -sample_logsm[batch_indices, action]
        chosen_relation = next_relations[batch_indices, action]
        return loss, new_hidden, log_probs, action, chosen_relation

    def forward(self, which_agent, candidate_relation_sequence,
                candidate_entity_sequence, current_entities, T=3,
                random_flag=False, key=None):
        B = candidate_relation_sequence[0].shape[0]
        hidden_states = self.init_hidden(B)
        prev_relation = self.dummy_start_label
        argument = self.judge.action_encoder_judge(prev_relation, prev_relation)

        all_loss, all_logits, action_idx = [], [], []
        all_temp_logits_judge, arguments_representations = [], []
        all_rewards_agents, all_rewards_before_baseline = [], []

        step_keys = jax.random.split(key, T)
        for t in range(T):
            next_relations = candidate_relation_sequence[t]
            next_entities = candidate_entity_sequence[t]
            current_ents = current_entities[t]
            which_agent_t = which_agent[t]
            loss, hidden_states, logits, idx, chosen_relation = self.step(
                next_relations, next_entities, hidden_states, prev_relation,
                current_ents, which_agent_t, random_flag, step_keys[t])
            all_loss.append(loss)
            all_logits.append(logits)
            action_idx.append(idx)
            prev_relation = chosen_relation
            batch_indices = jnp.arange(B)
            argument = self.judge.extend_argument(
                argument, t, idx, candidate_relation_sequence[t],
                candidate_entity_sequence[t], batch_indices)
            if t % self.path_length != self.path_length - 1:
                all_temp_logits_judge.append(jnp.zeros((B, 1), jnp.float32))
                temp_rewards = jnp.zeros((B, 1), jnp.float32)
                all_rewards_before_baseline.append(temp_rewards)
                all_rewards_agents.append(temp_rewards)
            else:
                logits_judge, rep_argu = self.judge.classify_argument(argument)
                rewards = jax.nn.sigmoid(logits_judge)
                all_temp_logits_judge.append(logits_judge)
                arguments_representations.append(rep_argu)
                all_rewards_before_baseline.append(rewards)
                if self.custom_baseline:
                    no_op_arg = self.judge.action_encoder_judge(prev_relation,
                                                                prev_relation)
                    for i in range(self.path_length):
                        no_op_arg = self.judge.extend_argument(
                            no_op_arg, i, jnp.zeros_like(idx),
                            candidate_relation_sequence[0],
                            candidate_entity_sequence[0], batch_indices)
                    no_op_logits, _ = self.judge.classify_argument(no_op_arg)
                    rewards_no_op = jax.nn.sigmoid(no_op_logits)
                    all_rewards_agents.append(rewards - rewards_no_op)
                else:
                    all_rewards_agents.append(rewards)

        loss_judge, final_logit_judge = self.judge.final_loss(arguments_representations)
        return (loss_judge, final_logit_judge, all_temp_logits_judge, all_loss,
                all_logits, action_idx, all_rewards_agents,
                all_rewards_before_baseline)


# ----------------------------------------------------------------------------
# main
# ----------------------------------------------------------------------------
if __name__ == "__main__":
    key = jax.random.PRNGKey(0)

    E = 32          # embedding_size
    A = 8           # max_num_actions
    T = 3
    B_base, false_facts, num_rollouts = 4, 0, 2

    relation_vocab = {'PAD': 0, 'DUMMY_START_RELATION': 1}
    for i in range(2, 16):
        relation_vocab[f'r{i}'] = i
    entity_vocab = {'PAD': 0}
    for i in range(1, 20):
        entity_vocab[f'e{i}'] = i

    params = {
        'relation_vocab': relation_vocab,
        'entity_vocab': entity_vocab,
        'embedding_size': E,
        'train_entity_embeddings': True,
        'train_relation_embeddings': True,
        'test_rollouts': 1,
        'path_length': 3,
        'batch_size': B_base,
        'false_facts_train': false_facts,
        'num_rollouts': num_rollouts,
        'layers_agent': 2,
        'custom_baseline': False,
        'use_entity_embeddings': True,
    }
    B = B_base * (1 + false_facts) * num_rollouts   # 8
    R = len(relation_vocab)
    Ne = len(entity_vocab)

    k_judge, k_agent, k_data, k_fwd = jax.random.split(key, 4)
    judge = PallasJudge(params, k_judge)
    agent = PallasAgent(params, judge, k_agent)

    data_keys = jax.random.split(k_data, 4 * T + 4)
    cand_rel_seq, cand_ent_seq, curr_ent_seq = [], [], []
    for t in range(T):
        kr, kp, ke, kc = data_keys[4 * t:4 * t + 4]
        rel = jax.random.randint(kr, (B, A), 1, R, dtype=jnp.int32)
        pad = jax.random.bernoulli(kp, 0.3, (B, A))
        pad = pad.at[:, 0].set(False)          # guarantee >=1 valid action per row
        rel = jnp.where(pad, relation_vocab['PAD'], rel)
        ent = jax.random.randint(ke, (B, A), 0, Ne, dtype=jnp.int32)
        cur = jax.random.randint(kc, (B,), 0, Ne, dtype=jnp.int32)
        cand_rel_seq.append(rel)
        cand_ent_seq.append(ent)
        curr_ent_seq.append(cur)

    kq1, kq2, kq3, kl = data_keys[4 * T:]
    query_subject = jax.random.randint(kq1, (B,), 1, Ne, dtype=jnp.int32)
    query_relation = jax.random.randint(kq2, (B,), 1, R, dtype=jnp.int32)
    query_object = jax.random.randint(kq3, (B,), 1, Ne, dtype=jnp.int32)
    labels = jax.random.bernoulli(kl, 0.5, (B, 1)).astype(jnp.float32)

    agent.set_query_embeddings(query_subject, query_relation, query_object)
    judge.set_query_embeddings(query_subject, query_relation, query_object)
    judge.set_labels(labels)

    which_agent = [0, 1, 0]   # static Python ints (weight selection per step)

    # Jit the whole forward: Pallas kernels + JAX glue compile to one program,
    # eliminating per-op dispatch overhead in this launch-latency-bound regime.
    forward_fn = jax.jit(
        lambda cr, ce, cu, k: agent.forward(which_agent, cr, ce, cu, T=T,
                                            random_flag=False, key=k))
    out = forward_fn(cand_rel_seq, cand_ent_seq, curr_ent_seq, k_fwd)
    jax.block_until_ready(out)
    print("KERNEL_OK")
</pallas_src>

<mosaic_0001>
module attributes {stable_mosaic.version = 11 : i64} {
  func.func @kernel(%arg0: memref<8x256xf32, #tpu.memory_space<vmem>>, %arg1: memref<2x8x128xf32, #tpu.memory_space<vmem>>, %arg2: memref<2x8x128xf32, #tpu.memory_space<vmem>>, %arg3: memref<8x8x128xf32, #tpu.memory_space<vmem>>, %arg4: memref<8x8xi32, #tpu.memory_space<vmem>>, %arg5: memref<384x512xf32, #tpu.memory_space<vmem>>, %arg6: memref<1x512xf32, #tpu.memory_space<vmem>>, %arg7: memref<256x512xf32, #tpu.memory_space<vmem>>, %arg8: memref<1x512xf32, #tpu.memory_space<vmem>>, %arg9: memref<2x8x128xf32, #tpu.memory_space<vmem>>, %arg10: memref<2x8x128xf32, #tpu.memory_space<vmem>>, %arg11: memref<8x8xf32, #tpu.memory_space<vmem>>, %arg12: memref<8x8xf32, #tpu.memory_space<vmem>>) attributes {dimension_semantics = [], scalar_prefetch = 0 : i64, scratch_operands = 0 : i64, tpu.core_type = #tpu.core_type<tc>} {
    %c0 = arith.constant 0 : index
    %c0_0 = arith.constant 0 : index
    %0 = vector.load %arg0[%c0, %c0_0] : memref<8x256xf32, #tpu.memory_space<vmem>>, vector<8x256xf32>
    %c0_1 = arith.constant 0 : index
    %c0_2 = arith.constant 0 : index
    %1 = vector.load %arg5[%c0_1, %c0_2] : memref<384x512xf32, #tpu.memory_space<vmem>>, vector<384x512xf32>
    %c0_3 = arith.constant 0 : index
    %c0_4 = arith.constant 0 : index
    %2 = vector.load %arg6[%c0_3, %c0_4] : memref<1x512xf32, #tpu.memory_space<vmem>>, vector<1x512xf32>
    %c0_5 = arith.constant 0 : index
    %c0_6 = arith.constant 0 : index
    %c0_7 = arith.constant 0 : index
    %3 = vector.load %arg1[%c0_5, %c0_6, %c0_7] : memref<2x8x128xf32, #tpu.memory_space<vmem>>, vector<1x8x128xf32>
    %4 = vector.shape_cast %3 : vector<1x8x128xf32> to vector<8x128xf32>
    %c0_8 = arith.constant 0 : index
    %c0_9 = arith.constant 0 : index
    %c0_10 = arith.constant 0 : index
    %5 = vector.load %arg2[%c0_8, %c0_9, %c0_10] : memref<2x8x128xf32, #tpu.memory_space<vmem>>, vector<1x8x128xf32>
    %6 = vector.shape_cast %5 : vector<1x8x128xf32> to vector<8x128xf32>
    %7 = tpu.concatenate %0, %4 in 1 : vector<8x256xf32>, vector<8x128xf32> -> vector<8x384xf32>
    %cst = arith.constant dense<0.000000e+00> : vector<8x512xf32>
    %8 = tpu.matmul %7, %1, %cst {dimension_numbers = #tpu.dot_dimension_numbers<[1], [0], [0], [1], [0, 0, 1, 1], [], []>} : vector<8x384xf32>, vector<384x512xf32>, vector<8x512xf32> -> vector<8x512xf32>
    %9 = vector.broadcast %2 : vector<1x512xf32> to vector<8x512xf32>
    %10 = arith.addf %8, %9 : vector<8x512xf32>
    %11 = vector.extract_strided_slice %10 {offsets = [0, 0], sizes = [8, 128], strides = [1, 1]} : vector<8x512xf32> to vector<8x128xf32>
    %12 = arith.negf %11 : vector<8x128xf32>
    %13 = math.exp %12 : vector<8x128xf32>
    %cst_11 = arith.constant 1.000000e+00 : f32
    %14 = vector.broadcast %cst_11 : f32 to vector<8x128xf32>
    %15 = arith.addf %14, %13 : vector<8x128xf32>
    %16 = arith.divf %14, %15 : vector<8x128xf32>
    %17 = vector.extract_strided_slice %10 {offsets = [0, 128], sizes = [8, 128], strides = [1, 1]} : vector<8x512xf32> to vector<8x128xf32>
    %18 = arith.negf %17 : vector<8x128xf32>
    %19 = math.exp %18 : vector<8x128xf32>
    %cst_12 = arith.constant 1.000000e+00 : f32
    %20 = vector.broadcast %cst_12 : f32 to vector<8x128xf32>
    %21 = arith.addf %20, %19 : vector<8x128xf32>
    %22 = arith.divf %20, %21 : vector<8x128xf32>
    %23 = vector.extract_strided_slice %10 {offsets = [0, 256], sizes = [8, 128], strides = [1, 1]} : vector<8x512xf32> to vector<8x128xf32>
    %24 = math.tanh %23 : vector<8x128xf32>
    %25 = vector.extract_strided_slice %10 {offsets = [0, 384], sizes = [8, 128], strides = [1, 1]} : vector<8x512xf32> to vector<8x128xf32>
    %26 = arith.negf %25 : vector<8x128xf32>
    %27 = math.exp %26 : vector<8x128xf32>
    %cst_13 = arith.constant 1.000000e+00 : f32
    %28 = vector.broadcast %cst_13 : f32 to vector<8x128xf32>
    %29 = arith.addf %28, %27 : vector<8x128xf32>
    %30 = arith.divf %28, %29 : vector<8x128xf32>
    %31 = arith.mulf %22, %6 : vector<8x128xf32>
    %32 = arith.mulf %16, %24 : vector<8x128xf32>
    %33 = arith.addf %31, %32 : vector<8x128xf32>
    %34 = math.tanh %33 : vector<8x128xf32>
    %35 = arith.mulf %30, %34 : vector<8x128xf32>
    %c0_14 = arith.constant 0 : index
    %c0_15 = arith.constant 0 : index
    %c0_16 = arith.constant 0 : index
    %36 = vector.load %arg9[%c0_14, %c0_15, %c0_16] : memref<2x8x128xf32, #tpu.memory_space<vmem>>, vector<1x8x128xf32>
    %37 = vector.shape_cast %36 : vector<1x8x128xf32> to vector<8x128xf32>
    %38 = vector.shape_cast %35 : vector<8x128xf32> to vector<1x8x128xf32>
    tpu.vector_store %arg9[%c0_14, %c0_15, %c0_16], %38 {strides = array<i32>} : memref<2x8x128xf32, #tpu.memory_space<vmem>>, vector<1x8x128xf32>,
    %c0_17 = arith.constant 0 : index
    %c0_18 = arith.constant 0 : index
    %c0_19 = arith.constant 0 : index
    %39 = vector.load %arg10[%c0_17, %c0_18, %c0_19] : memref<2x8x128xf32, #tpu.memory_space<vmem>>, vector<1x8x128xf32>
    %40 = vector.shape_cast %39 : vector<1x8x128xf32> to vector<8x128xf32>
    %41 = vector.shape_cast %33 : vector<8x128xf32> to vector<1x8x128xf32>
    tpu.vector_store %arg10[%c0_17, %c0_18, %c0_19], %41 {strides = array<i32>} : memref<2x8x128xf32, #tpu.memory_space<vmem>>, vector<1x8x128xf32>,
    %c0_20 = arith.constant 0 : index
    %c0_21 = arith.constant 0 : index
    %42 = vector.load %arg7[%c0_20, %c0_21] : memref<256x512xf32, #tpu.memory_space<vmem>>, vector<256x512xf32>
    %c0_22 = arith.constant 0 : index
    %c0_23 = arith.constant 0 : index
    %43 = vector.load %arg8[%c0_22, %c0_23] : memref<1x512xf32, #tpu.memory_space<vmem>>, vector<1x512xf32>
    %c1 = arith.constant 1 : index
    %c0_24 = arith.constant 0 : index
    %c0_25 = arith.constant 0 : index
    %44 = vector.load %arg1[%c1, %c0_24, %c0_25] : memref<2x8x128xf32, #tpu.memory_space<vmem>>, vector<1x8x128xf32>
    %45 = vector.shape_cast %44 : vector<1x8x128xf32> to vector<8x128xf32>
    %c1_26 = arith.constant 1 : index
    %c0_27 = arith.constant 0 : index
    %c0_28 = arith.constant 0 : index
    %46 = vector.load %arg2[%c1_26, %c0_27, %c0_28] : memref<2x8x128xf32, #tpu.memory_space<vmem>>, vector<1x8x128xf32>
    %47 = vector.shape_cast %46 : vector<1x8x128xf32> to vector<8x128xf32>
    %48 = tpu.concatenate %35, %45 in 1 : vector<8x128xf32>, vector<8x128xf32> -> vector<8x256xf32>
    %cst_29 = arith.constant dense<0.000000e+00> : vector<8x512xf32>
    %49 = tpu.matmul %48, %42, %cst_29 {dimension_numbers = #tpu.dot_dimension_numbers<[1], [0], [0], [1], [0, 0, 1, 1], [], []>} : vector<8x256xf32>, vector<256x512xf32>, vector<8x512xf32> -> vector<8x512xf32>
    %50 = vector.broadcast %43 : vector<1x512xf32> to vector<8x512xf32>
    %51 = arith.addf %49, %50 : vector<8x512xf32>
    %52 = vector.extract_strided_slice %51 {offsets = [0, 0], sizes = [8, 128], strides = [1, 1]} : vector<8x512xf32> to vector<8x128xf32>
    %53 = arith.negf %52 : vector<8x128xf32>
    %54 = math.exp %53 : vector<8x128xf32>
    %cst_30 = arith.constant 1.000000e+00 : f32
    %55 = vector.broadcast %cst_30 : f32 to vector<8x128xf32>
    %56 = arith.addf %55, %54 : vector<8x128xf32>
    %57 = arith.divf %55, %56 : vector<8x128xf32>
    %58 = vector.extract_strided_slice %51 {offsets = [0, 128], sizes = [8, 128], strides = [1, 1]} : vector<8x512xf32> to vector<8x128xf32>
    %59 = arith.negf %58 : vector<8x128xf32>
    %60 = math.exp %59 : vector<8x128xf32>
    %cst_31 = arith.constant 1.000000e+00 : f32
    %61 = vector.broadcast %cst_31 : f32 to vector<8x128xf32>
    %62 = arith.addf %61, %60 : vector<8x128xf32>
    %63 = arith.divf %61, %62 : vector<8x128xf32>
    %64 = vector.extract_strided_slice %51 {offsets = [0, 256], sizes = [8, 128], strides = [1, 1]} : vector<8x512xf32> to vector<8x128xf32>
    %65 = math.tanh %64 : vector<8x128xf32>
    %66 = vector.extract_strided_slice %51 {offsets = [0, 384], sizes = [8, 128], strides = [1, 1]} : vector<8x512xf32> to vector<8x128xf32>
    %67 = arith.negf %66 : vector<8x128xf32>
    %68 = math.exp %67 : vector<8x128xf32>
    %cst_32 = arith.constant 1.000000e+00 : f32
    %69 = vector.broadcast %cst_32 : f32 to vector<8x128xf32>
    %70 = arith.addf %69, %68 : vector<8x128xf32>
    %71 = arith.divf %69, %70 : vector<8x128xf32>
    %72 = arith.mulf %63, %47 : vector<8x128xf32>
    %73 = arith.mulf %57, %65 : vector<8x128xf32>
    %74 = arith.addf %72, %73 : vector<8x128xf32>
    %75 = math.tanh %74 : vector<8x128xf32>
    %76 = arith.mulf %71, %75 : vector<8x128xf32>
    %c1_33 = arith.constant 1 : index
    %c0_34 = arith.constant 0 : index
    %c0_35 = arith.constant 0 : index
    %77 = vector.load %arg9[%c1_33, %c0_34, %c0_35] : memref<2x8x128xf32, #tpu.memory_space<vmem>>, vector<1x8x128xf32>
    %78 = vector.shape_cast %77 : vector<1x8x128xf32> to vector<8x128xf32>
    %79 = vector.shape_cast %76 : vector<8x128xf32> to vector<1x8x128xf32>
    tpu.vector_store %arg9[%c1_33, %c0_34, %c0_35], %79 {strides = array<i32>} : memref<2x8x128xf32, #tpu.memory_space<vmem>>, vector<1x8x128xf32>,
    %c1_36 = arith.constant 1 : index
    %c0_37 = arith.constant 0 : index
    %c0_38 = arith.constant 0 : index
    %80 = vector.load %arg10[%c1_36, %c0_37, %c0_38] : memref<2x8x128xf32, #tpu.memory_space<vmem>>, vector<1x8x128xf32>
    %81 = vector.shape_cast %80 : vector<1x8x128xf32> to vector<8x128xf32>
    %82 = vector.shape_cast %74 : vector<8x128xf32> to vector<1x8x128xf32>
    tpu.vector_store %arg10[%c1_36, %c0_37, %c0_38], %82 {strides = array<i32>} : memref<2x8x128xf32, #tpu.memory_space<vmem>>, vector<1x8x128xf32>,
    %c0_39 = arith.constant 0 : index
    %c0_40 = arith.constant 0 : index
    %c0_41 = arith.constant 0 : index
    %83 = vector.load %arg3[%c0_39, %c0_40, %c0_41] : memref<8x8x128xf32, #tpu.memory_space<vmem>>, vector<8x8x128xf32>
    %84 = vector.shape_cast %76 : vector<8x128xf32> to vector<8x1x128xf32>
    %85 = vector.broadcast %84 : vector<8x1x128xf32> to vector<8x8x128xf32>
    %86 = arith.mulf %83, %85 : vector<8x8x128xf32>
    %cst_42 = arith.constant dense<0.000000e+00> : vector<8x8xf32>
    %87 = vector.multi_reduction <add>, %86, %cst_42 [2] : vector<8x8x128xf32> to vector<8x8xf32>
    %c0_43 = arith.constant 0 : index
    %c0_44 = arith.constant 0 : index
    %88 = vector.load %arg4[%c0_43, %c0_44] : memref<8x8xi32, #tpu.memory_space<vmem>>, vector<8x8xi32>
    %c0_i32 = arith.constant 0 : i32
    %89 = vector.broadcast %c0_i32 : i32 to vector<8x8xi32>
    %90 = arith.cmpi eq, %88, %89 : vector<8x8xi32>
    %cst_45 = arith.constant -1.000000e+30 : f32
    %91 = vector.broadcast %cst_45 : f32 to vector<8x8xf32>
    %92 = arith.select %90, %91, %87 : vector<8x8xi1>, vector<8x8xf32>
    %cst_46 = arith.constant dense<0xFF800000> : vector<8xf32>
    %93 = vector.multi_reduction <maximumf>, %92, %cst_46 [1] : vector<8x8xf32> to vector<8xf32>
    %94 = vector.shape_cast %93 : vector<8xf32> to vector<8x1xf32>
    %95 = vector.broadcast %94 : vector<8x1xf32> to vector<8x8xf32>
    %96 = arith.subf %92, %95 : vector<8x8xf32>
    %97 = math.exp %96 : vector<8x8xf32>
    %cst_47 = arith.constant dense<0.000000e+00> : vector<8xf32>
    %98 = vector.multi_reduction <add>, %97, %cst_47 [1] : vector<8x8xf32> to vector<8xf32>
    %99 = vector.shape_cast %98 : vector<8xf32> to vector<8x1xf32>
    %100 = math.log %99 : vector<8x1xf32>
    %101 = arith.addf %100, %94 : vector<8x1xf32>
    %c0_48 = arith.constant 0 : index
    %c0_49 = arith.constant 0 : index
    %102 = vector.load %arg11[%c0_48, %c0_49] : memref<8x8xf32, #tpu.memory_space<vmem>>, vector<8x8xf32>
    tpu.vector_store %arg11[%c0_48, %c0_49], %92 {strides = array<i32>} : memref<8x8xf32, #tpu.memory_space<vmem>>, vector<8x8xf32>,
    %103 = vector.broadcast %101 : vector<8x1xf32> to vector<8x8xf32>
    %104 = arith.subf %92, %103 : vector<8x8xf32>
    %c0_50 = arith.constant 0 : index
    %c0_51 = arith.constant 0 : index
    %105 = vector.load %arg12[%c0_50, %c0_51] : memref<8x8xf32, #tpu.memory_space<vmem>>, vector<8x8xf32>
    tpu.vector_store %arg12[%c0_50, %c0_51], %104 {strides = array<i32>} : memref<8x8xf32, #tpu.memory_space<vmem>>, vector<8x8xf32>,
    return
  }
}

module attributes {stable_mosaic.version = 11 : i64} {
  func.func @kernel(%arg0: memref<8x256xf32, #tpu.memory_space<vmem>>, %arg1: memref<2x8x128xf32, #tpu.memory_space<vmem>>, %arg2: memref<2x8x128xf32, #tpu.memory_space<vmem>>, %arg3: memref<8x8x128xf32, #tpu.memory_space<vmem>>, %arg4: memref<8x8xi32, #tpu.memory_space<vmem>>, %arg5: memref<384x512xf32, #tpu.memory_space<vmem>>, %arg6: memref<1x512xf32, #tpu.memory_space<vmem>>, %arg7: memref<256x512xf32, #tpu.memory_space<vmem>>, %arg8: memref<1x512xf32, #tpu.memory_space<vmem>>, %arg9: memref<2x8x128xf32, #tpu.memory_space<vmem>>, %arg10: memref<2x8x128xf32, #tpu.memory_space<vmem>>, %arg11: memref<8x8xf32, #tpu.memory_space<vmem>>, %arg12: memref<8x8xf32, #tpu.memory_space<vmem>>) attributes {dimension_semantics = [], scalar_prefetch = 0 : i64, scratch_operands = 0 : i64, tpu.core_type = #tpu.core_type<tc>} {
    %c0 = arith.constant 0 : index
    %c0_0 = arith.constant 0 : index
    %0 = vector.load %arg0[%c0, %c0_0] : memref<8x256xf32, #tpu.memory_space<vmem>>, vector<8x256xf32>
    %c0_1 = arith.constant 0 : index
    %c0_2 = arith.constant 0 : index
    %1 = vector.load %arg5[%c0_1, %c0_2] : memref<384x512xf32, #tpu.memory_space<vmem>>, vector<384x512xf32>
    %c0_3 = arith.constant 0 : index
    %c0_4 = arith.constant 0 : index
    %2 = vector.load %arg6[%c0_3, %c0_4] : memref<1x512xf32, #tpu.memory_space<vmem>>, vector<1x512xf32>
    %c0_5 = arith.constant 0 : index
    %c0_6 = arith.constant 0 : index
    %c0_7 = arith.constant 0 : index
    %3 = vector.load %arg1[%c0_5, %c0_6, %c0_7] : memref<2x8x128xf32, #tpu.memory_space<vmem>>, vector<1x8x128xf32>
    %4 = vector.shape_cast %3 : vector<1x8x128xf32> to vector<8x128xf32>
    %c0_8 = arith.constant 0 : index
    %c0_9 = arith.constant 0 : index
    %c0_10 = arith.constant 0 : index
    %5 = vector.load %arg2[%c0_8, %c0_9, %c0_10] : memref<2x8x128xf32, #tpu.memory_space<vmem>>, vector<1x8x128xf32>
    %6 = vector.shape_cast %5 : vector<1x8x128xf32> to vector<8x128xf32>
    %7 = tpu.concatenate %0, %4 in 1 : vector<8x256xf32>, vector<8x128xf32> -> vector<8x384xf32>
    %cst = arith.constant dense<0.000000e+00> : vector<8x512xf32>
    %8 = tpu.matmul %7, %1, %cst {dimension_numbers = #tpu.dot_dimension_numbers<[1], [0], [0], [1], [0, 0, 1, 1], [], []>} : vector<8x384xf32>, vector<384x512xf32>, vector<8x512xf32> -> vector<8x512xf32>
    %9 = vector.broadcast %2 : vector<1x512xf32> to vector<8x512xf32>
    %10 = arith.addf %8, %9 : vector<8x512xf32>
    %11 = vector.extract_strided_slice %10 {offsets = [0, 0], sizes = [8, 128], strides = [1, 1]} : vector<8x512xf32> to vector<8x128xf32>
    %12 = arith.negf %11 : vector<8x128xf32>
    %13 = math.exp %12 : vector<8x128xf32>
    %cst_11 = arith.constant 1.000000e+00 : f32
    %14 = vector.broadcast %cst_11 : f32 to vector<8x128xf32>
    %15 = arith.addf %14, %13 : vector<8x128xf32>
    %16 = arith.divf %14, %15 : vector<8x128xf32>
    %17 = vector.extract_strided_slice %10 {offsets = [0, 128], sizes = [8, 128], strides = [1, 1]} : vector<8x512xf32> to vector<8x128xf32>
    %18 = arith.negf %17 : vector<8x128xf32>
    %19 = math.exp %18 : vector<8x128xf32>
    %cst_12 = arith.constant 1.000000e+00 : f32
    %20 = vector.broadcast %cst_12 : f32 to vector<8x128xf32>
    %21 = arith.addf %20, %19 : vector<8x128xf32>
    %22 = arith.divf %20, %21 : vector<8x128xf32>
    %23 = vector.extract_strided_slice %10 {offsets = [0, 256], sizes = [8, 128], strides = [1, 1]} : vector<8x512xf32> to vector<8x128xf32>
    %24 = math.tanh %23 : vector<8x128xf32>
    %25 = vector.extract_strided_slice %10 {offsets = [0, 384], sizes = [8, 128], strides = [1, 1]} : vector<8x512xf32> to vector<8x128xf32>
    %26 = arith.negf %25 : vector<8x128xf32>
    %27 = math.exp %26 : vector<8x128xf32>
    %cst_13 = arith.constant 1.000000e+00 : f32
    %28 = vector.broadcast %cst_13 : f32 to vector<8x128xf32>
    %29 = arith.addf %28, %27 : vector<8x128xf32>
    %30 = arith.divf %28, %29 : vector<8x128xf32>
    %31 = arith.mulf %22, %6 : vector<8x128xf32>
    %32 = arith.mulf %16, %24 : vector<8x128xf32>
    %33 = arith.addf %31, %32 : vector<8x128xf32>
    %34 = math.tanh %33 : vector<8x128xf32>
    %35 = arith.mulf %30, %34 : vector<8x128xf32>
    %c0_14 = arith.constant 0 : index
    %c0_15 = arith.constant 0 : index
    %c0_16 = arith.constant 0 : index
    %36 = vector.load %arg9[%c0_14, %c0_15, %c0_16] : memref<2x8x128xf32, #tpu.memory_space<vmem>>, vector<1x8x128xf32>
    %37 = vector.shape_cast %36 : vector<1x8x128xf32> to vector<8x128xf32>
    %38 = vector.shape_cast %35 : vector<8x128xf32> to vector<1x8x128xf32>
    tpu.vector_store %arg9[%c0_14, %c0_15, %c0_16], %38 {strides = array<i32>} : memref<2x8x128xf32, #tpu.memory_space<vmem>>, vector<1x8x128xf32>,
    %c0_17 = arith.constant 0 : index
    %c0_18 = arith.constant 0 : index
    %c0_19 = arith.constant 0 : index
    %39 = vector.load %arg10[%c0_17, %c0_18, %c0_19] : memref<2x8x128xf32, #tpu.memory_space<vmem>>, vector<1x8x128xf32>
    %40 = vector.shape_cast %39 : vector<1x8x128xf32> to vector<8x128xf32>
    %41 = vector.shape_cast %33 : vector<8x128xf32> to vector<1x8x128xf32>
    tpu.vector_store %arg10[%c0_17, %c0_18, %c0_19], %41 {strides = array<i32>} : memref<2x8x128xf32, #tpu.memory_space<vmem>>, vector<1x8x128xf32>,
    %c0_20 = arith.constant 0 : index
    %c0_21 = arith.constant 0 : index
    %42 = vector.load %arg7[%c0_20, %c0_21] : memref<256x512xf32, #tpu.memory_space<vmem>>, vector<256x512xf32>
    %c0_22 = arith.constant 0 : index
    %c0_23 = arith.constant 0 : index
    %43 = vector.load %arg8[%c0_22, %c0_23] : memref<1x512xf32, #tpu.memory_space<vmem>>, vector<1x512xf32>
    %c1 = arith.constant 1 : index
    %c0_24 = arith.constant 0 : index
    %c0_25 = arith.constant 0 : index
    %44 = vector.load %arg1[%c1, %c0_24, %c0_25] : memref<2x8x128xf32, #tpu.memory_space<vmem>>, vector<1x8x128xf32>
    %45 = vector.shape_cast %44 : vector<1x8x128xf32> to vector<8x128xf32>
    %c1_26 = arith.constant 1 : index
    %c0_27 = arith.constant 0 : index
    %c0_28 = arith.constant 0 : index
    %46 = vector.load %arg2[%c1_26, %c0_27, %c0_28] : memref<2x8x128xf32, #tpu.memory_space<vmem>>, vector<1x8x128xf32>
    %47 = vector.shape_cast %46 : vector<1x8x128xf32> to vector<8x128xf32>
    %48 = tpu.concatenate %35, %45 in 1 : vector<8x128xf32>, vector<8x128xf32> -> vector<8x256xf32>
    %cst_29 = arith.constant dense<0.000000e+00> : vector<8x512xf32>
    %49 = tpu.matmul %48, %42, %cst_29 {dimension_numbers = #tpu.dot_dimension_numbers<[1], [0], [0], [1], [0, 0, 1, 1], [], []>} : vector<8x256xf32>, vector<256x512xf32>, vector<8x512xf32> -> vector<8x512xf32>
    %50 = vector.broadcast %43 : vector<1x512xf32> to vector<8x512xf32>
    %51 = arith.addf %49, %50 : vector<8x512xf32>
    %52 = vector.extract_strided_slice %51 {offsets = [0, 0], sizes = [8, 128], strides = [1, 1]} : vector<8x512xf32> to vector<8x128xf32>
    %53 = arith.negf %52 : vector<8x128xf32>
    %54 = math.exp %53 : vector<8x128xf32>
    %cst_30 = arith.constant 1.000000e+00 : f32
    %55 = vector.broadcast %cst_30 : f32 to vector<8x128xf32>
    %56 = arith.addf %55, %54 : vector<8x128xf32>
    %57 = arith.divf %55, %56 : vector<8x128xf32>
    %58 = vector.extract_strided_slice %51 {offsets = [0, 128], sizes = [8, 128], strides = [1, 1]} : vector<8x512xf32> to vector<8x128xf32>
    %59 = arith.negf %58 : vector<8x128xf32>
    %60 = math.exp %59 : vector<8x128xf32>
    %cst_31 = arith.constant 1.000000e+00 : f32
    %61 = vector.broadcast %cst_31 : f32 to vector<8x128xf32>
    %62 = arith.addf %61, %60 : vector<8x128xf32>
    %63 = arith.divf %61, %62 : vector<8x128xf32>
    %64 = vector.extract_strided_slice %51 {offsets = [0, 256], sizes = [8, 128], strides = [1, 1]} : vector<8x512xf32> to vector<8x128xf32>
    %65 = math.tanh %64 : vector<8x128xf32>
    %66 = vector.extract_strided_slice %51 {offsets = [0, 384], sizes = [8, 128], strides = [1, 1]} : vector<8x512xf32> to vector<8x128xf32>
    %67 = arith.negf %66 : vector<8x128xf32>
    %68 = math.exp %67 : vector<8x128xf32>
    %cst_32 = arith.constant 1.000000e+00 : f32
    %69 = vector.broadcast %cst_32 : f32 to vector<8x128xf32>
    %70 = arith.addf %69, %68 : vector<8x128xf32>
    %71 = arith.divf %69, %70 : vector<8x128xf32>
    %72 = arith.mulf %63, %47 : vector<8x128xf32>
    %73 = arith.mulf %57, %65 : vector<8x128xf32>
    %74 = arith.addf %72, %73 : vector<8x128xf32>
    %75 = math.tanh %74 : vector<8x128xf32>
    %76 = arith.mulf %71, %75 : vector<8x128xf32>
    %c1_33 = arith.constant 1 : index
    %c0_34 = arith.constant 0 : index
    %c0_35 = arith.constant 0 : index
    %77 = vector.load %arg9[%c1_33, %c0_34, %c0_35] : memref<2x8x128xf32, #tpu.memory_space<vmem>>, vector<1x8x128xf32>
    %78 = vector.shape_cast %77 : vector<1x8x128xf32> to vector<8x128xf32>
    %79 = vector.shape_cast %76 : vector<8x128xf32> to vector<1x8x128xf32>
    tpu.vector_store %arg9[%c1_33, %c0_34, %c0_35], %79 {strides = array<i32>} : memref<2x8x128xf32, #tpu.memory_space<vmem>>, vector<1x8x128xf32>,
    %c1_36 = arith.constant 1 : index
    %c0_37 = arith.constant 0 : index
    %c0_38 = arith.constant 0 : index
    %80 = vector.load %arg10[%c1_36, %c0_37, %c0_38] : memref<2x8x128xf32, #tpu.memory_space<vmem>>, vector<1x8x128xf32>
    %81 = vector.shape_cast %80 : vector<1x8x128xf32> to vector<8x128xf32>
    %82 = vector.shape_cast %74 : vector<8x128xf32> to vector<1x8x128xf32>
    tpu.vector_store %arg10[%c1_36, %c0_37, %c0_38], %82 {strides = array<i32>} : memref<2x8x128xf32, #tpu.memory_space<vmem>>, vector<1x8x128xf32>,
    %c0_39 = arith.constant 0 : index
    %c0_40 = arith.constant 0 : index
    %c0_41 = arith.constant 0 : index
    %83 = vector.load %arg3[%c0_39, %c0_40, %c0_41] : memref<8x8x128xf32, #tpu.memory_space<vmem>>, vector<8x8x128xf32>
    %84 = vector.shape_cast %76 : vector<8x128xf32> to vector<8x1x128xf32>
    %85 = vector.broadcast %84 : vector<8x1x128xf32> to vector<8x8x128xf32>
    %86 = arith.mulf %83, %85 : vector<8x8x128xf32>
    %cst_42 = arith.constant dense<0.000000e+00> : vector<8x8xf32>
    %87 = vector.multi_reduction <add>, %86, %cst_42 [2] : vector<8x8x128xf32> to vector<8x8xf32>
    %c0_43 = arith.constant 0 : index
    %c0_44 = arith.constant 0 : index
    %88 = vector.load %arg4[%c0_43, %c0_44] : memref<8x8xi32, #tpu.memory_space<vmem>>, vector<8x8xi32>
    %c0_i32 = arith.constant 0 : i32
    %89 = vector.broadcast %c0_i32 : i32 to vector<8x8xi32>
    %90 = arith.cmpi eq, %88, %89 : vector<8x8xi32>
    %cst_45 = arith.constant -1.000000e+30 : f32
    %91 = vector.broadcast %cst_45 : f32 to vector<8x8xf32>
    %92 = arith.select %90, %91, %87 : vector<8x8xi1>, vector<8x8xf32>
    %cst_46 = arith.constant dense<0xFF800000> : vector<8xf32>
    %93 = vector.multi_reduction <maximumf>, %92, %cst_46 [1] : vector<8x8xf32> to vector<8xf32>
    %94 = vector.shape_cast %93 : vector<8xf32> to vector<8x1xf32>
    %95 = vector.broadcast %94 : vector<8x1xf32> to vector<8x8xf32>
    %96 = arith.subf %92, %95 : vector<8x8xf32>
    %97 = math.exp %96 : vector<8x8xf32>
    %cst_47 = arith.constant dense<0.000000e+00> : vector<8xf32>
    %98 = vector.multi_reduction <add>, %97, %cst_47 [1] : vector<8x8xf32> to vector<8xf32>
    %99 = vector.shape_cast %98 : vector<8xf32> to vector<8x1xf32>
    %100 = math.log %99 : vector<8x1xf32>
    %101 = arith.addf %100, %94 : vector<8x1xf32>
    %c0_48 = arith.constant 0 : index
    %c0_49 = arith.constant 0 : index
    %102 = vector.load %arg11[%c0_48, %c0_49] : memref<8x8xf32, #tpu.memory_space<vmem>>, vector<8x8xf32>
    tpu.vector_store %arg11[%c0_48, %c0_49], %92 {strides = array<i32>} : memref<8x8xf32, #tpu.memory_space<vmem>>, vector<8x8xf32>,
    %103 = vector.broadcast %101 : vector<8x1xf32> to vector<8x8xf32>
    %104 = arith.subf %92, %103 : vector<8x8xf32>
    %c0_50 = arith.constant 0 : index
    %c0_51 = arith.constant 0 : index
    %105 = vector.load %arg12[%c0_50, %c0_51] : memref<8x8xf32, #tpu.memory_space<vmem>>, vector<8x8xf32>
    tpu.vector_store %arg12[%c0_50, %c0_51], %104 {strides = array<i32>} : memref<8x8xf32, #tpu.memory_space<vmem>>, vector<8x8xf32>,
    return
  }
}

module attributes {stable_mosaic.version = 11 : i64} {
  func.func @_classify_kernel(%arg0: memref<8x288xf32, #tpu.memory_space<vmem>>, %arg1: memref<288x64xf32, #tpu.memory_space<vmem>>, %arg2: memref<1x64xf32, #tpu.memory_space<vmem>>, %arg3: memref<1x64xf32, #tpu.memory_space<vmem>>, %arg4: memref<1x1xf32, #tpu.memory_space<vmem>>, %arg5: memref<8x64xf32, #tpu.memory_space<vmem>>, %arg6: memref<8x1xf32, #tpu.memory_space<vmem>>) attributes {dimension_semantics = [], scalar_prefetch = 0 : i64, scratch_operands = 0 : i64, tpu.core_type = #tpu.core_type<tc>} {
    %c0 = arith.constant 0 : index
    %c0_0 = arith.constant 0 : index
    %0 = vector.load %arg0[%c0, %c0_0] : memref<8x288xf32, #tpu.memory_space<vmem>>, vector<8x288xf32>
    %c0_1 = arith.constant 0 : index
    %c0_2 = arith.constant 0 : index
    %1 = vector.load %arg1[%c0_1, %c0_2] : memref<288x64xf32, #tpu.memory_space<vmem>>, vector<288x64xf32>
    %cst = arith.constant dense<0.000000e+00> : vector<8x64xf32>
    %2 = tpu.matmul %0, %1, %cst {dimension_numbers = #tpu.dot_dimension_numbers<[1], [0], [0], [1], [0, 0, 1, 1], [], []>} : vector<8x288xf32>, vector<288x64xf32>, vector<8x64xf32> -> vector<8x64xf32>
    %c0_3 = arith.constant 0 : index
    %c0_4 = arith.constant 0 : index
    %3 = vector.load %arg2[%c0_3, %c0_4] : memref<1x64xf32, #tpu.memory_space<vmem>>, vector<1x64xf32>
    %4 = vector.broadcast %3 : vector<1x64xf32> to vector<8x64xf32>
    %5 = arith.addf %2, %4 : vector<8x64xf32>
    %cst_5 = arith.constant 0.000000e+00 : f32
    %6 = vector.broadcast %cst_5 : f32 to vector<8x64xf32>
    %7 = arith.maximumf %5, %6 : vector<8x64xf32>
    %c0_6 = arith.constant 0 : index
    %c0_7 = arith.constant 0 : index
    %8 = vector.load %arg5[%c0_6, %c0_7] : memref<8x64xf32, #tpu.memory_space<vmem>>, vector<8x64xf32>
    tpu.vector_store %arg5[%c0_6, %c0_7], %7 {strides = array<i32>} : memref<8x64xf32, #tpu.memory_space<vmem>>, vector<8x64xf32>,
    %c0_8 = arith.constant 0 : index
    %c0_9 = arith.constant 0 : index
    %9 = vector.load %arg3[%c0_8, %c0_9] : memref<1x64xf32, #tpu.memory_space<vmem>>, vector<1x64xf32>
    %10 = vector.broadcast %9 : vector<1x64xf32> to vector<8x64xf32>
    %11 = arith.mulf %7, %10 : vector<8x64xf32>
    %cst_10 = arith.constant dense<0.000000e+00> : vector<8xf32>
    %12 = vector.multi_reduction <add>, %11, %cst_10 [1] : vector<8x64xf32> to vector<8xf32>
    %13 = vector.shape_cast %12 : vector<8xf32> to vector<8x1xf32>
    %c0_11 = arith.constant 0 : index
    %c0_12 = arith.constant 0 : index
    %14 = vector.load %arg4[%c0_11, %c0_12] : memref<1x1xf32, #tpu.memory_space<vmem>>, vector<1x1xf32>
    %15 = vector.broadcast %14 : vector<1x1xf32> to vector<8x1xf32>
    %16 = arith.addf %13, %15 : vector<8x1xf32>
    %c0_13 = arith.constant 0 : index
    %c0_14 = arith.constant 0 : index
    %17 = vector.load %arg6[%c0_13, %c0_14] : memref<8x1xf32, #tpu.memory_space<vmem>>, vector<8x1xf32>
    tpu.vector_store %arg6[%c0_13, %c0_14], %16 {strides = array<i32>} : memref<8x1xf32, #tpu.memory_space<vmem>>, vector<8x1xf32>,
    return
  }
}

module attributes {stable_mosaic.version = 11 : i64} {
  func.func @_proj1_kernel(%arg0: memref<8x64xf32, #tpu.memory_space<vmem>>, %arg1: memref<1x64xf32, #tpu.memory_space<vmem>>, %arg2: memref<1x1xf32, #tpu.memory_space<vmem>>, %arg3: memref<8x1xf32, #tpu.memory_space<vmem>>) attributes {dimension_semantics = [], scalar_prefetch = 0 : i64, scratch_operands = 0 : i64, tpu.core_type = #tpu.core_type<tc>} {
    %c0 = arith.constant 0 : index
    %c0_0 = arith.constant 0 : index
    %0 = vector.load %arg0[%c0, %c0_0] : memref<8x64xf32, #tpu.memory_space<vmem>>, vector<8x64xf32>
    %c0_1 = arith.constant 0 : index
    %c0_2 = arith.constant 0 : index
    %1 = vector.load %arg1[%c0_1, %c0_2] : memref<1x64xf32, #tpu.memory_space<vmem>>, vector<1x64xf32>
    %2 = vector.broadcast %1 : vector<1x64xf32> to vector<8x64xf32>
    %3 = arith.mulf %0, %2 : vector<8x64xf32>
    %cst = arith.constant dense<0.000000e+00> : vector<8xf32>
    %4 = vector.multi_reduction <add>, %3, %cst [1] : vector<8x64xf32> to vector<8xf32>
    %5 = vector.shape_cast %4 : vector<8xf32> to vector<8x1xf32>
    %c0_3 = arith.constant 0 : index
    %c0_4 = arith.constant 0 : index
    %6 = vector.load %arg2[%c0_3, %c0_4] : memref<1x1xf32, #tpu.memory_space<vmem>>, vector<1x1xf32>
    %7 = vector.broadcast %6 : vector<1x1xf32> to vector<8x1xf32>
    %8 = arith.addf %5, %7 : vector<8x1xf32>
    %c0_5 = arith.constant 0 : index
    %c0_6 = arith.constant 0 : index
    %9 = vector.load %arg3[%c0_5, %c0_6] : memref<8x1xf32, #tpu.memory_space<vmem>>, vector<8x1xf32>
    tpu.vector_store %arg3[%c0_5, %c0_6], %8 {strides = array<i32>} : memref<8x1xf32, #tpu.memory_space<vmem>>, vector<8x1xf32>,
    return
  }
}

</mosaic_0001>

<bundles_post_ra>
// kernel: neg.11
= control target key start
LH: loop header
LB: loop body
LE: loop exit
PB: predicated region body
PF: predicated region fallthrough
CT: control target
= control target key end

     0   :  { %2 = vsyncpa [#allocation1], 0  ;;  %s70_s0 = inlined_call_operand.vmem [shape: f32[8], index: 0, kind: input, shape index: {}]   ;;  %s71_s1 = inlined_call_operand.hbm [shape: f32[8], index: 1, kind: output, shape index: {}]  }
   0x1   :  { %v3_v0 = vld [vmem:[%s70_s0] sm:$0x1]  ;;  %s44_s0 = smov [#allocation0]  }
   0x2   :  { %v6_v1 = vxor.u32 2147483648, %v3_v0  ;;  %s13_s8 = sshll.u32 %s44_s0, 4  ;;  %s14_s8 = int_to_ptr.vmem [resolvable:$true] %s13_s8 }
   0x3   :  { %s20_s9 = scalar_lea.vmem %s14_s8, 16  ;;  %s24_s10 = scalar_lea.vmem %s14_s8, 32 }
   0x4   :  { %8 = vst [vmem:[#allocation0] sm:$0x1] %v6_v1  ;;  %p21_p0 = scmp.ne.s32.totalorder %s14_s8, %s20_s9  ;;  %p25_p1 = scmp.lt.s32.totalorder %s14_s8, %s14_s8 }
   0x5   :  { %p26_p2 = scmp.lt.s32.totalorder %s24_s10, %s20_s9 }
   0x7   :  { %p27_p3 = por %p26_p2, %p25_p1 }
   0x9   :  { %p28_p4 = pnand %p27_p3, %p21_p0 }
   0xb   :  { %31 = shalt.err (!%p28_p4)
}
   0xc   :  { %s32_s13 = scalar_lea.hbm %s71_s1, 16 }
   0xd   :  { %p33_p5 = scmp.ne.s32.totalorder %s71_s1, %s32_s13  ;;  %p36_p6 = scmp.lt.u32.totalorder %s32_s13, %s71_s1 }
   0xf   :  { %p38_p7 = pnand %p36_p6, %p33_p5 }
  0x11   :  { %41 = shalt.err (!%p38_p7)
}
  0x12   :  { %16 = dma.vmem_to_hbm [thread:$0]  %s14_s8, 16, %s71_s1, [#allocation1]  }
  0x13   :  { %42 = dma.done.wait [#allocation1], 16  }
  0x14   :  { %43 = vsyncadd [#allocation1], 4294967280 }
  0x15   :  { %18 = vsyncpa [#allocation1], 1 }

// kernel: _lambda_.5
= control target key start
LH: loop header
LB: loop body
LE: loop exit
PB: predicated region body
PF: predicated region fallthrough
CT: control target
= control target key end

     0   :  { %18 = vsyncpa [#allocation3], 0  ;;  %s1750_s0 = inlined_call_operand.vmem [shape: f32[8,256], index: 0, kind: input, shape index: {}]   ;;  %s1751_s1 = inlined_call_operand.vmem [shape: f32[2,8,128], index: 1, kind: input, shape index: {}, may-alias: {1,2}]   ;;  %s1752_s2 = inlined_call_operand.vmem [shape: f32[2,8,128], index: 2, kind: input, shape index: {}, may-alias: {1,2}]   ;;  %s1753_s3 = inlined_call_operand.vmem [shape: f32[8,8,128], index: 3, kind: input, shape index: {}]   ;;  %s1754_s4 = inlined_call_operand.vmem [shape: s32[8,8], index: 4, kind: input, shape index: {}]   ;;  %s1755_s5 = inlined_call_operand.hbm [shape: f32[384,512], index: 5, kind: input, shape index: {}]   ;;  %s1756_s6 = inlined_call_operand.vmem [shape: f32[1,512], index: 6, kind: input, shape index: {}]   ;;  %s1757_s7 = inlined_call_operand.hbm [shape: f32[256,512], index: 7, kind: input, shape index: {}]   ;;  %s1758_s8 = inlined_call_operand.vmem [shape: f32[1,512], index: 8, kind: input, shape index: {}]   ;;  %s1759_s9 = inlined_call_operand.vmem [shape: f32[2,8,128], index: 9, kind: output, shape index: {0}]   ;;  %s1760_s10 = inlined_call_operand.vmem [shape: f32[2,8,128], index: 10, kind: output, shape index: {1}]   ;;  %s1761_s11 = inlined_call_operand.vmem [shape: f32[8,8], index: 11, kind: output, shape index: {2}]   ;;  %s1762_s12 = inlined_call_operand.vmem [shape: f32[8,8], index: 12, kind: output, shape index: {3}]  }
   0x1   :  { %19 = vsyncpa [#allocation5], 0  ;;  %s1560_s21 = smov [#allocation2]   ;;  %s1512_s25 = scalar_lea.hbm %s1755_s5, 24576 }
   0x2   :  { %s35_s22 = sshll.u32 %s1560_s21, 4  ;;  %p1513_p0 = scmp.ne.s32.totalorder %s1755_s5, %s1512_s25  ;;  %s36_s22 = int_to_ptr.vmem [resolvable:$true] %s35_s22 }
   0x3   :  { %p1516_p1 = scmp.lt.u32.totalorder %s1512_s25, %s1755_s5 }
   0x5   :  { %p1518_p2 = pnand %p1516_p1, %p1513_p0 }
   0x7   :  { %1521 = shalt.err (!%p1518_p2)
}
   0x8   :  { %s1522_s30 = scalar_lea.vmem %s36_s22, 24576  ;;  %p1527_p4 = scmp.lt.s32.totalorder %s36_s22, %s36_s22 }
   0x9   :  { %p1523_p3 = scmp.ne.s32.totalorder %s36_s22, %s1522_s30  ;;  %p1528_p5 = scmp.lt.s32.totalorder %s1522_s30, %s1522_s30 }
   0xb   :  { %p1529_p6 = por %p1528_p5, %p1527_p4 }
   0xd   :  { %p1530_p7 = pnand %p1529_p6, %p1523_p3 }
   0xf   :  { %1533 = shalt.err (!%p1530_p7)
}
  0x10   :  { %s1561_s13 = smov 512   ;;  %s1562_s14 = smov 32  }
  0x11   :  { %41 = dma.hbm_to_vmem [thread:$0]  %s1755_s5, 24576, %s36_s22, [#allocation3], %s1561_s13, %s1561_s13, %s1562_s14  }
  0x12   :  { %s1563_s17 = smov [#allocation4]   ;;  %s1534_s21 = scalar_lea.hbm %s1757_s7, 16384 }
  0x13   :  { %s49_s18 = sshll.u32 %s1563_s17, 4  ;;  %p1535_p8 = scmp.ne.s32.totalorder %s1757_s7, %s1534_s21  ;;  %s50_s18 = int_to_ptr.vmem [resolvable:$true] %s49_s18 }
  0x14   :  { %p1538_p9 = scmp.lt.u32.totalorder %s1534_s21, %s1757_s7 }
  0x16   :  { %p1540_p10 = pnand %p1538_p9, %p1535_p8 }
  0x18   :  { %1543 = shalt.err (!%p1540_p10)
}
  0x19   :  { %s1544_s27 = scalar_lea.vmem %s50_s18, 16384  ;;  %p1549_p12 = scmp.lt.s32.totalorder %s50_s18, %s50_s18 }
  0x1a   :  { %p1545_p11 = scmp.ne.s32.totalorder %s50_s18, %s1544_s27  ;;  %p1550_p13 = scmp.lt.s32.totalorder %s1544_s27, %s1544_s27 }
  0x1c   :  { %p1551_p0 = por %p1550_p13, %p1549_p12 }
  0x1e   :  { %p1552_p1 = pnand %p1551_p0, %p1545_p11 }
  0x20   :  { %1555 = shalt.err (!%p1552_p1)
}
  0x21   :  { %55 = dma.hbm_to_vmem [thread:$0]  %s1757_s7, 16384, %s50_s18, [#allocation5], %s1561_s13, %s1561_s13, %s1562_s14  }
  0x22   :  { %1556 = dma.done.wait [#allocation3], 24576  }
  0x23   :  { %1557 = vsyncadd [#allocation3], 4294942720 }
  0x24   :  { %1558 = dma.done.wait [#allocation5], 16384  }
  0x25   :  { %1559 = vsyncadd [#allocation5], 4294950912  ;;  %v67_v0 = vld [vmem:[#allocation2 + $0x8] sm:$0xff]  ;;  %v69_v2 = vld [vmem:[#allocation2 + $0x18] sm:$0xff]  ;;  %vm1082_vm0 = vcmask 1041409   ;;  %vm1084_vm1 = vcmask 1042434  }
  0x26   :  { %v71_v1 = vld [vmem:[#allocation2 + $0x28] sm:$0xff]  ;;  %v73_v4 = vld [vmem:[#allocation2 + $0x38] sm:$0xff]  ;;  %v66_v5 = vld [vmem:[#allocation2] sm:$0xff]  ;;  %vm1086_vm2 = vcmask 1043459   ;;  %vm1088_vm3 = vcmask 1044484   ;;  %vm1090_vm4 = vcmask 1045509  }
  0x27   :  { %v1142_v3 = vpack.c.bf16 %v71_v1, %v67_v0  ;;  %v70_v6 = vld [vmem:[#allocation2 + $0x20] sm:$0xff]  ;;  %v1238_v7 = vpack.c.bf16 %v73_v4, %v69_v2  ;;  %v68_v9 = vld [vmem:[#allocation2 + $0x10] sm:$0xff]  ;;  %v75_v11 = vld [vmem:[#allocation2 + $0x48] sm:$0xff]  ;;  %vm1092_vm5 = vcmask 1046534   ;;  %vm1094_vm6 = vcmask 1047559  }
  0x28   :  { %v1144_v8 = vpack.c.bf16 %v70_v6, %v66_v5  ;;  %v72_v10 = vld [vmem:[#allocation2 + $0x30] sm:$0xff]  ;;  %v79_v13 = vld [vmem:[#allocation2 + $0x68] sm:$0xff]  ;;  %v77_v14 = vld [vmem:[#allocation2 + $0x58] sm:$0xff]  ;;  %vm1098_vm8 = vcmask 64512  }
  0x29   :  { %1143 = vmatprep.subr.bf16.mxu0 %v1142_v3  ;;  %v1240_v12 = vpack.c.bf16 %v72_v10, %v68_v9  ;;  %v81_v15 = vld [vmem:[#allocation2 + $0x78] sm:$0xff]  ;;  %1239 = vmatprep.subr.bf16.mxu1 %v1238_v7  ;;  %v1146_v16 = vpack.c.bf16 %v79_v13, %v75_v11  ;;  %v74_v18 = vld [vmem:[#allocation2 + $0x40] sm:$0xff]  ;;  %v76_v20 = vld [vmem:[#allocation2 + $0x50] sm:$0xff] }
  0x2a   :  { %1145 = vmatpush1.bf16.msra.mxu0 %v1144_v8  ;;  %v1242_v17 = vpack.c.bf16 %v81_v15, %v77_v14  ;;  %v78_v19 = vld [vmem:[#allocation2 + $0x60] sm:$0xff]  ;;  %v80_v22 = vld [vmem:[#allocation2 + $0x70] sm:$0xff]  ;;  %v83_v23 = vld [vmem:[#allocation2 + $0x88] sm:$0xff] }
  0x2b   :  { %1241 = vmatpush1.bf16.msra.mxu1 %v1240_v12  ;;  %v1148_v21 = vpack.c.bf16 %v78_v19, %v74_v18  ;;  %v87_v24 = vld [vmem:[#allocation2 + $0xa8] sm:$0xff]  ;;  %1147 = vmatprep.subr.bf16.mxu0 %v1146_v16  ;;  %v1244_v25 = vpack.c.bf16 %v80_v22, %v76_v20  ;;  %v85_v27 = vld [vmem:[#allocation2 + $0x98] sm:$0xff]  ;;  %v82_v29 = vld [vmem:[#allocation2 + $0x80] sm:$0xff] }
  0x2c   :  { %1243 = vmatprep.subr.bf16.mxu1 %v1242_v17  ;;  %v1150_v26 = vpack.c.bf16 %v87_v24, %v83_v23  ;;  %v89_v28 = vld [vmem:[#allocation2 + $0xb8] sm:$0xff]  ;;  %v86_v31 = vld [vmem:[#allocation2 + $0xa0] sm:$0xff]  ;;  %v84_v32 = vld [vmem:[#allocation2 + $0x90] sm:$0xff] }
  0x2d   :  { %v1246_v30 = vpack.c.bf16 %v89_v28, %v85_v27  ;;  %v88_v33 = vld [vmem:[#allocation2 + $0xb0] sm:$0xff]  ;;  %v1152_v34 = vpack.c.bf16 %v86_v31, %v82_v29  ;;  %v91_v35 = vld [vmem:[#allocation2 + $0xc8] sm:$0xff]  ;;  %v93_v37 = vld [vmem:[#allocation2 + $0xd8] sm:$0xff] }
  0x2e   :  { %1149 = vmatpush1.bf16.msra.mxu0 %v1148_v21  ;;  %v95_v36 = vld [vmem:[#allocation2 + $0xe8] sm:$0xff]  ;;  %v1248_v38 = vpack.c.bf16 %v88_v33, %v84_v32  ;;  %v97_v40 = vld [vmem:[#allocation2 + $0xf8] sm:$0xff]  ;;  %v90_v41 = vld [vmem:[#allocation2 + $0xc0] sm:$0xff] }
  0x2f   :  { %1245 = vmatpush1.bf16.msra.mxu1 %v1244_v25  ;;  %1151 = vmatprep.subr.bf16.mxu0 %v1150_v26  ;;  %v1154_v39 = vpack.c.bf16 %v95_v36, %v91_v35  ;;  %v94_v42 = vld [vmem:[#allocation2 + $0xe0] sm:$0xff]  ;;  %v1250_v43 = vpack.c.bf16 %v97_v40, %v93_v37  ;;  %v92_v44 = vld [vmem:[#allocation2 + $0xd0] sm:$0xff]  ;;  %v99_v46 = vld [vmem:[#allocation2 + $0x108] sm:$0xff] }
  0x30   :  { %1247 = vmatprep.subr.bf16.mxu1 %v1246_v30  ;;  %v96_v45 = vld [vmem:[#allocation2 + $0xf0] sm:$0xff]  ;;  %v103_v47 = vld [vmem:[#allocation2 + $0x128] sm:$0xff]  ;;  %v101_v48 = vld [vmem:[#allocation2 + $0x118] sm:$0xff]  ;;  %v1156_v50 = vpack.c.bf16 %v94_v42, %v90_v41 }
  0x31   :  { %v105_v49 = vld [vmem:[#allocation2 + $0x138] sm:$0xff]  ;;  %v1252_v51 = vpack.c.bf16 %v96_v45, %v92_v44  ;;  %v1158_v52 = vpack.c.bf16 %v103_v47, %v99_v46  ;;  %v98_v53 = vld [vmem:[#allocation2 + $0x100] sm:$0xff]  ;;  %v100_v55 = vld [vmem:[#allocation2 + $0x110] sm:$0xff] }
  0x32   :  { %1153 = vmatpush1.bf16.msra.mxu0 %v1152_v34  ;;  %v102_v54 = vld [vmem:[#allocation2 + $0x120] sm:$0xff]  ;;  %v1254_v56 = vpack.c.bf16 %v105_v49, %v101_v48  ;;  %v104_v57 = vld [vmem:[#allocation2 + $0x130] sm:$0xff]  ;;  %v107_v58 = vld [vmem:[#allocation2 + $0x148] sm:$0xff] }
  0x33   :  { %1249 = vmatpush1.bf16.msra.mxu1 %v1248_v38  ;;  %1155 = vmatprep.subr.bf16.mxu0 %v1154_v39  ;;  %v111_v59 = vld [vmem:[#allocation2 + $0x168] sm:$0xff]  ;;  %v109_v60 = vld [vmem:[#allocation2 + $0x158] sm:$0xff]  ;;  %v1160_v62 = vpack.c.bf16 %v102_v54, %v98_v53  ;;  %v1256_v63 = vpack.c.bf16 %v104_v57, %v100_v55  ;;  %v106_v1 = vld [vmem:[#allocation2 + $0x140] sm:$0xff] }
  0x34   :  { %1251 = vmatprep.subr.bf16.mxu1 %v1250_v43  ;;  %v113_v61 = vld [vmem:[#allocation2 + $0x178] sm:$0xff]  ;;  %v1162_v0 = vpack.c.bf16 %v111_v59, %v107_v58  ;;  %v110_v2 = vld [vmem:[#allocation2 + $0x160] sm:$0xff]  ;;  %v108_v3 = vld [vmem:[#allocation2 + $0x150] sm:$0xff] }
  0x35   :  { %v1258_v4 = vpack.c.bf16 %v113_v61, %v109_v60  ;;  %v112_v5 = vld [vmem:[#allocation2 + $0x170] sm:$0xff]  ;;  %v115_v6 = vld [vmem:[#allocation2 + $0x188] sm:$0xff]  ;;  %v117_v8 = vld [vmem:[#allocation2 + $0x198] sm:$0xff]  ;;  %v1164_v10 = vpack.c.bf16 %v110_v2, %v106_v1 }
  0x36   :  { %1157 = vmatpush1.bf16.msra.mxu0 %v1156_v50  ;;  %v119_v7 = vld [vmem:[#allocation2 + $0x1a8] sm:$0xff]  ;;  %v121_v9 = vld [vmem:[#allocation2 + $0x1b8] sm:$0xff]  ;;  %v1260_v11 = vpack.c.bf16 %v112_v5, %v108_v3  ;;  %v114_v13 = vld [vmem:[#allocation2 + $0x180] sm:$0xff] }
  0x37   :  { %1253 = vmatpush1.bf16.msra.mxu1 %v1252_v51  ;;  %1159 = vmatprep.subr.bf16.mxu0 %v1158_v52  ;;  %v1166_v12 = vpack.c.bf16 %v119_v7, %v115_v6  ;;  %v118_v14 = vld [vmem:[#allocation2 + $0x1a0] sm:$0xff]  ;;  %v116_v15 = vld [vmem:[#allocation2 + $0x190] sm:$0xff]  ;;  %v1262_v16 = vpack.c.bf16 %v121_v9, %v117_v8  ;;  %v123_v18 = vld [vmem:[#allocation2 + $0x1c8] sm:$0xff] }
  0x38   :  { %1255 = vmatprep.subr.bf16.mxu1 %v1254_v56  ;;  %v120_v17 = vld [vmem:[#allocation2 + $0x1b0] sm:$0xff]  ;;  %v127_v19 = vld [vmem:[#allocation2 + $0x1e8] sm:$0xff]  ;;  %v125_v20 = vld [vmem:[#allocation2 + $0x1d8] sm:$0xff]  ;;  %v1168_v22 = vpack.c.bf16 %v118_v14, %v114_v13 }
  0x39   :  { %v129_v21 = vld [vmem:[#allocation2 + $0x1f8] sm:$0xff]  ;;  %v1264_v23 = vpack.c.bf16 %v120_v17, %v116_v15  ;;  %v1170_v24 = vpack.c.bf16 %v127_v19, %v123_v18  ;;  %v122_v25 = vld [vmem:[#allocation2 + $0x1c0] sm:$0xff]  ;;  %v124_v27 = vld [vmem:[#allocation2 + $0x1d0] sm:$0xff] }
  0x3a   :  { %1161 = vmatpush1.bf16.msra.mxu0 %v1160_v62  ;;  %v126_v26 = vld [vmem:[#allocation2 + $0x1e0] sm:$0xff]  ;;  %v1266_v28 = vpack.c.bf16 %v129_v21, %v125_v20  ;;  %v128_v29 = vld [vmem:[#allocation2 + $0x1f0] sm:$0xff]  ;;  %v131_v30 = vld [vmem:[#allocation2 + $0x208] sm:$0xff] }
  0x3b   :  { %1257 = vmatpush1.bf16.msra.mxu1 %v1256_v63  ;;  %1163 = vmatprep.subr.bf16.mxu0 %v1162_v0  ;;  %v135_v31 = vld [vmem:[#allocation2 + $0x228] sm:$0xff]  ;;  %v133_v32 = vld [vmem:[#allocation2 + $0x218] sm:$0xff]  ;;  %v1172_v34 = vpack.c.bf16 %v126_v26, %v122_v25  ;;  %v1268_v35 = vpack.c.bf16 %v128_v29, %v124_v27  ;;  %v130_v37 = vld [vmem:[#allocation2 + $0x200] sm:$0xff] }
  0x3c   :  { %1259 = vmatprep.subr.bf16.mxu1 %v1258_v4  ;;  %v137_v33 = vld [vmem:[#allocation2 + $0x238] sm:$0xff]  ;;  %v1174_v36 = vpack.c.bf16 %v135_v31, %v131_v30  ;;  %v134_v38 = vld [vmem:[#allocation2 + $0x220] sm:$0xff]  ;;  %v132_v39 = vld [vmem:[#allocation2 + $0x210] sm:$0xff] }
  0x3d   :  { %v1270_v40 = vpack.c.bf16 %v137_v33, %v133_v32  ;;  %v136_v41 = vld [vmem:[#allocation2 + $0x230] sm:$0xff]  ;;  %v139_v42 = vld [vmem:[#allocation2 + $0x248] sm:$0xff]  ;;  %v141_v44 = vld [vmem:[#allocation2 + $0x258] sm:$0xff]  ;;  %v1176_v46 = vpack.c.bf16 %v134_v38, %v130_v37 }
  0x3e   :  { %1165 = vmatpush1.bf16.msra.mxu0 %v1164_v10  ;;  %v143_v43 = vld [vmem:[#allocation2 + $0x268] sm:$0xff]  ;;  %v145_v45 = vld [vmem:[#allocation2 + $0x278] sm:$0xff]  ;;  %v1272_v47 = vpack.c.bf16 %v136_v41, %v132_v39  ;;  %v138_v49 = vld [vmem:[#allocation2 + $0x240] sm:$0xff] }
  0x3f   :  { %1261 = vmatpush1.bf16.msra.mxu1 %v1260_v11  ;;  %1167 = vmatprep.subr.bf16.mxu0 %v1166_v12  ;;  %v1178_v48 = vpack.c.bf16 %v143_v43, %v139_v42  ;;  %v142_v50 = vld [vmem:[#allocation2 + $0x260] sm:$0xff]  ;;  %v140_v51 = vld [vmem:[#allocation2 + $0x250] sm:$0xff]  ;;  %v1274_v52 = vpack.c.bf16 %v145_v45, %v141_v44  ;;  %v147_v54 = vld [vmem:[#allocation2 + $0x288] sm:$0xff] }
  0x40   :  { %1263 = vmatprep.subr.bf16.mxu1 %v1262_v16  ;;  %v144_v53 = vld [vmem:[#allocation2 + $0x270] sm:$0xff]  ;;  %v151_v55 = vld [vmem:[#allocation2 + $0x2a8] sm:$0xff]  ;;  %v149_v56 = vld [vmem:[#allocation2 + $0x298] sm:$0xff]  ;;  %v1180_v58 = vpack.c.bf16 %v142_v50, %v138_v49 }
  0x41   :  { %v153_v57 = vld [vmem:[#allocation2 + $0x2b8] sm:$0xff]  ;;  %v1276_v59 = vpack.c.bf16 %v144_v53, %v140_v51  ;;  %v1182_v60 = vpack.c.bf16 %v151_v55, %v147_v54  ;;  %v146_v61 = vld [vmem:[#allocation2 + $0x280] sm:$0xff]  ;;  %v148_v63 = vld [vmem:[#allocation2 + $0x290] sm:$0xff] }
  0x42   :  { %1169 = vmatpush1.bf16.msra.mxu0 %v1168_v22  ;;  %v150_v62 = vld [vmem:[#allocation2 + $0x2a0] sm:$0xff]  ;;  %v1278_v0 = vpack.c.bf16 %v153_v57, %v149_v56  ;;  %v152_v1 = vld [vmem:[#allocation2 + $0x2b0] sm:$0xff]  ;;  %v155_v2 = vld [vmem:[#allocation2 + $0x2c8] sm:$0xff] }
  0x43   :  { %1265 = vmatpush1.bf16.msra.mxu1 %v1264_v23  ;;  %1171 = vmatprep.subr.bf16.mxu0 %v1170_v24  ;;  %v159_v3 = vld [vmem:[#allocation2 + $0x2e8] sm:$0xff]  ;;  %v157_v4 = vld [vmem:[#allocation2 + $0x2d8] sm:$0xff]  ;;  %v1184_v6 = vpack.c.bf16 %v150_v62, %v146_v61  ;;  %v154_v7 = vld [vmem:[#allocation2 + $0x2c0] sm:$0xff]  ;;  %v1280_v8 = vpack.c.bf16 %v152_v1, %v148_v63 }
  0x44   :  { %1267 = vmatprep.subr.bf16.mxu1 %v1266_v28  ;;  %v161_v5 = vld [vmem:[#allocation2 + $0x2f8] sm:$0xff]  ;;  %v1186_v9 = vpack.c.bf16 %v159_v3, %v155_v2  ;;  %v158_v10 = vld [vmem:[#allocation2 + $0x2e0] sm:$0xff]  ;;  %v156_v11 = vld [vmem:[#allocation2 + $0x2d0] sm:$0xff] }
  0x45   :  { %v160_v12 = vld [vmem:[#allocation2 + $0x2f0] sm:$0xff]  ;;  %v1282_v13 = vpack.c.bf16 %v161_v5, %v157_v4  ;;  %v163_v14 = vld [vmem:[#allocation2 + $0x308] sm:$0xff]  ;;  %v165_v17 = vld [vmem:[#allocation2 + $0x318] sm:$0xff]  ;;  %v1188_v19 = vpack.c.bf16 %v158_v10, %v154_v7 }
  0x46   :  { %1173 = vmatpush1.bf16.msra.mxu0 %v1172_v34  ;;  %v167_v15 = vld [vmem:[#allocation2 + $0x328] sm:$0xff]  ;;  %v169_v18 = vld [vmem:[#allocation2 + $0x338] sm:$0xff]  ;;  %v1284_v20 = vpack.c.bf16 %v160_v12, %v156_v11  ;;  %v162_v22 = vld [vmem:[#allocation2 + $0x300] sm:$0xff] }
  0x47   :  { %1269 = vmatpush1.bf16.msra.mxu1 %v1268_v35  ;;  %1175 = vmatprep.subr.bf16.mxu0 %v1174_v36  ;;  %v65_v16 = vld [vmem:[%s1750_s0 + $0x8] sm:$0xff]  ;;  %v1190_v21 = vpack.c.bf16 %v167_v15, %v163_v14  ;;  %v166_v23 = vld [vmem:[#allocation2 + $0x320] sm:$0xff]  ;;  %v164_v24 = vld [vmem:[#allocation2 + $0x310] sm:$0xff]  ;;  %v1286_v25 = vpack.c.bf16 %v169_v18, %v165_v17 }
  0x48   :  { %1271 = vmatprep.subr.bf16.mxu1 %v1270_v40  ;;  %346 = vmatprep.mubr.f32.mxu0 %v65_v16  ;;  %v168_v26 = vld [vmem:[#allocation2 + $0x330] sm:$0xff]  ;;  %v171_v27 = vld [vmem:[#allocation2 + $0x348] sm:$0xff]  ;;  %v173_v29 = vld [vmem:[#allocation2 + $0x358] sm:$0xff]  ;;  %v1192_v31 = vpack.c.bf16 %v166_v23, %v162_v22 }
  0x49   :  { %488 = vmatprep.mubr.f32.mxu1 %v65_v16  ;;  %v175_v28 = vld [vmem:[#allocation2 + $0x368] sm:$0xff]  ;;  %v177_v30 = vld [vmem:[#allocation2 + $0x378] sm:$0xff]  ;;  %v1288_v32 = vpack.c.bf16 %v168_v26, %v164_v24  ;;  %v170_v34 = vld [vmem:[#allocation2 + $0x340] sm:$0xff] }
  0x4a   :  { %1177 = vmatpush1.bf16.msra.mxu0 %v1176_v46  ;;  %v1194_v33 = vpack.c.bf16 %v175_v28, %v171_v27  ;;  %v174_v35 = vld [vmem:[#allocation2 + $0x360] sm:$0xff]  ;;  %v172_v36 = vld [vmem:[#allocation2 + $0x350] sm:$0xff]  ;;  %v1290_v37 = vpack.c.bf16 %v177_v30, %v173_v29  ;;  %v179_v39 = vld [vmem:[#allocation2 + $0x388] sm:$0xff] }
  0x4b   :  { %1273 = vmatpush1.bf16.msra.mxu1 %v1272_v47  ;;  %1179 = vmatprep.subr.bf16.mxu0 %v1178_v48  ;;  %v176_v38 = vld [vmem:[#allocation2 + $0x370] sm:$0xff]  ;;  %v183_v40 = vld [vmem:[#allocation2 + $0x3a8] sm:$0xff]  ;;  %v181_v41 = vld [vmem:[#allocation2 + $0x398] sm:$0xff]  ;;  %v1196_v43 = vpack.c.bf16 %v174_v35, %v170_v34 }
  0x4c   :  { %1275 = vmatprep.subr.bf16.mxu1 %v1274_v52  ;;  %v185_v42 = vld [vmem:[#allocation2 + $0x3b8] sm:$0xff]  ;;  %v1292_v44 = vpack.c.bf16 %v176_v38, %v172_v36  ;;  %v1198_v45 = vpack.c.bf16 %v183_v40, %v179_v39  ;;  %v178_v46 = vld [vmem:[#allocation2 + $0x380] sm:$0xff]  ;;  %v180_v48 = vld [vmem:[#allocation2 + $0x390] sm:$0xff]  ;;  %v1564_v38 = vmov 0.0  }
  0x4d   :  { %v182_v47 = vld [vmem:[#allocation2 + $0x3a0] sm:$0xff]  ;;  %v1294_v49 = vpack.c.bf16 %v185_v42, %v181_v41  ;;  %v184_v50 = vld [vmem:[#allocation2 + $0x3b0] sm:$0xff]  ;;  %v187_v51 = vld [vmem:[#allocation2 + $0x3c8] sm:$0xff] }
  0x4e   :  { %1181 = vmatpush1.bf16.msra.mxu0 %v1180_v58  ;;  %v191_v52 = vld [vmem:[#allocation2 + $0x3e8] sm:$0xff]  ;;  %v189_v53 = vld [vmem:[#allocation2 + $0x3d8] sm:$0xff]  ;;  %v1200_v55 = vpack.c.bf16 %v182_v47, %v178_v46  ;;  %v1296_v56 = vpack.c.bf16 %v184_v50, %v180_v48  ;;  %v186_v58 = vld [vmem:[#allocation2 + $0x3c0] sm:$0xff] }
  0x4f   :  { %1277 = vmatpush1.bf16.msra.mxu1 %v1276_v59  ;;  %1183 = vmatprep.subr.bf16.mxu0 %v1182_v60  ;;  %v193_v54 = vld [vmem:[#allocation2 + $0x3f8] sm:$0xff]  ;;  %v1202_v57 = vpack.c.bf16 %v191_v52, %v187_v51  ;;  %v190_v59 = vld [vmem:[#allocation2 + $0x3e0] sm:$0xff]  ;;  %v188_v60 = vld [vmem:[#allocation2 + $0x3d0] sm:$0xff] }
  0x50   :  { %1279 = vmatprep.subr.bf16.mxu1 %v1278_v0  ;;  %v1298_v61 = vpack.c.bf16 %v193_v54, %v189_v53  ;;  %v192_v62 = vld [vmem:[#allocation2 + $0x3f0] sm:$0xff]  ;;  %v195_v63 = vld [vmem:[#allocation2 + $0x408] sm:$0xff]  ;;  %v197_v1 = vld [vmem:[#allocation2 + $0x418] sm:$0xff]  ;;  %v1204_v3 = vpack.c.bf16 %v190_v59, %v186_v58 }
  0x51   :  { %v199_v0 = vld [vmem:[#allocation2 + $0x428] sm:$0xff]  ;;  %v201_v2 = vld [vmem:[#allocation2 + $0x438] sm:$0xff]  ;;  %v1300_v4 = vpack.c.bf16 %v192_v62, %v188_v60  ;;  %v198_v7 = vld [vmem:[#allocation2 + $0x420] sm:$0xff] }
  0x52   :  { %1185 = vmatpush1.bf16.msra.mxu0 %v1184_v6  ;;  %v1206_v5 = vpack.c.bf16 %v199_v0, %v195_v63  ;;  %v194_v6 = vld [vmem:[#allocation2 + $0x400] sm:$0xff]  ;;  %v200_v10 = vld [vmem:[#allocation2 + $0x430] sm:$0xff]  ;;  %v203_v11 = vld [vmem:[#allocation2 + $0x448] sm:$0xff] }
  0x53   :  { %1281 = vmatpush1.bf16.msra.mxu1 %v1280_v8  ;;  %1187 = vmatprep.subr.bf16.mxu0 %v1186_v9  ;;  %v196_v8 = vld [vmem:[#allocation2 + $0x410] sm:$0xff]  ;;  %v1302_v9 = vpack.c.bf16 %v201_v2, %v197_v1  ;;  %v207_v12 = vld [vmem:[#allocation2 + $0x468] sm:$0xff]  ;;  %v209_v14 = vld [vmem:[#allocation2 + $0x478] sm:$0xff]  ;;  %v1208_v16 = vpack.c.bf16 %v198_v7, %v194_v6 }
  0x54   :  { %1283 = vmatprep.subr.bf16.mxu1 %v1282_v13  ;;  %v205_v13 = vld [vmem:[#allocation2 + $0x458] sm:$0xff]  ;;  %v64_v15 = vld [vmem:[%s1750_s0] sm:$0xff]  ;;  %v1304_v17 = vpack.c.bf16 %v200_v10, %v196_v8  ;;  %v1210_v18 = vpack.c.bf16 %v207_v12, %v203_v11  ;;  %v208_v23 = vld [vmem:[#allocation2 + $0x470] sm:$0xff] }
  0x55   :  { %v1306_v22 = vpack.c.bf16 %v209_v14, %v205_v13  ;;  %v211_v24 = vld [vmem:[#allocation2 + $0x488] sm:$0xff]  ;;  %v213_v26 = vld [vmem:[#allocation2 + $0x498] sm:$0xff]  ;;  %v216_v35 = vld [vmem:[#allocation2 + $0x4b0] sm:$0xff] }
  0x56   :  { %1189 = vmatpush1.bf16.msra.mxu0 %v1188_v19  ;;  %v202_v19 = vld [vmem:[#allocation2 + $0x440] sm:$0xff]  ;;  %v217_v27 = vld [vmem:[#allocation2 + $0x4b8] sm:$0xff]  ;;  %v219_v36 = vld [vmem:[#allocation2 + $0x4c8] sm:$0xff] }
  0x57   :  { %1285 = vmatpush1.bf16.msra.mxu1 %v1284_v20  ;;  %1191 = vmatprep.subr.bf16.mxu0 %v1190_v21  ;;  %v206_v20 = vld [vmem:[#allocation2 + $0x460] sm:$0xff]  ;;  %v204_v21 = vld [vmem:[#allocation2 + $0x450] sm:$0xff]  ;;  %v1310_v34 = vpack.c.bf16 %v217_v27, %v213_v26  ;;  %v221_v39 = vld [vmem:[#allocation2 + $0x4d8] sm:$0xff] }
  0x58   :  { %1287 = vmatprep.subr.bf16.mxu1 %v1286_v25  ;;  %v215_v25 = vld [vmem:[#allocation2 + $0x4a8] sm:$0xff]  ;;  %v1212_v28 = vpack.c.bf16 %v206_v20, %v202_v19  ;;  %v1308_v29 = vpack.c.bf16 %v208_v23, %v204_v21  ;;  %v225_v40 = vld [vmem:[#allocation2 + $0x4f8] sm:$0xff]  ;;  %v220_v46 = vld [vmem:[#allocation2 + $0x4d0] sm:$0xff] }
  0x59   :  { %v1214_v30 = vpack.c.bf16 %v215_v25, %v211_v24  ;;  %v1314_v47 = vpack.c.bf16 %v225_v40, %v221_v39  ;;  %v224_v48 = vld [vmem:[#allocation2 + $0x4f0] sm:$0xff]  ;;  %v231_v50 = vld [vmem:[#allocation2 + $0x528] sm:$0xff]  ;;  %v229_v51 = vld [vmem:[#allocation2 + $0x518] sm:$0xff] }
  0x5a   :  { %1193 = vmatpush1.bf16.msra.mxu0 %v1192_v31  ;;  %v210_v31 = vld [vmem:[#allocation2 + $0x480] sm:$0xff]  ;;  %v233_v52 = vld [vmem:[#allocation2 + $0x538] sm:$0xff]  ;;  %v1316_v54 = vpack.c.bf16 %v224_v48, %v220_v46  ;;  %v228_v58 = vld [vmem:[#allocation2 + $0x510] sm:$0xff] }
  0x5b   :  { %1289 = vmatpush1.bf16.msra.mxu1 %v1288_v32  ;;  %1195 = vmatprep.subr.bf16.mxu0 %v1194_v33  ;;  %v214_v32 = vld [vmem:[#allocation2 + $0x4a0] sm:$0xff]  ;;  %v212_v33 = vld [vmem:[#allocation2 + $0x490] sm:$0xff]  ;;  %v1318_v59 = vpack.c.bf16 %v233_v52, %v229_v51  ;;  %v239_v62 = vld [vmem:[#allocation2 + $0x568] sm:$0xff] }
  0x5c   :  { %1291 = vmatprep.subr.bf16.mxu1 %v1290_v37  ;;  %v223_v37 = vld [vmem:[#allocation2 + $0x4e8] sm:$0xff]  ;;  %v1216_v41 = vpack.c.bf16 %v214_v32, %v210_v31  ;;  %v1312_v42 = vpack.c.bf16 %v216_v35, %v212_v33  ;;  %v232_v60 = vld [vmem:[#allocation2 + $0x530] sm:$0xff]  ;;  %v237_v63 = vld [vmem:[#allocation2 + $0x558] sm:$0xff] }
  0x5d   :  { %v241_v0 = vld [vmem:[#allocation2 + $0x578] sm:$0xff]  ;;  %v1320_v2 = vpack.c.bf16 %v232_v60, %v228_v58  ;;  %v236_v6 = vld [vmem:[#allocation2 + $0x550] sm:$0xff]  ;;  %v247_v10 = vld [vmem:[#allocation2 + $0x5a8] sm:$0xff] }
  0x5e   :  { %1197 = vmatpush1.bf16.msra.mxu0 %v1196_v43  ;;  %v1218_v43 = vpack.c.bf16 %v223_v37, %v219_v36  ;;  %v1322_v7 = vpack.c.bf16 %v241_v0, %v237_v63  ;;  %v240_v8 = vld [vmem:[#allocation2 + $0x570] sm:$0xff]  ;;  %v245_v11 = vld [vmem:[#allocation2 + $0x598] sm:$0xff]  ;;  %v251_v21 = vld [vmem:[#allocation2 + $0x5c8] sm:$0xff] }
  0x5f   :  { %1293 = vmatpush1.bf16.msra.mxu1 %v1292_v44  ;;  %1199 = vmatprep.subr.bf16.mxu0 %v1198_v45  ;;  %v218_v44 = vld [vmem:[#allocation2 + $0x4c0] sm:$0xff]  ;;  %v249_v12 = vld [vmem:[#allocation2 + $0x5b8] sm:$0xff]  ;;  %v1324_v14 = vpack.c.bf16 %v240_v8, %v236_v6  ;;  %v248_v20 = vld [vmem:[#allocation2 + $0x5b0] sm:$0xff] }
  0x60   :  { %1295 = vmatprep.subr.bf16.mxu1 %v1294_v49  ;;  %v222_v45 = vld [vmem:[#allocation2 + $0x4e0] sm:$0xff]  ;;  %v227_v49 = vld [vmem:[#allocation2 + $0x508] sm:$0xff]  ;;  %v1326_v19 = vpack.c.bf16 %v249_v12, %v245_v11  ;;  %v253_v23 = vld [vmem:[#allocation2 + $0x5d8] sm:$0xff] }
  0x61   :  { %v1220_v53 = vpack.c.bf16 %v222_v45, %v218_v44  ;;  %v257_v24 = vld [vmem:[#allocation2 + $0x5f8] sm:$0xff]  ;;  %v256_v32 = vld [vmem:[#allocation2 + $0x5f0] sm:$0xff]  ;;  %v593_v33 = vld [vmem:[#allocation4 + $0x8] sm:$0xff] }
  0x62   :  { %1201 = vmatpush1.bf16.msra.mxu0 %v1200_v55  ;;  %v1222_v55 = vpack.c.bf16 %v231_v50, %v227_v49  ;;  %v1330_v31 = vpack.c.bf16 %v257_v24, %v253_v23  ;;  %v595_v35 = vld [vmem:[#allocation4 + $0x18] sm:$0xff]  ;;  %v592_v40 = vld [vmem:[#allocation4] sm:$0xff]  ;;  %v598_v44 = vld [vmem:[#allocation4 + $0x30] sm:$0xff] }
  0x63   :  { %1297 = vmatpush1.bf16.msra.mxu1 %v1296_v56  ;;  %1203 = vmatprep.subr.bf16.mxu0 %v1202_v57  ;;  %v226_v56 = vld [vmem:[#allocation2 + $0x500] sm:$0xff]  ;;  %v599_v36 = vld [vmem:[#allocation4 + $0x38] sm:$0xff]  ;;  %v601_v45 = vld [vmem:[#allocation4 + $0x48] sm:$0xff] }
  0x64   :  { %1299 = vmatprep.subr.bf16.mxu1 %v1298_v61  ;;  %v230_v57 = vld [vmem:[#allocation2 + $0x520] sm:$0xff]  ;;  %v235_v61 = vld [vmem:[#allocation2 + $0x548] sm:$0xff]  ;;  %v607_v48 = vld [vmem:[#allocation4 + $0x78] sm:$0xff] }
  0x65   :  { %v1224_v1 = vpack.c.bf16 %v230_v57, %v226_v56  ;;  %v605_v46 = vld [vmem:[#allocation4 + $0x68] sm:$0xff]  ;;  %v259_v49 = vld [vmem:[%s1751_s1] sm:$0xff]  ;;  %v606_v57 = vld [vmem:[#allocation4 + $0x70] sm:$0xff] }
  0x66   :  { %1205 = vmatpush1.bf16.msra.mxu0 %v1204_v3  ;;  %v1226_v3 = vpack.c.bf16 %v239_v62, %v235_v61  ;;  %v1338_v52 = vpack.c.bf16 %v605_v46, %v601_v45  ;;  %v609_v58 = vld [vmem:[#allocation4 + $0x88] sm:$0xff]  ;;  %v611_v60 = vld [vmem:[#allocation4 + $0x98] sm:$0xff] }
  0x67   :  { %1301 = vmatpush1.bf16.msra.mxu1 %v1300_v4  ;;  %1207 = vmatprep.subr.bf16.mxu0 %v1206_v5  ;;  %v234_v4 = vld [vmem:[#allocation2 + $0x540] sm:$0xff]  ;;  %v615_v61 = vld [vmem:[#allocation4 + $0xb8] sm:$0xff]  ;;  %v617_v6 = vld [vmem:[#allocation4 + $0xc8] sm:$0xff] }
  0x68   :  { %1303 = vmatprep.subr.bf16.mxu1 %v1302_v9  ;;  %v238_v5 = vld [vmem:[#allocation2 + $0x560] sm:$0xff]  ;;  %v243_v9 = vld [vmem:[#allocation2 + $0x588] sm:$0xff]  ;;  %v619_v8 = vld [vmem:[#allocation4 + $0xd8] sm:$0xff] }
  0x69   :  { %347 = vmatmul.mubr.f32.vlgmr.msra.gmra.mrb[0].mxu0 %v64_v15  ;;  %v1228_v13 = vpack.c.bf16 %v238_v5, %v234_v4  ;;  %v1406_v4 = vpack.c.bf16 %v615_v61, %v611_v60  ;;  %v614_v5 = vld [vmem:[#allocation4 + $0xb0] sm:$0xff]  ;;  %v645_v45 = vld [vmem:[#allocation4 + $0x1a8] sm:$0xff]  ;;  %v643_v46 = vld [vmem:[#allocation4 + $0x198] sm:$0xff] }
  0x6a   :  { %1209 = vmatpush1.bf16.msra.mxu0 %v1208_v16  ;;  %489 = vmatmul.mubr.f32.vlgmr.msra.gmra.mrb[0].mxu1 %v64_v15  ;;  %v1230_v15 = vpack.c.bf16 %v247_v10, %v243_v9  ;;  %v242_v16 = vld [vmem:[#allocation2 + $0x580] sm:$0xff]  ;;  %v623_v9 = vld [vmem:[#allocation4 + $0xf8] sm:$0xff] }
  0x6b   :  { %1305 = vmatpush1.bf16.msra.mxu1 %v1304_v17  ;;  %1211 = vmatprep.subr.bf16.mxu0 %v1210_v18  ;;  %v246_v17 = vld [vmem:[#allocation2 + $0x5a0] sm:$0xff]  ;;  %v244_v18 = vld [vmem:[#allocation2 + $0x590] sm:$0xff]  ;;  %v655_v60 = vld [vmem:[#allocation4 + $0x1f8] sm:$0xff] }
  0x6c   :  { %1307 = vmatprep.subr.bf16.mxu1 %v1306_v22  ;;  %417 = vmatprep.mubr.f32.mxu0 %v1564_v38  ;;  %v255_v22 = vld [vmem:[#allocation2 + $0x5e8] sm:$0xff]  ;;  %v1232_v25 = vpack.c.bf16 %v246_v17, %v242_v16  ;;  %v1328_v26 = vpack.c.bf16 %v248_v20, %v244_v18  ;;  %v1410_v16 = vpack.c.bf16 %v623_v9, %v619_v8  ;;  %v622_v17 = vld [vmem:[#allocation4 + $0xf0] sm:$0xff]  ;;  %v627_v20 = vld [vmem:[#allocation4 + $0x118] sm:$0xff] }
  0x6d   :  { %559 = vmatprep.mubr.f32.mxu1 %v1564_v38  ;;  %v1234_v27 = vpack.c.bf16 %v255_v22, %v251_v21  ;;  %v625_v18 = vld [vmem:[#allocation4 + $0x108] sm:$0xff]  ;;  %v631_v21 = vld [vmem:[#allocation4 + $0x138] sm:$0xff]  ;;  %v648_v61 = vld [vmem:[#allocation4 + $0x1c0] sm:$0xff] }
  0x6e   :  { %1213 = vmatpush1.bf16.msra.mxu0 %v1212_v28  ;;  %v250_v28 = vld [vmem:[#allocation2 + $0x5c0] sm:$0xff]  ;;  %v663_v8 = vld [vmem:[#allocation4 + $0x238] sm:$0xff] }
  0x6f   :  { %1309 = vmatpush1.bf16.msra.mxu1 %v1308_v29  ;;  %1215 = vmatprep.subr.bf16.mxu0 %v1214_v30  ;;  %v254_v29 = vld [vmem:[#allocation2 + $0x5e0] sm:$0xff]  ;;  %v252_v30 = vld [vmem:[#allocation2 + $0x5d0] sm:$0xff] }
  0x70   :  { %1311 = vmatprep.subr.bf16.mxu1 %v1310_v34  ;;  %v597_v34 = vld [vmem:[#allocation4 + $0x28] sm:$0xff]  ;;  %v1236_v37 = vpack.c.bf16 %v254_v29, %v250_v28  ;;  %v1332_v38 = vpack.c.bf16 %v256_v32, %v252_v30  ;;  %v626_v28 = vld [vmem:[#allocation4 + $0x110] sm:$0xff]  ;;  %v656_v9 = vld [vmem:[#allocation4 + $0x200] sm:$0xff] }
  0x71   :  { %v1334_v39 = vpack.c.bf16 %v597_v34, %v593_v33  ;;  %v630_v30 = vld [vmem:[#allocation4 + $0x130] sm:$0xff]  ;;  %v633_v32 = vld [vmem:[#allocation4 + $0x148] sm:$0xff]  ;;  %v635_v34 = vld [vmem:[#allocation4 + $0x158] sm:$0xff] }
  0x72   :  { %1217 = vmatpush1.bf16.msra.mxu0 %v1216_v41  ;;  %v596_v41 = vld [vmem:[#allocation4 + $0x20] sm:$0xff]  ;;  %v637_v33 = vld [vmem:[#allocation4 + $0x168] sm:$0xff] }
  0x73   :  { %1313 = vmatpush1.bf16.msra.mxu1 %v1312_v42  ;;  %1219 = vmatprep.subr.bf16.mxu0 %v1218_v43  ;;  %v594_v42 = vld [vmem:[#allocation4 + $0x10] sm:$0xff]  ;;  %v1398_v43 = vpack.c.bf16 %v599_v36, %v595_v35  ;;  %v1336_v50 = vpack.c.bf16 %v596_v41, %v592_v40  ;;  %v1354_v35 = vpack.c.bf16 %v637_v33, %v633_v32  ;;  %v639_v36 = vld [vmem:[#allocation4 + $0x178] sm:$0xff]  ;;  %v672_v33 = vld [vmem:[#allocation4 + $0x280] sm:$0xff] }
  0x74   :  { %1315 = vmatprep.subr.bf16.mxu1 %v1314_v47  ;;  %v603_v47 = vld [vmem:[#allocation4 + $0x58] sm:$0xff]  ;;  %v1400_v51 = vpack.c.bf16 %v598_v44, %v594_v42  ;;  %v634_v41 = vld [vmem:[#allocation4 + $0x150] sm:$0xff]  ;;  %v641_v44 = vld [vmem:[#allocation4 + $0x188] sm:$0xff] }
  0x75   :  { %v1402_v56 = vpack.c.bf16 %v607_v48, %v603_v47  ;;  %v638_v42 = vld [vmem:[#allocation4 + $0x170] sm:$0xff]  ;;  %v1358_v47 = vpack.c.bf16 %v645_v45, %v641_v44  ;;  %v647_v48 = vld [vmem:[#allocation4 + $0x1b8] sm:$0xff]  ;;  %v680_v45 = vld [vmem:[#allocation4 + $0x2c0] sm:$0xff] }
  0x76   :  { %1221 = vmatpush1.bf16.msra.mxu0 %v1220_v53  ;;  %v600_v53 = vld [vmem:[#allocation4 + $0x40] sm:$0xff]  ;;  %v679_v32 = vld [vmem:[#allocation4 + $0x2b8] sm:$0xff] }
  0x77   :  { %1317 = vmatpush1.bf16.msra.mxu1 %v1316_v54  ;;  %1223 = vmatprep.subr.bf16.mxu0 %v1222_v55  ;;  %v604_v54 = vld [vmem:[#allocation4 + $0x60] sm:$0xff]  ;;  %v602_v55 = vld [vmem:[#allocation4 + $0x50] sm:$0xff]  ;;  %v687_v44 = vld [vmem:[#allocation4 + $0x2f8] sm:$0xff] }
  0x78   :  { %1319 = vmatprep.subr.bf16.mxu1 %v1318_v59  ;;  %v613_v59 = vld [vmem:[#allocation4 + $0xa8] sm:$0xff]  ;;  %v1340_v62 = vpack.c.bf16 %v604_v54, %v600_v53  ;;  %v1404_v63 = vpack.c.bf16 %v606_v57, %v602_v55  ;;  %v642_v53 = vld [vmem:[#allocation4 + $0x190] sm:$0xff] }
  0x79   :  { %v1342_v0 = vpack.c.bf16 %v613_v59, %v609_v58  ;;  %v646_v54 = vld [vmem:[#allocation4 + $0x1b0] sm:$0xff]  ;;  %v653_v57 = vld [vmem:[#allocation4 + $0x1e8] sm:$0xff]  ;;  %v651_v58 = vld [vmem:[#allocation4 + $0x1d8] sm:$0xff] }
  0x7a   :  { %1225 = vmatpush1.bf16.msra.mxu0 %v1224_v1  ;;  %v608_v1 = vld [vmem:[#allocation4 + $0x80] sm:$0xff]  ;;  %v1424_v55 = vpack.c.bf16 %v646_v54, %v642_v53  ;;  %v693_v53 = vld [vmem:[#allocation4 + $0x328] sm:$0xff] }
  0x7b   :  { %1321 = vmatpush1.bf16.msra.mxu1 %v1320_v2  ;;  %1227 = vmatprep.subr.bf16.mxu0 %v1226_v3  ;;  %v612_v2 = vld [vmem:[#allocation4 + $0xa0] sm:$0xff]  ;;  %v610_v3 = vld [vmem:[#allocation4 + $0x90] sm:$0xff] }
  0x7c   :  { %1323 = vmatprep.subr.bf16.mxu1 %v1322_v7  ;;  %v621_v7 = vld [vmem:[#allocation4 + $0xe8] sm:$0xff]  ;;  %v1344_v10 = vpack.c.bf16 %v612_v2, %v608_v1  ;;  %v1408_v11 = vpack.c.bf16 %v614_v5, %v610_v3  ;;  %v650_v1 = vld [vmem:[#allocation4 + $0x1d0] sm:$0xff] }
  0x7d   :  { %v1346_v12 = vpack.c.bf16 %v621_v7, %v617_v6  ;;  %v654_v2 = vld [vmem:[#allocation4 + $0x1f0] sm:$0xff]  ;;  %v661_v5 = vld [vmem:[#allocation4 + $0x228] sm:$0xff]  ;;  %v659_v6 = vld [vmem:[#allocation4 + $0x218] sm:$0xff] }
  0x7e   :  { %1229 = vmatpush1.bf16.msra.mxu0 %v1228_v13  ;;  %v616_v13 = vld [vmem:[#allocation4 + $0xc0] sm:$0xff]  ;;  %v1428_v3 = vpack.c.bf16 %v654_v2, %v650_v1  ;;  %v701_v1 = vld [vmem:[#allocation4 + $0x368] sm:$0xff]  ;;  %v699_v2 = vld [vmem:[#allocation4 + $0x358] sm:$0xff] }
  0x7f   :  { %1325 = vmatpush1.bf16.msra.mxu1 %v1324_v14  ;;  %1231 = vmatprep.subr.bf16.mxu0 %v1230_v15  ;;  %v620_v14 = vld [vmem:[#allocation4 + $0xe0] sm:$0xff]  ;;  %v618_v15 = vld [vmem:[#allocation4 + $0xd0] sm:$0xff] }
  0x80   :  { %1327 = vmatprep.subr.bf16.mxu1 %v1326_v19  ;;  %v629_v19 = vld [vmem:[#allocation4 + $0x128] sm:$0xff]  ;;  %v1348_v22 = vpack.c.bf16 %v620_v14, %v616_v13  ;;  %v1412_v23 = vpack.c.bf16 %v622_v17, %v618_v15  ;;  %v658_v13 = vld [vmem:[#allocation4 + $0x210] sm:$0xff] }
  0x81   :  { %v1350_v24 = vpack.c.bf16 %v629_v19, %v625_v18  ;;  %v662_v14 = vld [vmem:[#allocation4 + $0x230] sm:$0xff]  ;;  %v669_v17 = vld [vmem:[#allocation4 + $0x268] sm:$0xff]  ;;  %v667_v18 = vld [vmem:[#allocation4 + $0x258] sm:$0xff] }
  0x82   :  { %1233 = vmatpush1.bf16.msra.mxu0 %v1232_v25  ;;  %v1414_v25 = vpack.c.bf16 %v631_v21, %v627_v20  ;;  %v1432_v15 = vpack.c.bf16 %v662_v14, %v658_v13  ;;  %v671_v20 = vld [vmem:[#allocation4 + $0x278] sm:$0xff]  ;;  %v664_v21 = vld [vmem:[#allocation4 + $0x240] sm:$0xff]  ;;  %v709_v13 = vld [vmem:[#allocation4 + $0x3a8] sm:$0xff] }
  0x83   :  { %1329 = vmatpush1.bf16.msra.mxu1 %v1328_v26  ;;  %1235 = vmatprep.subr.bf16.mxu0 %v1234_v27  ;;  %v624_v26 = vld [vmem:[#allocation4 + $0x100] sm:$0xff]  ;;  %v707_v14 = vld [vmem:[#allocation4 + $0x398] sm:$0xff] }
  0x84   :  { %1331 = vmatprep.subr.bf16.mxu1 %v1330_v31  ;;  %v628_v27 = vld [vmem:[#allocation4 + $0x120] sm:$0xff]  ;;  %v1416_v31 = vpack.c.bf16 %v630_v30, %v626_v28  ;;  %v673_v28 = vld [vmem:[#allocation4 + $0x288] sm:$0xff]  ;;  %v675_v30 = vld [vmem:[#allocation4 + $0x298] sm:$0xff] }
  0x85   :  { %v1352_v29 = vpack.c.bf16 %v628_v27, %v624_v26  ;;  %v670_v26 = vld [vmem:[#allocation4 + $0x270] sm:$0xff] }
  0x86   :  { %1237 = vmatpush1.bf16.msra.mxu0 %v1236_v37  ;;  %v632_v37 = vld [vmem:[#allocation4 + $0x140] sm:$0xff] }
  0x87   :  { %1333 = vmatpush1.bf16.msra.mxu1 %v1332_v38  ;;  %1335 = vmatprep.subr.bf16.mxu0 %v1334_v39  ;;  %v636_v38 = vld [vmem:[#allocation4 + $0x160] sm:$0xff]  ;;  %v1418_v39 = vpack.c.bf16 %v639_v36, %v635_v34 }
  0x88   :  { %1399 = vmatprep.subr.bf16.mxu1 %v1398_v43  ;;  %v1356_v40 = vpack.c.bf16 %v636_v38, %v632_v37  ;;  %v1420_v43 = vpack.c.bf16 %v638_v42, %v634_v41  ;;  %v676_v34 = vld [vmem:[#allocation4 + $0x2a0] sm:$0xff]  ;;  %v674_v37 = vld [vmem:[#allocation4 + $0x290] sm:$0xff]  ;;  %v685_v41 = vld [vmem:[#allocation4 + $0x2e8] sm:$0xff] }
  0x89   :  { %418 = vmatmul.mubr.f32.vlgmr.msra.gmra.mrb[0].mxu0 %v259_v49  ;;  %v1376_v36 = vpack.c.bf16 %v676_v34, %v672_v33  ;;  %v678_v38 = vld [vmem:[#allocation4 + $0x2b0] sm:$0xff]  ;;  %v683_v42 = vld [vmem:[#allocation4 + $0x2d8] sm:$0xff]  ;;  %v1135_v34 = vld [vmem:[%s1751_s1 + $0x8] sm:$0xff] }
  0x8a   :  { %560 = vmatmul.mubr.f32.vlgmr.msra.gmra.mrb[0].mxu1 %v259_v49  ;;  %1337 = vmatpush1.bf16.msra.mxu0 %v1336_v50  ;;  %v640_v49 = vld [vmem:[#allocation4 + $0x180] sm:$0xff]  ;;  %v718_v33 = vld [vmem:[#allocation4 + $0x3f0] sm:$0xff] }
  0x8b   :  { %1401 = vmatpush1.bf16.msra.mxu1 %v1400_v51  ;;  %1339 = vmatprep.subr.bf16.mxu0 %v1338_v52  ;;  %v644_v50 = vld [vmem:[#allocation4 + $0x1a0] sm:$0xff]  ;;  %v1422_v51 = vpack.c.bf16 %v647_v48, %v643_v46 }
  0x8c   :  { %1403 = vmatprep.subr.bf16.mxu1 %v1402_v56  ;;  %v1360_v52 = vpack.c.bf16 %v644_v50, %v640_v49  ;;  %v649_v56 = vld [vmem:[#allocation4 + $0x1c8] sm:$0xff]  ;;  %v684_v46 = vld [vmem:[#allocation4 + $0x2e0] sm:$0xff]  ;;  %v682_v49 = vld [vmem:[#allocation4 + $0x2d0] sm:$0xff]  ;;  %810 = vmatprep.mubr.f32.mxu0 %v1135_v34 }
  0x8d   :  { %v1362_v59 = vpack.c.bf16 %v653_v57, %v649_v56  ;;  %v1380_v48 = vpack.c.bf16 %v684_v46, %v680_v45  ;;  %v686_v50 = vld [vmem:[#allocation4 + $0x2f0] sm:$0xff]  ;;  %v695_v56 = vld [vmem:[#allocation4 + $0x338] sm:$0xff]  ;;  %v688_v57 = vld [vmem:[#allocation4 + $0x300] sm:$0xff]  ;;  %881 = vmatprep.mubr.f32.mxu1 %v1135_v34 }
  0x8e   :  { %1341 = vmatpush1.bf16.msra.mxu0 %v1340_v62  ;;  %v652_v62 = vld [vmem:[#allocation4 + $0x1e0] sm:$0xff] }
  0x8f   :  { %1405 = vmatpush1.bf16.msra.mxu1 %v1404_v63  ;;  %1343 = vmatprep.subr.bf16.mxu0 %v1342_v0  ;;  %v1426_v63 = vpack.c.bf16 %v655_v60, %v651_v58  ;;  %v1364_v0 = vpack.c.bf16 %v652_v62, %v648_v61  ;;  %v690_v60 = vld [vmem:[#allocation4 + $0x310] sm:$0xff] }
  0x90   :  { %1407 = vmatprep.subr.bf16.mxu1 %v1406_v4  ;;  %v657_v4 = vld [vmem:[#allocation4 + $0x208] sm:$0xff]  ;;  %v694_v61 = vld [vmem:[#allocation4 + $0x330] sm:$0xff] }
  0x91   :  { %v1366_v7 = vpack.c.bf16 %v661_v5, %v657_v4  ;;  %v703_v4 = vld [vmem:[#allocation4 + $0x378] sm:$0xff]  ;;  %v696_v5 = vld [vmem:[#allocation4 + $0x340] sm:$0xff] }
  0x92   :  { %1345 = vmatpush1.bf16.msra.mxu0 %v1344_v10  ;;  %v660_v10 = vld [vmem:[#allocation4 + $0x220] sm:$0xff] }
  0x93   :  { %1409 = vmatpush1.bf16.msra.mxu1 %v1408_v11  ;;  %1347 = vmatprep.subr.bf16.mxu0 %v1346_v12  ;;  %v1430_v11 = vpack.c.bf16 %v663_v8, %v659_v6  ;;  %v1368_v12 = vpack.c.bf16 %v660_v10, %v656_v9  ;;  %v700_v6 = vld [vmem:[#allocation4 + $0x360] sm:$0xff]  ;;  %v698_v9 = vld [vmem:[#allocation4 + $0x350] sm:$0xff] }
  0x94   :  { %1411 = vmatprep.subr.bf16.mxu1 %v1410_v16  ;;  %v665_v16 = vld [vmem:[#allocation4 + $0x248] sm:$0xff]  ;;  %v1388_v8 = vpack.c.bf16 %v700_v6, %v696_v5  ;;  %v702_v10 = vld [vmem:[#allocation4 + $0x370] sm:$0xff] }
  0x95   :  { %v1370_v19 = vpack.c.bf16 %v669_v17, %v665_v16 }
  0x96   :  { %1349 = vmatpush1.bf16.msra.mxu0 %v1348_v22  ;;  %v668_v22 = vld [vmem:[#allocation4 + $0x260] sm:$0xff] }
  0x97   :  { %1413 = vmatpush1.bf16.msra.mxu1 %v1412_v23  ;;  %1351 = vmatprep.subr.bf16.mxu0 %v1350_v24  ;;  %v1434_v23 = vpack.c.bf16 %v671_v20, %v667_v18  ;;  %v1372_v24 = vpack.c.bf16 %v668_v22, %v664_v21  ;;  %v704_v18 = vld [vmem:[#allocation4 + $0x380] sm:$0xff]  ;;  %v706_v20 = vld [vmem:[#allocation4 + $0x390] sm:$0xff] }
  0x98   :  { %1415 = vmatprep.subr.bf16.mxu1 %v1414_v25  ;;  %v666_v25 = vld [vmem:[#allocation4 + $0x250] sm:$0xff] }
  0x99   :  { %v1436_v27 = vpack.c.bf16 %v670_v26, %v666_v25  ;;  %v710_v22 = vld [vmem:[#allocation4 + $0x3b0] sm:$0xff] }
  0x9a   :  { %1353 = vmatpush1.bf16.msra.mxu0 %v1352_v29  ;;  %v677_v29 = vld [vmem:[#allocation4 + $0x2a8] sm:$0xff]  ;;  %v1456_v25 = vpack.c.bf16 %v710_v22, %v706_v20 }
  0x9b   :  { %1417 = vmatpush1.bf16.msra.mxu1 %v1416_v31  ;;  %1355 = vmatprep.subr.bf16.mxu0 %v1354_v35  ;;  %v1374_v31 = vpack.c.bf16 %v677_v29, %v673_v28  ;;  %v1438_v35 = vpack.c.bf16 %v679_v32, %v675_v30  ;;  %v719_v28 = vld [vmem:[#allocation4 + $0x3f8] sm:$0xff]  ;;  %v712_v29 = vld [vmem:[#allocation4 + $0x3c0] sm:$0xff]  ;;  %v714_v32 = vld [vmem:[#allocation4 + $0x3d0] sm:$0xff] }
  0x9c   :  { %1419 = vmatprep.subr.bf16.mxu1 %v1418_v39  ;;  %v1440_v39 = vpack.c.bf16 %v678_v38, %v674_v37  ;;  %v262_v37 = vlaneseq }
  0x9e   :  { %1357 = vmatpush1.bf16.msra.mxu0 %v1356_v40  ;;  %v681_v40 = vld [vmem:[#allocation4 + $0x2c8] sm:$0xff]  ;;  %v1668_v38 = vshrl.u32 %v262_v37, 7 }
  0x9f   :  { %1421 = vmatpush1.bf16.msra.mxu1 %v1420_v43  ;;  %1359 = vmatprep.subr.bf16.mxu0 %v1358_v47  ;;  %v1378_v43 = vpack.c.bf16 %v685_v41, %v681_v40  ;;  %v1442_v47 = vpack.c.bf16 %v687_v44, %v683_v42  ;;  %v258_v40 = vld [vmem:[%s1756_s6] sm:$0xf] }
  0xa0   :  { %1423 = vmatprep.subr.bf16.mxu1 %v1422_v51  ;;  %v1444_v51 = vpack.c.bf16 %v686_v50, %v682_v49  ;;  %v268_v41 = vsub.s32 1, %v1668_v38  ;;  %v276_v45 = vsub.s32 3, %v1668_v38 }
  0xa2   :  { %1361 = vmatpush1.bf16.msra.mxu0 %v1360_v52  ;;  %v689_v52 = vld [vmem:[#allocation4 + $0x308] sm:$0xff] }
  0xa3   :  { %1425 = vmatpush1.bf16.msra.mxu1 %v1424_v55  ;;  %1363 = vmatprep.subr.bf16.mxu0 %v1362_v59  ;;  %v1382_v54 = vpack.c.bf16 %v693_v53, %v689_v52  ;;  %v691_v55 = vld [vmem:[#allocation4 + $0x318] sm:$0xff]  ;;  %v692_v59 = vld [vmem:[#allocation4 + $0x320] sm:$0xff]  ;;  %v277_v53 = vrot.slane %v258_v40, %v276_v45 }
  0xa4   :  { %1427 = vmatprep.subr.bf16.mxu1 %v1426_v63  ;;  %v1446_v58 = vpack.c.bf16 %v695_v56, %v691_v55  ;;  %v1384_v62 = vpack.c.bf16 %v692_v59, %v688_v57  ;;  %v1448_v63 = vpack.c.bf16 %v694_v61, %v690_v60 }
  0xa6   :  { %1365 = vmatpush1.bf16.msra.mxu0 %v1364_v0  ;;  %v697_v0 = vld [vmem:[#allocation4 + $0x348] sm:$0xff] }
  0xa7   :  { %1429 = vmatpush1.bf16.msra.mxu1 %v1428_v3  ;;  %1367 = vmatprep.subr.bf16.mxu0 %v1366_v7  ;;  %v1386_v3 = vpack.c.bf16 %v701_v1, %v697_v0  ;;  %v1450_v7 = vpack.c.bf16 %v703_v4, %v699_v2  ;;  %v260_v1 = vld [vmem:[%s1752_s2] sm:$0xff] }
  0xa8   :  { %1431 = vmatprep.subr.bf16.mxu1 %v1430_v11  ;;  %v705_v11 = vld [vmem:[#allocation4 + $0x388] sm:$0xff] }
  0xa9   :  { %v1390_v16 = vpack.c.bf16 %v709_v13, %v705_v11  ;;  %v720_v11 = vld [vmem:[%s1758_s8] sm:$0xf] }
  0xaa   :  { %1369 = vmatpush1.bf16.msra.mxu0 %v1368_v12  ;;  %v1452_v12 = vpack.c.bf16 %v702_v10, %v698_v9  ;;  %v733_v13 = vrot.slane %v720_v11, %v268_v41  ;;  %v741_v22 = vrot.slane %v720_v11, %v276_v45 }
  0xab   :  { %1433 = vmatpush1.bf16.msra.mxu1 %v1432_v15  ;;  %1371 = vmatprep.subr.bf16.mxu0 %v1370_v19  ;;  %v711_v15 = vld [vmem:[#allocation4 + $0x3b8] sm:$0xff]  ;;  %v708_v19 = vld [vmem:[#allocation4 + $0x3a0] sm:$0xff] }
  0xac   :  { %1435 = vmatprep.subr.bf16.mxu1 %v1434_v23  ;;  %v1454_v17 = vpack.c.bf16 %v711_v15, %v707_v14  ;;  %v1392_v21 = vpack.c.bf16 %v708_v19, %v704_v18  ;;  %v713_v23 = vld [vmem:[#allocation4 + $0x3c8] sm:$0xff] }
  0xae   :  { %1373 = vmatpush1.bf16.msra.mxu0 %v1372_v24  ;;  %v717_v24 = vld [vmem:[#allocation4 + $0x3e8] sm:$0xff] }
  0xaf   :  { %1437 = vmatpush1.bf16.msra.mxu1 %v1436_v27  ;;  %1375 = vmatprep.subr.bf16.mxu0 %v1374_v31  ;;  %v1394_v26 = vpack.c.bf16 %v717_v24, %v713_v23  ;;  %v715_v27 = vld [vmem:[#allocation4 + $0x3d8] sm:$0xff]  ;;  %v716_v31 = vld [vmem:[#allocation4 + $0x3e0] sm:$0xff] }
  0xb0   :  { %1439 = vmatprep.subr.bf16.mxu1 %v1438_v35  ;;  %v1458_v30 = vpack.c.bf16 %v719_v28, %v715_v27  ;;  %v1396_v35 = vpack.c.bf16 %v716_v31, %v712_v29 }
  0xb2   :  { %1377 = vmatpush1.bf16.msra.mxu0 %v1376_v36  ;;  %v1460_v36 = vpack.c.bf16 %v718_v33, %v714_v32  ;;  %v1136_v33 = vld [vmem:[%s1752_s2 + $0x8] sm:$0xff] }
  0xb3   :  { %1441 = vmatpush1.bf16.msra.mxu1 %v1440_v39  ;;  %1379 = vmatprep.subr.bf16.mxu0 %v1378_v43  ;;  %v1671_v39 = vsub.s32 0, %v1668_v38  ;;  %v269_v43 = vrot.slane %v258_v40, %v268_v41 }
  0xb4   :  { %1443 = vmatprep.subr.bf16.mxu1 %v1442_v47 }
  0xb5   :  { %v265_v42 = vrot.slane %v258_v40, %v1671_v39 }
  0xb6   :  { %1381 = vmatpush1.bf16.msra.mxu0 %v1380_v48 }
  0xb7   :  { %1445 = vmatpush1.bf16.msra.mxu1 %v1444_v51  ;;  %1383 = vmatprep.subr.bf16.mxu0 %v1382_v54  ;;  %v272_v54 = vsub.s32 2, %v1668_v38 }
  0xb8   :  { %1447 = vmatprep.subr.bf16.mxu1 %v1446_v58 }
  0xb9   :  { %v273_v56 = vrot.slane %v258_v40, %v272_v54  ;;  %v737_v24 = vrot.slane %v720_v11, %v272_v54 }
  0xba   :  { %1385 = vmatpush1.bf16.msra.mxu0 %v1384_v62 }
  0xbb   :  { %1449 = vmatpush1.bf16.msra.mxu1 %v1448_v63  ;;  %1387 = vmatprep.subr.bf16.mxu0 %v1386_v3 }
  0xbc   :  { %1451 = vmatprep.subr.bf16.mxu1 %v1450_v7 }
  0xbe   :  { %1389 = vmatpush1.bf16.msra.mxu0 %v1388_v8 }
  0xbf   :  { %1453 = vmatpush1.bf16.msra.mxu1 %v1452_v12  ;;  %1391 = vmatprep.subr.bf16.mxu0 %v1390_v16  ;;  %v729_v12 = vrot.slane %v720_v11, %v1671_v39 }
  0xc0   :  { %1455 = vmatprep.subr.bf16.mxu1 %v1454_v17 }
  0xc2   :  { %1393 = vmatpush1.bf16.msra.mxu0 %v1392_v21 }
  0xc3   :  { %1457 = vmatpush1.bf16.msra.mxu1 %v1456_v25  ;;  %1395 = vmatprep.subr.bf16.mxu0 %v1394_v26 }
  0xc4   :  { %1459 = vmatprep.subr.bf16.mxu1 %v1458_v30 }
  0xc6   :  { %1397 = vmatpush1.bf16.msra.mxu0 %v1396_v35 }
  0xc7   :  { %1461 = vmatpush1.bf16.msra.mxu1 %v1460_v36 }
 0x15c   :  { %v419_v44 = vpop.f32.mrb[0].mxu0 }
 0x15d   :  { %v1462_v46 = vadd.f32 %v419_v44, %v265_v42  ;;  %v561_v47 = vpop.f32.mrb[0].mxu1  ;;  %v421_v48 = vpop.f32.mrb[1].mxu0 }
 0x15e   :  { %v1463_v49 = vadd.f32 %v421_v48, %v269_v43  ;;  %v563_v50 = vpop.f32.mrb[1].mxu1  ;;  %v1464_v58 = vadd.f32 %v561_v47, %v273_v56  ;;  %v1565_v43 = vmov 1966171168  }
 0x15f   :  { %v1132_v51 = vmul.f32 -1.442695, %v1462_v46  ;;  %v1465_v55 = vadd.f32 %v563_v50, %v277_v53  ;;  %v927_v44 = vunpack.c.l.s4 %v1565_v43 }
 0x160   :  { %v1133_v52 = vmul.f32 -1.442695, %v1463_v49 }
 0x161   :  { %1476 = vpow2.f32 %v1132_v51  ;;  %v1134_v57 = vmul.f32 -1.442695, %v1465_v55  ;;  %v928_v45 = vunpack.c.0.s8 %v927_v44  ;;  %v916_v55 = vld [vmem:[%s1753_s3] sm:$0xff] }
 0x162   :  { %1478 = vpow2.f32 %v1133_v52 }
 0x163   :  { %1480 = vpow2.f32 %v1134_v57  ;;  %v931_v47 = vsub.s32 %v928_v45, %v1668_v38 }
 0x164   :  { %1482 = vtanh.f32 %v1464_v58 }
 0x16b   :  { %v1477_v59 = vpop.eup %1476 }
 0x16c   :  { %v1479_v60 = vpop.eup %1478  ;;  %v569_v61 = vadd.f32 1.0, %v1477_v59  ;;  %v918_v59 = vld [vmem:[%s1753_s3 + $0x10] sm:$0xff] }
 0x16d   :  { %v575_v62 = vadd.f32 1.0, %v1479_v60  ;;  %v1481_v63 = vpop.eup %1480 }
 0x16e   :  { %1484 = vrcp.f32 %v569_v61  ;;  %v1483_v0 = vpop.eup %1482  ;;  %v582_v5 = vadd.f32 1.0, %v1481_v63 }
 0x16f   :  { %1486 = vrcp.f32 %v575_v62 }
 0x170   :  { %1488 = vrcp.f32 %v582_v5 }
 0x178   :  { %v1485_v2 = vpop.eup %1484 }
 0x179   :  { %v1487_v3 = vpop.eup %1486  ;;  %v586_v4 = vmul.f32 %v1485_v2, %v1483_v0  ;;  %v917_v2 = vld [vmem:[%s1753_s3 + $0x8] sm:$0xff] }
 0x17a   :  { %v585_v6 = vmul.f32 %v1487_v3, %v260_v1  ;;  %v1489_v8 = vpop.eup %1488 }
 0x17c   :  { %v587_v7 = vadd.f32 %v586_v4, %v585_v6  ;;  %v919_v6 = vld [vmem:[%s1753_s3 + $0x18] sm:$0xff] }
 0x17e   :  { %591 = vst [vmem:[%s1760_s10] sm:$0xff] %v587_v7  ;;  %1490 = vtanh.f32 %v587_v7 }
 0x188   :  { %v1491_v9 = vpop.eup %1490 }
 0x189   :  { %v589_v10 = vmul.f32 %v1491_v9, %v1489_v8 }
 0x18b   :  { %590 = vst [vmem:[%s1759_s9] sm:$0xff] %v589_v10  ;;  %811 = vmatmul.mubr.f32.vlgmr.msra.gmra.mrb[2].mxu0 %v589_v10  ;;  %882 = vmatmul.mubr.f32.vlgmr.msra.gmra.mrb[2].mxu1 %v589_v10  ;;  %v920_v10 = vld [vmem:[%s1753_s3 + $0x20] sm:$0xff] }
 0x25e   :  { %v812_v14 = vpop.f32.mrb[2].mxu0  ;;  %v883_v15 = vpop.f32.mrb[2].mxu1 }
 0x25f   :  { %v813_v16 = vadd.f32 %v812_v14, %v729_v12  ;;  %v814_v17 = vpop.f32.mrb[3].mxu0  ;;  %v885_v18 = vpop.f32.mrb[3].mxu1  ;;  %v884_v26 = vadd.f32 %v883_v15, %v737_v24  ;;  %v921_v14 = vld [vmem:[%s1753_s3 + $0x28] sm:$0xff] }
 0x260   :  { %v815_v19 = vadd.f32 %v814_v17, %v733_v13  ;;  %v886_v23 = vadd.f32 %v885_v18, %v741_v22  ;;  %v922_v17 = vld [vmem:[%s1753_s3 + $0x30] sm:$0xff] }
 0x261   :  { %v1137_v20 = vmul.f32 -1.442695, %v813_v16 }
 0x262   :  { %v1138_v21 = vmul.f32 -1.442695, %v815_v19  ;;  %v1139_v25 = vmul.f32 -1.442695, %v886_v23  ;;  %v1049_v23 = vand.u32 127, %v262_v37 }
 0x263   :  { %1492 = vpow2.f32 %v1137_v20  ;;  %v923_v20 = vld [vmem:[%s1753_s3 + $0x38] sm:$0xff] }
 0x264   :  { %1494 = vpow2.f32 %v1138_v21 }
 0x265   :  { %1496 = vpow2.f32 %v1139_v25  ;;  %v1052_v25 = vsub.s32 %v1049_v23, %v1668_v38 }
 0x266   :  { %1498 = vtanh.f32 %v884_v26 }
 0x26d   :  { %v1493_v27 = vpop.eup %1492 }
 0x26e   :  { %v1495_v28 = vpop.eup %1494  ;;  %v891_v29 = vadd.f32 1.0, %v1493_v27 }
 0x26f   :  { %v897_v30 = vadd.f32 1.0, %v1495_v28  ;;  %v1497_v31 = vpop.eup %1496 }
 0x270   :  { %1500 = vrcp.f32 %v891_v29  ;;  %v1499_v32 = vpop.eup %1498  ;;  %v904_v40 = vadd.f32 1.0, %v1497_v31 }
 0x271   :  { %1502 = vrcp.f32 %v897_v30 }
 0x272   :  { %1504 = vrcp.f32 %v904_v40 }
 0x27a   :  { %v1501_v34 = vpop.eup %1500 }
 0x27b   :  { %v1503_v35 = vpop.eup %1502  ;;  %v908_v36 = vmul.f32 %v1501_v34, %v1499_v32 }
 0x27c   :  { %v907_v41 = vmul.f32 %v1503_v35, %v1136_v33  ;;  %v1505_v46 = vpop.eup %1504 }
 0x27e   :  { %v909_v42 = vadd.f32 %v908_v36, %v907_v41 }
 0x280   :  { %1506 = vtanh.f32 %v909_v42  ;;  %1141 = vst [vmem:[%s1760_s10 + $0x8] sm:$0xff] %v909_v42  ;;  %v1038_v42 = vld [vmem:[%s1754_s4] sm:$0xff] }
 0x281   :  { %vm1039_vm7 = vcmp.eq.s32.totalorder %v1038_v42, 0 }
 0x28a   :  { %v1507_v48 = vpop.eup %1506 }
 0x28b   :  { %v911_v49 = vmul.f32 %v1507_v48, %v1505_v46 }
 0x28d   :  { %v932_v50 = vrot.slane %v911_v49, %v931_v47  ;;  %1140 = vst [vmem:[%s1759_s9 + $0x8] sm:$0xff] %v911_v49  ;;  %v925_v51 = vcombine.high %v911_v49, %v911_v49 }
 0x28f   :  { %v948_v52 = vrot.slane %v932_v50, %v931_v47  ;;  %v940_v53 = vcombine.high %v932_v50, %v932_v50  ;;  %v939_v54 = vrot.slane %v925_v51, %v931_v47 }
 0x291   :  { %v977_v56 = vrot.slane %v948_v52, %v1671_v39  ;;  %v970_v57 = vcombine.high %v948_v52, %v948_v52  ;;  %v962_v58 = vrot.slane %v940_v53, %v931_v47  ;;  %v955_v60 = vrot.slane %v939_v54, %v931_v47 }
 0x292   :  { %v941_v61 = vcombine.high %v939_v54, %v939_v54 }
 0x293   :  { %v1014_v62 = vmul.f32 %v977_v56, %v916_v55  ;;  %v985_v63 = vrot.slane %v970_v57, %v1671_v39  ;;  %v981_v0 = vrot.slane %v962_v58, %v1671_v39  ;;  %v972_v1 = vcombine.high %v962_v58, %v962_v58 }
 0x294   :  { %v969_v5 = vrot.slane %v941_v61, %v931_v47  ;;  %v993_v8 = vrot.slane %v955_v60, %v1671_v39  ;;  %v971_v9 = vcombine.high %v955_v60, %v955_v60 }
 0x295   :  { %1022 = vadd.xlane.f32.xlu0 %v1014_v62  ;;  %v1016_v3 = vmul.f32 %v985_v63, %v918_v59  ;;  %v989_v4 = vrot.slane %v972_v1, %v1671_v39  ;;  %v1015_v7 = vmul.f32 %v981_v0, %v917_v2 }
 0x296   :  { %v997_v12 = vrot.slane %v969_v5, %v1671_v39  ;;  %v973_v13 = vcombine.high %v969_v5, %v969_v5  ;;  %v1018_v15 = vmul.f32 %v993_v8, %v920_v10  ;;  %v1001_v16 = vrot.slane %v971_v9, %v1671_v39 }
 0x297   :  { %1026 = vadd.xlane.f32.xlu1 %v1016_v3  ;;  %v1017_v11 = vmul.f32 %v989_v4, %v919_v6 }
 0x298   :  { %v1019_v18 = vmul.f32 %v997_v12, %v921_v14  ;;  %v1005_v19 = vrot.slane %v973_v13, %v1671_v39  ;;  %v1020_v21 = vmul.f32 %v1001_v16, %v922_v17 }
 0x299   :  { %1024 = vadd.xlane.f32.xlu0 %v1015_v7 }
 0x29a   :  { %v1021_v22 = vmul.f32 %v1005_v19, %v923_v20 }
 0x29b   :  { %1028 = vadd.xlane.f32.xlu1 %v1017_v11 }
 0x29d   :  { %1030 = vadd.xlane.f32.xlu0 %v1018_v15 }
 0x29f   :  { %1032 = vadd.xlane.f32.xlu1 %v1019_v18 }
 0x2a1   :  { %1034 = vadd.xlane.f32.xlu0 %v1020_v21 }
 0x2a3   :  { %1036 = vadd.xlane.f32.xlu1 %v1021_v22 }
 0x322   :  { %v1023_v24 = vpop.xlane.xlu0 %1022 }
 0x323   :  { %v1053_v28 = vrot.slane %v1023_v24, %v1052_v25 }
 0x324   :  { %v1027_v26 = vpop.xlane.xlu1 %1026 }
 0x325   :  { %v1061_v39 = vrot.slane %v1027_v26, %v1052_v25 }
 0x326   :  { %v1025_v27 = vpop.xlane.xlu0 %1024 }
 0x327   :  { %v1057_v29 = vrot.slane %v1025_v27, %v1052_v25 }
 0x328   :  { %v1029_v30 = vpop.xlane.xlu1 %1028 }
 0x329   :  { %v1083_v31 = vsel %vm1082_vm0, %v1057_v29, %v1053_v28  ;;  %v1065_v32 = vrot.slane %v1029_v30, %v1052_v25 }
 0x32a   :  { %v1085_v33 = vsel %vm1084_vm1, %v1061_v39, %v1083_v31  ;;  %v1031_v34 = vpop.xlane.xlu0 %1030 }
 0x32b   :  { %v1087_v35 = vsel %vm1086_vm2, %v1065_v32, %v1085_v33  ;;  %v1069_v36 = vrot.slane %v1031_v34, %v1052_v25 }
 0x32c   :  { %v1033_v37 = vpop.xlane.xlu1 %1032 }
 0x32d   :  { %v1089_v40 = vsel %vm1088_vm3, %v1069_v36, %v1087_v35  ;;  %v1073_v38 = vrot.slane %v1033_v37, %v1052_v25 }
 0x32e   :  { %v1035_v41 = vpop.xlane.xlu0 %1034 }
 0x32f   :  { %v1091_v43 = vsel %vm1090_vm4, %v1073_v38, %v1089_v40  ;;  %v1077_v44 = vrot.slane %v1035_v41, %v1052_v25 }
 0x330   :  { %v1037_v45 = vpop.xlane.xlu1 %1036 }
 0x331   :  { %v1093_v46 = vsel %vm1092_vm5, %v1077_v44, %v1091_v43  ;;  %v1081_v47 = vrot.slane %v1037_v45, %v1052_v25 }
 0x333   :  { %v1095_v48 = vsel %vm1094_vm6, %v1081_v47, %v1093_v46 }
 0x334   :  { %v1097_v49 = vsel %vm1039_vm7, -1e+30, %v1095_v48 }
 0x335   :  { %v1099_v50 = vsel %vm1098_vm8, %v1097_v49, -inf  ;;  %1111 = vst.msk [vmem:[%s1761_s11] sm:$0xff] %vm1098_vm8, %v1097_v49 }
 0x336   :  { %1100 = vmax.xlane.f32.xlu0 %v1099_v50 }
 0x3c3   :  { %v1101_v51 = vpop.xlane.xlu0 %1100 }
 0x3c4   :  { %v1102_v52 = vsub.f32 %v1097_v49, %v1101_v51 }
 0x3c6   :  { %v1103_v53 = vmul.f32 1.442695, %v1102_v52 }
 0x3c8   :  { %1508 = vpow2.f32 %v1103_v53 }
 0x3d2   :  { %v1509_v54 = vpop.eup %1508 }
 0x3d3   :  { %v1105_v55 = vsel %vm1098_vm8, %v1509_v54, 0.0 }
 0x3d4   :  { %1106 = vadd.xlane.f32.xlu1 %v1105_v55 }
 0x461   :  { %v1107_v56 = vpop.xlane.xlu1 %1106 }
 0x462   :  { %1510 = vlog2.f32 %v1107_v56 }
 0x46c   :  { %v1511_v57 = vpop.eup %1510 }
 0x46d   :  { %v1109_v58 = vmul.f32 0.6931472, %v1511_v57 }
 0x46f   :  { %v1110_v59 = vadd.f32 %v1109_v58, %v1101_v51 }
 0x471   :  { %v1112_v60 = vsub.f32 %v1097_v49, %v1110_v59 }
 0x473   :  { %1113 = vst.msk [vmem:[%s1762_s12] sm:$0xff] %vm1098_vm8, %v1112_v60 }
 0x474   :  { %1130 = vsyncpa [#allocation3], 1 }
 0x475   :  { %1131 = vsyncpa [#allocation5], 1 }

// kernel: _lambda_.8
= control target key start
LH: loop header
LB: loop body
LE: loop exit
PB: predicated region body
PF: predicated region fallthrough
CT: control target
= control target key end

     0   :  { %v342_v3 = vmov 0.0|0.0   ;;  %vm343_vm0 = vmmov 0   ;;  %v344_v4 = vmov 0.0   ;;  %vm70_vm1 = vcmask 261120   ;;  %s512_s1 = inlined_call_operand.vmem [shape: f32[288,64], index: 1, kind: input, shape index: {}]   ;;  %s513_s0 = inlined_call_operand.vmem [shape: f32[8,288], index: 0, kind: input, shape index: {}]   ;;  %s514_s4 = inlined_call_operand.<no memory space> [shape: f32[1,1], index: 4, kind: input, shape index: {}]   ;;  %s515_s2 = inlined_call_operand.vmem [shape: f32[1,64], index: 2, kind: input, shape index: {}]   ;;  %s516_s3 = inlined_call_operand.vmem [shape: f32[1,64], index: 3, kind: input, shape index: {}]   ;;  %s517_s5 = inlined_call_operand.vmem [shape: f32[8,64], index: 5, kind: output, shape index: {0}]   ;;  %s518_s6 = inlined_call_operand.vmem [shape: f32[8,1], index: 6, kind: output, shape index: {1}]  }
   0x1   :  { %v43_v0 = vld [vmem:[%s512_s1 + $0x80] sm:$0xff]  ;;  %v44_v1 = vld [vmem:[%s512_s1 + $0x88] sm:$0xff]  ;;  %333 = vmatprep.subr.bf16.mxu1 %v342_v3  ;;  %298 = vmatprep.mubr.msk.f32.mxu1 %vm343_vm0, %v344_v4  ;;  %v45_v7 = vld [vmem:[%s512_s1 + $0x90] sm:$0xff]  ;;  %v12_v59 = vstv %s514_s4  ;;  %vm215_vm2 = vcmask 523264   ;;  %vm236_vm3 = vcmask 7168  }
   0x2   :  { %v27_v2 = vld [vmem:[%s512_s1] sm:$0xff]  ;;  %v301_v5 = vpack.c.bf16 %v44_v1, %v43_v0  ;;  %v28_v6 = vld [vmem:[%s512_s1 + $0x8] sm:$0xff]  ;;  %v46_v8 = vld [vmem:[%s512_s1 + $0x98] sm:$0xff]  ;;  %13 = vst [vmem:[#allocation2] sm:$0x1] %v12_v59 }
   0x3   :  { %v303_v9 = vpack.c.bf16 %v28_v6, %v27_v2  ;;  %v305_v10 = vpack.c.bf16 %v46_v8, %v45_v7  ;;  %v29_v11 = vld [vmem:[%s512_s1 + $0x10] sm:$0xff]  ;;  %v30_v12 = vld [vmem:[%s512_s1 + $0x18] sm:$0xff]  ;;  %v47_v13 = vld [vmem:[%s512_s1 + $0xa0] sm:$0xff] }
   0x4   :  { %302 = vmatprep.subr.bf16.mxu0 %v301_v5  ;;  %v48_v14 = vld [vmem:[%s512_s1 + $0xa8] sm:$0xff]  ;;  %v307_v15 = vpack.c.bf16 %v30_v12, %v29_v11  ;;  %v31_v17 = vld [vmem:[%s512_s1 + $0x20] sm:$0xff]  ;;  %v49_v19 = vld [vmem:[%s512_s1 + $0xb0] sm:$0xff] }
   0x5   :  { %304 = vmatpush3.bf16.msra.mxu0 %v303_v9  ;;  %v309_v16 = vpack.c.bf16 %v48_v14, %v47_v13  ;;  %v32_v18 = vld [vmem:[%s512_s1 + $0x28] sm:$0xff]  ;;  %v50_v20 = vld [vmem:[%s512_s1 + $0xb8] sm:$0xff]  ;;  %v33_v23 = vld [vmem:[%s512_s1 + $0x30] sm:$0xff] }
   0x6   :  { %306 = vmatprep.subr.bf16.mxu0 %v305_v10  ;;  %v311_v21 = vpack.c.bf16 %v32_v18, %v31_v17  ;;  %v313_v22 = vpack.c.bf16 %v50_v20, %v49_v19  ;;  %v34_v24 = vld [vmem:[%s512_s1 + $0x38] sm:$0xff]  ;;  %v51_v25 = vld [vmem:[%s512_s1 + $0xc0] sm:$0xff]  ;;  %v52_v26 = vld [vmem:[%s512_s1 + $0xc8] sm:$0xff] }
   0x7   :  { %v59_v27 = vld [vmem:[%s512_s1 + $0x100] sm:$0xff]  ;;  %v60_v28 = vld [vmem:[%s512_s1 + $0x108] sm:$0xff]  ;;  %v315_v30 = vpack.c.bf16 %v34_v24, %v33_v23  ;;  %v61_v32 = vld [vmem:[%s512_s1 + $0x110] sm:$0xff]  ;;  %v317_v34 = vpack.c.bf16 %v52_v26, %v51_v25 }
   0x8   :  { %v25_v29 = vld [vmem:[%s513_s0 + $0x8] sm:$0xff]  ;;  %v334_v31 = vpack.c.bf16 %v60_v28, %v59_v27  ;;  %v62_v33 = vld [vmem:[%s512_s1 + $0x118] sm:$0xff]  ;;  %v35_v35 = vld [vmem:[%s512_s1 + $0x40] sm:$0xff] }
   0x9   :  { %308 = vmatpush3.bf16.msra.mxu0 %v307_v15  ;;  %138 = vmatprep.mubr.f32.mxu0 %v25_v29  ;;  %v36_v36 = vld [vmem:[%s512_s1 + $0x48] sm:$0xff]  ;;  %v53_v37 = vld [vmem:[%s512_s1 + $0xd0] sm:$0xff]  ;;  %v54_v38 = vld [vmem:[%s512_s1 + $0xd8] sm:$0xff]  ;;  %v337_v39 = vpack.c.bf16 %v62_v33, %v61_v32 }
   0xa   :  { %310 = vmatprep.subr.bf16.mxu0 %v309_v16  ;;  %335 = vmatpush3.bf16.msra.mxu1 %v334_v31  ;;  %v319_v40 = vpack.c.bf16 %v36_v36, %v35_v35  ;;  %v321_v41 = vpack.c.bf16 %v54_v38, %v53_v37  ;;  %v37_v42 = vld [vmem:[%s512_s1 + $0x50] sm:$0xff]  ;;  %v38_v43 = vld [vmem:[%s512_s1 + $0x58] sm:$0xff]  ;;  %v55_v44 = vld [vmem:[%s512_s1 + $0xe0] sm:$0xff] }
   0xb   :  { %336 = vmatprep.subr.bf16.mxu1 %v342_v3  ;;  %v56_v45 = vld [vmem:[%s512_s1 + $0xe8] sm:$0xff]  ;;  %v26_v46 = vld [vmem:[%s513_s0 + $0x10] sm:$0xff]  ;;  %v323_v47 = vpack.c.bf16 %v38_v43, %v37_v42  ;;  %v39_v49 = vld [vmem:[%s512_s1 + $0x60] sm:$0xff] }
   0xc   :  { %v325_v48 = vpack.c.bf16 %v56_v45, %v55_v44  ;;  %v40_v50 = vld [vmem:[%s512_s1 + $0x68] sm:$0xff]  ;;  %v57_v51 = vld [vmem:[%s512_s1 + $0xf0] sm:$0xff]  ;;  %v58_v52 = vld [vmem:[%s512_s1 + $0xf8] sm:$0xff] }
   0xd   :  { %312 = vmatpush3.bf16.msra.mxu0 %v311_v21  ;;  %v327_v53 = vpack.c.bf16 %v40_v50, %v39_v49  ;;  %v329_v54 = vpack.c.bf16 %v58_v52, %v57_v51  ;;  %v41_v55 = vld [vmem:[%s512_s1 + $0x70] sm:$0xff]  ;;  %v42_v56 = vld [vmem:[%s512_s1 + $0x78] sm:$0xff]  ;;  %v24_v58 = vld [vmem:[%s513_s0] sm:$0xff] }
   0xe   :  { %314 = vmatprep.subr.bf16.mxu0 %v313_v22  ;;  %338 = vmatpush3.bf16.msra.mxu1 %v337_v39  ;;  %v331_v57 = vpack.c.bf16 %v42_v56, %v41_v55  ;;  %v246_v0 = vld [vmem:[%s515_s2] ss:$0 sm:$0xff] }
   0xf   :  { %v248_v4 = vld [vmem:[%s516_s3] ss:$0 sm:$0xff] }
  0x10   :  { %v249_v8 = vld [vmem:[#allocation2] ss:$0 sm:$0xff] }
  0x11   :  { %316 = vmatpush3.bf16.msra.mxu0 %v315_v30  ;;  %299 = vmatmul.mubr.msk.f32.vlgmr.msra.gmra.mrb[0].mxu1 %vm70_vm1, %v26_v46 }
  0x12   :  { %318 = vmatprep.subr.bf16.mxu0 %v317_v34 }
  0x15   :  { %320 = vmatpush3.bf16.msra.mxu0 %v319_v40 }
  0x16   :  { %322 = vmatprep.subr.bf16.mxu0 %v321_v41 }
  0x19   :  { %324 = vmatpush3.bf16.msra.mxu0 %v323_v47 }
  0x1a   :  { %326 = vmatprep.subr.bf16.mxu0 %v325_v48 }
  0x1d   :  { %328 = vmatpush3.bf16.msra.mxu0 %v327_v53 }
  0x1e   :  { %330 = vmatprep.subr.bf16.mxu0 %v329_v54 }
  0x21   :  { %332 = vmatpush3.bf16.msra.mxu0 %v331_v57 }
  0x24   :  { %139 = vmatmul.mubr.f32.vlgmr.msra.gmra.mrb[0].mxu0 %v24_v58 }
  0xe4   :  { %v210_v60 = vpop.f32.mrb[0].mxu1 }
  0xe5   :  { %v300_v61 = vpop.f32.mrb[1].mxu1 }
  0xf7   :  { %v282_v62 = vpop.f32.mrb[0].mxu0 }
  0xf8   :  { %v283_v63 = vpop.f32.mrb[1].mxu0 }
  0xf9   :  { %v284_v1 = vadd.f32 %v283_v63, %v282_v62 }
  0xfb   :  { %v141_v2 = vadd.f32 %v284_v1, %v246_v0 }
  0xfd   :  { %v211_v3 = vadd.f32 %v210_v60, %v141_v2 }
  0xff   :  { %v214_v5 = vmax.f32 %v211_v3, 0.0 }
 0x101   :  { %216 = vst.msk [vmem:[%s517_s5] sm:$0xff] %vm215_vm2, %v214_v5  ;;  %v224_v6 = vmul.f32 %v248_v4, %v214_v5 }
 0x103   :  { %v225_v7 = vsel %vm215_vm2, %v224_v6, 0.0 }
 0x104   :  { %226 = vadd.xlane.f32.xlu0 %v225_v7 }
 0x191   :  { %v227_v9 = vpop.xlane.xlu0 %226 }
 0x192   :  { %v235_v10 = vadd.f32 %v249_v8, %v227_v9 }
 0x194   :  { %237 = vst.msk [vmem:[%s518_s6] sm:$0xff] %vm236_vm3, %v235_v10 }

// kernel: _lambda_.9
= control target key start
LH: loop header
LB: loop body
LE: loop exit
PB: predicated region body
PF: predicated region fallthrough
CT: control target
= control target key end

     0   :  { %vm25_vm0 = vcmask 523264   ;;  %vm37_vm1 = vcmask 7168   ;;  %s77_s0 = inlined_call_operand.vmem [shape: f32[8,64], index: 0, kind: input, shape index: {}]   ;;  %s78_s1 = inlined_call_operand.vmem [shape: f32[1,64], index: 1, kind: input, shape index: {}]   ;;  %s79_s2 = inlined_call_operand.<no memory space> [shape: f32[1,1], index: 2, kind: input, shape index: {}]   ;;  %s80_s3 = inlined_call_operand.vmem [shape: f32[8,1], index: 3, kind: output, shape index: {}]  }
   0x1   :  { %v16_v0 = vld [vmem:[%s77_s0] sm:$0xff]  ;;  %v8_v2 = vstv %s79_s2 }
   0x2   :  { %v43_v1 = vld [vmem:[%s78_s1] ss:$0 sm:$0xff]  ;;  %9 = vst [vmem:[#allocation2] sm:$0x1] %v8_v2 }
   0x3   :  { %v24_v3 = vmul.f32 %v43_v1, %v16_v0 }
   0x5   :  { %v26_v4 = vsel %vm25_vm0, %v24_v3, 0.0 }
   0x6   :  { %27 = vadd.xlane.f32.xlu0 %v26_v4 }
   0x9   :  { %v44_v5 = vld [vmem:[#allocation2] ss:$0 sm:$0xff] }
  0x93   :  { %v28_v6 = vpop.xlane.xlu0 %27 }
  0x94   :  { %v36_v7 = vadd.f32 %v44_v5, %v28_v6 }
  0x96   :  { %38 = vst.msk [vmem:[%s80_s3] sm:$0xff] %vm37_vm1, %v36_v7 }

// kernel: _lambda_.6
= control target key start
LH: loop header
LB: loop body
LE: loop exit
PB: predicated region body
PF: predicated region fallthrough
CT: control target
= control target key end

     0   :  { %18 = vsyncpa [#allocation3], 0  ;;  %s2699_s0 = inlined_call_operand.vmem [shape: f32[8,256], index: 0, kind: input, shape index: {}]   ;;  %s2700_s1 = inlined_call_operand.vmem [shape: f32[2,8,128], index: 1, kind: input, shape index: {}, may-alias: {1,2}]   ;;  %s2701_s2 = inlined_call_operand.vmem [shape: f32[2,8,128], index: 2, kind: input, shape index: {}, may-alias: {1,2}]   ;;  %s2702_s3 = inlined_call_operand.vmem [shape: f32[8,8,128], index: 3, kind: input, shape index: {}]   ;;  %s2703_s4 = inlined_call_operand.vmem [shape: s32[8,8], index: 4, kind: input, shape index: {}]   ;;  %s2704_s5 = inlined_call_operand.vmem [shape: f32[384,512], index: 5, kind: input, shape index: {}]   ;;  %s2705_s6 = inlined_call_operand.vmem [shape: f32[1,512], index: 6, kind: input, shape index: {}]   ;;  %s2706_s7 = inlined_call_operand.vmem [shape: f32[256,512], index: 7, kind: input, shape index: {}]   ;;  %s2707_s8 = inlined_call_operand.vmem [shape: f32[1,512], index: 8, kind: input, shape index: {}]   ;;  %s2708_s9 = inlined_call_operand.hbm [shape: f32[2,8,128], index: 9, kind: output, shape index: {0}]   ;;  %s2709_s10 = inlined_call_operand.hbm [shape: f32[2,8,128], index: 10, kind: output, shape index: {1}]   ;;  %s2710_s11 = inlined_call_operand.vmem [shape: f32[8,8], index: 11, kind: output, shape index: {2}]   ;;  %s2711_s12 = inlined_call_operand.vmem [shape: f32[8,8], index: 12, kind: output, shape index: {3}]  }
   0x1   :  { %v41_v0 = vld [vmem:[%s2704_s5 + $0x8] sm:$0xff]  ;;  %v43_v2 = vld [vmem:[%s2704_s5 + $0x18] sm:$0xff]  ;;  %v40_v5 = vld [vmem:[%s2704_s5] sm:$0xff] }
   0x2   :  { %v45_v1 = vld [vmem:[%s2704_s5 + $0x28] sm:$0xff]  ;;  %v47_v4 = vld [vmem:[%s2704_s5 + $0x38] sm:$0xff]  ;;  %v44_v6 = vld [vmem:[%s2704_s5 + $0x20] sm:$0xff] }
   0x3   :  { %v1136_v3 = vpack.c.bf16 %v45_v1, %v41_v0  ;;  %v1232_v7 = vpack.c.bf16 %v47_v4, %v43_v2  ;;  %v1138_v8 = vpack.c.bf16 %v44_v6, %v40_v5  ;;  %v42_v9 = vld [vmem:[%s2704_s5 + $0x10] sm:$0xff]  ;;  %v49_v11 = vld [vmem:[%s2704_s5 + $0x48] sm:$0xff]  ;;  %v51_v14 = vld [vmem:[%s2704_s5 + $0x58] sm:$0xff] }
   0x4   :  { %v46_v10 = vld [vmem:[%s2704_s5 + $0x30] sm:$0xff]  ;;  %v53_v13 = vld [vmem:[%s2704_s5 + $0x68] sm:$0xff]  ;;  %v55_v15 = vld [vmem:[%s2704_s5 + $0x78] sm:$0xff] }
   0x5   :  { %1137 = vmatprep.subr.bf16.mxu0 %v1136_v3  ;;  %v1234_v12 = vpack.c.bf16 %v46_v10, %v42_v9  ;;  %1233 = vmatprep.subr.bf16.mxu1 %v1232_v7  ;;  %v1140_v16 = vpack.c.bf16 %v53_v13, %v49_v11  ;;  %v1236_v17 = vpack.c.bf16 %v55_v15, %v51_v14  ;;  %v48_v18 = vld [vmem:[%s2704_s5 + $0x40] sm:$0xff]  ;;  %v50_v20 = vld [vmem:[%s2704_s5 + $0x50] sm:$0xff]  ;;  %v57_v23 = vld [vmem:[%s2704_s5 + $0x88] sm:$0xff] }
   0x6   :  { %1139 = vmatpush1.bf16.msra.mxu0 %v1138_v8  ;;  %v52_v19 = vld [vmem:[%s2704_s5 + $0x60] sm:$0xff]  ;;  %v54_v22 = vld [vmem:[%s2704_s5 + $0x70] sm:$0xff]  ;;  %v61_v24 = vld [vmem:[%s2704_s5 + $0xa8] sm:$0xff] }
   0x7   :  { %1235 = vmatpush1.bf16.msra.mxu1 %v1234_v12  ;;  %v1142_v21 = vpack.c.bf16 %v52_v19, %v48_v18  ;;  %1141 = vmatprep.subr.bf16.mxu0 %v1140_v16  ;;  %v1238_v25 = vpack.c.bf16 %v54_v22, %v50_v20  ;;  %v1144_v26 = vpack.c.bf16 %v61_v24, %v57_v23  ;;  %v59_v27 = vld [vmem:[%s2704_s5 + $0x98] sm:$0xff]  ;;  %v56_v29 = vld [vmem:[%s2704_s5 + $0x80] sm:$0xff]  ;;  %v58_v32 = vld [vmem:[%s2704_s5 + $0x90] sm:$0xff] }
   0x8   :  { %1237 = vmatprep.subr.bf16.mxu1 %v1236_v17  ;;  %v63_v28 = vld [vmem:[%s2704_s5 + $0xb8] sm:$0xff]  ;;  %v60_v31 = vld [vmem:[%s2704_s5 + $0xa0] sm:$0xff]  ;;  %v62_v33 = vld [vmem:[%s2704_s5 + $0xb0] sm:$0xff] }
   0x9   :  { %v1240_v30 = vpack.c.bf16 %v63_v28, %v59_v27  ;;  %v1146_v34 = vpack.c.bf16 %v60_v31, %v56_v29  ;;  %v65_v35 = vld [vmem:[%s2704_s5 + $0xc8] sm:$0xff]  ;;  %v67_v37 = vld [vmem:[%s2704_s5 + $0xd8] sm:$0xff]  ;;  %v1242_v38 = vpack.c.bf16 %v62_v33, %v58_v32  ;;  %v64_v41 = vld [vmem:[%s2704_s5 + $0xc0] sm:$0xff] }
   0xa   :  { %1143 = vmatpush1.bf16.msra.mxu0 %v1142_v21  ;;  %v69_v36 = vld [vmem:[%s2704_s5 + $0xe8] sm:$0xff]  ;;  %v71_v40 = vld [vmem:[%s2704_s5 + $0xf8] sm:$0xff]  ;;  %v68_v42 = vld [vmem:[%s2704_s5 + $0xe0] sm:$0xff] }
   0xb   :  { %1239 = vmatpush1.bf16.msra.mxu1 %v1238_v25  ;;  %1145 = vmatprep.subr.bf16.mxu0 %v1144_v26  ;;  %v1148_v39 = vpack.c.bf16 %v69_v36, %v65_v35  ;;  %v1244_v43 = vpack.c.bf16 %v71_v40, %v67_v37  ;;  %v66_v44 = vld [vmem:[%s2704_s5 + $0xd0] sm:$0xff]  ;;  %v73_v46 = vld [vmem:[%s2704_s5 + $0x108] sm:$0xff]  ;;  %v75_v48 = vld [vmem:[%s2704_s5 + $0x118] sm:$0xff]  ;;  %v1150_v50 = vpack.c.bf16 %v68_v42, %v64_v41 }
   0xc   :  { %1241 = vmatprep.subr.bf16.mxu1 %v1240_v30  ;;  %v70_v45 = vld [vmem:[%s2704_s5 + $0xf0] sm:$0xff]  ;;  %v77_v47 = vld [vmem:[%s2704_s5 + $0x128] sm:$0xff]  ;;  %v79_v49 = vld [vmem:[%s2704_s5 + $0x138] sm:$0xff] }
   0xd   :  { %v1246_v51 = vpack.c.bf16 %v70_v45, %v66_v44  ;;  %v1152_v52 = vpack.c.bf16 %v77_v47, %v73_v46  ;;  %v72_v53 = vld [vmem:[%s2704_s5 + $0x100] sm:$0xff]  ;;  %v74_v55 = vld [vmem:[%s2704_s5 + $0x110] sm:$0xff]  ;;  %v1248_v56 = vpack.c.bf16 %v79_v49, %v75_v48  ;;  %v81_v58 = vld [vmem:[%s2704_s5 + $0x148] sm:$0xff] }
   0xe   :  { %1147 = vmatpush1.bf16.msra.mxu0 %v1146_v34  ;;  %v76_v54 = vld [vmem:[%s2704_s5 + $0x120] sm:$0xff]  ;;  %v78_v57 = vld [vmem:[%s2704_s5 + $0x130] sm:$0xff]  ;;  %v85_v59 = vld [vmem:[%s2704_s5 + $0x168] sm:$0xff] }
   0xf   :  { %1243 = vmatpush1.bf16.msra.mxu1 %v1242_v38  ;;  %1149 = vmatprep.subr.bf16.mxu0 %v1148_v39  ;;  %v83_v60 = vld [vmem:[%s2704_s5 + $0x158] sm:$0xff]  ;;  %v1154_v62 = vpack.c.bf16 %v76_v54, %v72_v53  ;;  %v1250_v63 = vpack.c.bf16 %v78_v57, %v74_v55  ;;  %v1156_v0 = vpack.c.bf16 %v85_v59, %v81_v58  ;;  %v80_v1 = vld [vmem:[%s2704_s5 + $0x140] sm:$0xff]  ;;  %v82_v3 = vld [vmem:[%s2704_s5 + $0x150] sm:$0xff] }
  0x10   :  { %1245 = vmatprep.subr.bf16.mxu1 %v1244_v43  ;;  %v87_v61 = vld [vmem:[%s2704_s5 + $0x178] sm:$0xff]  ;;  %v84_v2 = vld [vmem:[%s2704_s5 + $0x160] sm:$0xff]  ;;  %v86_v5 = vld [vmem:[%s2704_s5 + $0x170] sm:$0xff] }
  0x11   :  { %v1252_v4 = vpack.c.bf16 %v87_v61, %v83_v60  ;;  %v89_v6 = vld [vmem:[%s2704_s5 + $0x188] sm:$0xff]  ;;  %v91_v8 = vld [vmem:[%s2704_s5 + $0x198] sm:$0xff]  ;;  %v1158_v10 = vpack.c.bf16 %v84_v2, %v80_v1  ;;  %v1254_v11 = vpack.c.bf16 %v86_v5, %v82_v3  ;;  %v88_v13 = vld [vmem:[%s2704_s5 + $0x180] sm:$0xff] }
  0x12   :  { %1151 = vmatpush1.bf16.msra.mxu0 %v1150_v50  ;;  %v93_v7 = vld [vmem:[%s2704_s5 + $0x1a8] sm:$0xff]  ;;  %v95_v9 = vld [vmem:[%s2704_s5 + $0x1b8] sm:$0xff]  ;;  %v92_v14 = vld [vmem:[%s2704_s5 + $0x1a0] sm:$0xff] }
  0x13   :  { %1247 = vmatpush1.bf16.msra.mxu1 %v1246_v51  ;;  %1153 = vmatprep.subr.bf16.mxu0 %v1152_v52  ;;  %v1160_v12 = vpack.c.bf16 %v93_v7, %v89_v6  ;;  %v90_v15 = vld [vmem:[%s2704_s5 + $0x190] sm:$0xff]  ;;  %v1256_v16 = vpack.c.bf16 %v95_v9, %v91_v8  ;;  %v97_v18 = vld [vmem:[%s2704_s5 + $0x1c8] sm:$0xff]  ;;  %v99_v20 = vld [vmem:[%s2704_s5 + $0x1d8] sm:$0xff]  ;;  %v1162_v22 = vpack.c.bf16 %v92_v14, %v88_v13 }
  0x14   :  { %1249 = vmatprep.subr.bf16.mxu1 %v1248_v56  ;;  %v94_v17 = vld [vmem:[%s2704_s5 + $0x1b0] sm:$0xff]  ;;  %v101_v19 = vld [vmem:[%s2704_s5 + $0x1e8] sm:$0xff]  ;;  %v103_v21 = vld [vmem:[%s2704_s5 + $0x1f8] sm:$0xff] }
  0x15   :  { %v1258_v23 = vpack.c.bf16 %v94_v17, %v90_v15  ;;  %v1164_v24 = vpack.c.bf16 %v101_v19, %v97_v18  ;;  %v96_v25 = vld [vmem:[%s2704_s5 + $0x1c0] sm:$0xff]  ;;  %v98_v27 = vld [vmem:[%s2704_s5 + $0x1d0] sm:$0xff]  ;;  %v1260_v28 = vpack.c.bf16 %v103_v21, %v99_v20  ;;  %v105_v30 = vld [vmem:[%s2704_s5 + $0x208] sm:$0xff] }
  0x16   :  { %1155 = vmatpush1.bf16.msra.mxu0 %v1154_v62  ;;  %v100_v26 = vld [vmem:[%s2704_s5 + $0x1e0] sm:$0xff]  ;;  %v102_v29 = vld [vmem:[%s2704_s5 + $0x1f0] sm:$0xff]  ;;  %v109_v31 = vld [vmem:[%s2704_s5 + $0x228] sm:$0xff] }
  0x17   :  { %1251 = vmatpush1.bf16.msra.mxu1 %v1250_v63  ;;  %1157 = vmatprep.subr.bf16.mxu0 %v1156_v0  ;;  %v107_v32 = vld [vmem:[%s2704_s5 + $0x218] sm:$0xff]  ;;  %v1166_v34 = vpack.c.bf16 %v100_v26, %v96_v25  ;;  %v1262_v35 = vpack.c.bf16 %v102_v29, %v98_v27  ;;  %v1168_v36 = vpack.c.bf16 %v109_v31, %v105_v30  ;;  %v104_v37 = vld [vmem:[%s2704_s5 + $0x200] sm:$0xff]  ;;  %v106_v39 = vld [vmem:[%s2704_s5 + $0x210] sm:$0xff] }
  0x18   :  { %1253 = vmatprep.subr.bf16.mxu1 %v1252_v4  ;;  %v111_v33 = vld [vmem:[%s2704_s5 + $0x238] sm:$0xff]  ;;  %v108_v38 = vld [vmem:[%s2704_s5 + $0x220] sm:$0xff]  ;;  %v110_v41 = vld [vmem:[%s2704_s5 + $0x230] sm:$0xff] }
  0x19   :  { %v1264_v40 = vpack.c.bf16 %v111_v33, %v107_v32  ;;  %v113_v42 = vld [vmem:[%s2704_s5 + $0x248] sm:$0xff]  ;;  %v115_v44 = vld [vmem:[%s2704_s5 + $0x258] sm:$0xff]  ;;  %v1170_v46 = vpack.c.bf16 %v108_v38, %v104_v37  ;;  %v1266_v47 = vpack.c.bf16 %v110_v41, %v106_v39  ;;  %v112_v49 = vld [vmem:[%s2704_s5 + $0x240] sm:$0xff] }
  0x1a   :  { %1159 = vmatpush1.bf16.msra.mxu0 %v1158_v10  ;;  %v117_v43 = vld [vmem:[%s2704_s5 + $0x268] sm:$0xff]  ;;  %v119_v45 = vld [vmem:[%s2704_s5 + $0x278] sm:$0xff]  ;;  %v116_v50 = vld [vmem:[%s2704_s5 + $0x260] sm:$0xff] }
  0x1b   :  { %1255 = vmatpush1.bf16.msra.mxu1 %v1254_v11  ;;  %1161 = vmatprep.subr.bf16.mxu0 %v1160_v12  ;;  %v1172_v48 = vpack.c.bf16 %v117_v43, %v113_v42  ;;  %v114_v51 = vld [vmem:[%s2704_s5 + $0x250] sm:$0xff]  ;;  %v1268_v52 = vpack.c.bf16 %v119_v45, %v115_v44  ;;  %v121_v54 = vld [vmem:[%s2704_s5 + $0x288] sm:$0xff]  ;;  %v123_v56 = vld [vmem:[%s2704_s5 + $0x298] sm:$0xff]  ;;  %v1174_v58 = vpack.c.bf16 %v116_v50, %v112_v49 }
  0x1c   :  { %1257 = vmatprep.subr.bf16.mxu1 %v1256_v16  ;;  %v118_v53 = vld [vmem:[%s2704_s5 + $0x270] sm:$0xff]  ;;  %v125_v55 = vld [vmem:[%s2704_s5 + $0x2a8] sm:$0xff]  ;;  %v127_v57 = vld [vmem:[%s2704_s5 + $0x2b8] sm:$0xff] }
  0x1d   :  { %v1270_v59 = vpack.c.bf16 %v118_v53, %v114_v51  ;;  %v1176_v60 = vpack.c.bf16 %v125_v55, %v121_v54  ;;  %v120_v61 = vld [vmem:[%s2704_s5 + $0x280] sm:$0xff]  ;;  %v122_v63 = vld [vmem:[%s2704_s5 + $0x290] sm:$0xff]  ;;  %v1272_v0 = vpack.c.bf16 %v127_v57, %v123_v56  ;;  %v129_v2 = vld [vmem:[%s2704_s5 + $0x2c8] sm:$0xff] }
  0x1e   :  { %1163 = vmatpush1.bf16.msra.mxu0 %v1162_v22  ;;  %v124_v62 = vld [vmem:[%s2704_s5 + $0x2a0] sm:$0xff]  ;;  %v126_v1 = vld [vmem:[%s2704_s5 + $0x2b0] sm:$0xff]  ;;  %v133_v3 = vld [vmem:[%s2704_s5 + $0x2e8] sm:$0xff] }
  0x1f   :  { %1259 = vmatpush1.bf16.msra.mxu1 %v1258_v23  ;;  %1165 = vmatprep.subr.bf16.mxu0 %v1164_v24  ;;  %v131_v4 = vld [vmem:[%s2704_s5 + $0x2d8] sm:$0xff]  ;;  %v1178_v6 = vpack.c.bf16 %v124_v62, %v120_v61  ;;  %v128_v7 = vld [vmem:[%s2704_s5 + $0x2c0] sm:$0xff]  ;;  %v1274_v8 = vpack.c.bf16 %v126_v1, %v122_v63  ;;  %v1180_v9 = vpack.c.bf16 %v133_v3, %v129_v2  ;;  %v130_v11 = vld [vmem:[%s2704_s5 + $0x2d0] sm:$0xff] }
  0x20   :  { %1261 = vmatprep.subr.bf16.mxu1 %v1260_v28  ;;  %v135_v5 = vld [vmem:[%s2704_s5 + $0x2f8] sm:$0xff]  ;;  %v132_v10 = vld [vmem:[%s2704_s5 + $0x2e0] sm:$0xff]  ;;  %v134_v12 = vld [vmem:[%s2704_s5 + $0x2f0] sm:$0xff] }
  0x21   :  { %v1276_v13 = vpack.c.bf16 %v135_v5, %v131_v4  ;;  %v137_v14 = vld [vmem:[%s2704_s5 + $0x308] sm:$0xff]  ;;  %v139_v17 = vld [vmem:[%s2704_s5 + $0x318] sm:$0xff]  ;;  %v1182_v19 = vpack.c.bf16 %v132_v10, %v128_v7  ;;  %v1278_v20 = vpack.c.bf16 %v134_v12, %v130_v11  ;;  %v136_v22 = vld [vmem:[%s2704_s5 + $0x300] sm:$0xff] }
  0x22   :  { %1167 = vmatpush1.bf16.msra.mxu0 %v1166_v34  ;;  %v141_v15 = vld [vmem:[%s2704_s5 + $0x328] sm:$0xff]  ;;  %v143_v18 = vld [vmem:[%s2704_s5 + $0x338] sm:$0xff]  ;;  %v140_v23 = vld [vmem:[%s2704_s5 + $0x320] sm:$0xff] }
  0x23   :  { %1263 = vmatpush1.bf16.msra.mxu1 %v1262_v35  ;;  %1169 = vmatprep.subr.bf16.mxu0 %v1168_v36  ;;  %v39_v16 = vld [vmem:[%s2699_s0 + $0x8] sm:$0xff]  ;;  %v1184_v21 = vpack.c.bf16 %v141_v15, %v137_v14  ;;  %v138_v24 = vld [vmem:[%s2704_s5 + $0x310] sm:$0xff]  ;;  %v1280_v25 = vpack.c.bf16 %v143_v18, %v139_v17  ;;  %v147_v29 = vld [vmem:[%s2704_s5 + $0x358] sm:$0xff]  ;;  %v1186_v31 = vpack.c.bf16 %v140_v23, %v136_v22 }
  0x24   :  { %1265 = vmatprep.subr.bf16.mxu1 %v1264_v40  ;;  %320 = vmatprep.mubr.f32.mxu0 %v39_v16  ;;  %v142_v26 = vld [vmem:[%s2704_s5 + $0x330] sm:$0xff]  ;;  %v145_v27 = vld [vmem:[%s2704_s5 + $0x348] sm:$0xff]  ;;  %v151_v30 = vld [vmem:[%s2704_s5 + $0x378] sm:$0xff] }
  0x25   :  { %462 = vmatprep.mubr.f32.mxu1 %v39_v16  ;;  %v149_v28 = vld [vmem:[%s2704_s5 + $0x368] sm:$0xff]  ;;  %v1282_v32 = vpack.c.bf16 %v142_v26, %v138_v24  ;;  %v144_v34 = vld [vmem:[%s2704_s5 + $0x340] sm:$0xff]  ;;  %v146_v36 = vld [vmem:[%s2704_s5 + $0x350] sm:$0xff]  ;;  %v1284_v37 = vpack.c.bf16 %v151_v30, %v147_v29 }
  0x26   :  { %1171 = vmatpush1.bf16.msra.mxu0 %v1170_v46  ;;  %v1188_v33 = vpack.c.bf16 %v149_v28, %v145_v27  ;;  %v148_v35 = vld [vmem:[%s2704_s5 + $0x360] sm:$0xff]  ;;  %v150_v38 = vld [vmem:[%s2704_s5 + $0x370] sm:$0xff]  ;;  %v153_v39 = vld [vmem:[%s2704_s5 + $0x388] sm:$0xff] }
  0x27   :  { %1267 = vmatpush1.bf16.msra.mxu1 %v1266_v47  ;;  %1173 = vmatprep.subr.bf16.mxu0 %v1172_v48  ;;  %v157_v40 = vld [vmem:[%s2704_s5 + $0x3a8] sm:$0xff]  ;;  %v155_v41 = vld [vmem:[%s2704_s5 + $0x398] sm:$0xff]  ;;  %v1190_v43 = vpack.c.bf16 %v148_v35, %v144_v34  ;;  %v1286_v44 = vpack.c.bf16 %v150_v38, %v146_v36  ;;  %v152_v46 = vld [vmem:[%s2704_s5 + $0x380] sm:$0xff]  ;;  %v1554_v38 = vmov 0.0  }
  0x28   :  { %1269 = vmatprep.subr.bf16.mxu1 %v1268_v52  ;;  %v159_v42 = vld [vmem:[%s2704_s5 + $0x3b8] sm:$0xff]  ;;  %v1192_v45 = vpack.c.bf16 %v157_v40, %v153_v39  ;;  %v156_v47 = vld [vmem:[%s2704_s5 + $0x3a0] sm:$0xff]  ;;  %v154_v48 = vld [vmem:[%s2704_s5 + $0x390] sm:$0xff] }
  0x29   :  { %v1288_v49 = vpack.c.bf16 %v159_v42, %v155_v41  ;;  %v158_v50 = vld [vmem:[%s2704_s5 + $0x3b0] sm:$0xff]  ;;  %v161_v51 = vld [vmem:[%s2704_s5 + $0x3c8] sm:$0xff]  ;;  %v163_v53 = vld [vmem:[%s2704_s5 + $0x3d8] sm:$0xff]  ;;  %v1194_v55 = vpack.c.bf16 %v156_v47, %v152_v46 }
  0x2a   :  { %1175 = vmatpush1.bf16.msra.mxu0 %v1174_v58  ;;  %v165_v52 = vld [vmem:[%s2704_s5 + $0x3e8] sm:$0xff]  ;;  %v167_v54 = vld [vmem:[%s2704_s5 + $0x3f8] sm:$0xff]  ;;  %v1290_v56 = vpack.c.bf16 %v158_v50, %v154_v48  ;;  %v160_v58 = vld [vmem:[%s2704_s5 + $0x3c0] sm:$0xff] }
  0x2b   :  { %1271 = vmatpush1.bf16.msra.mxu1 %v1270_v59  ;;  %1177 = vmatprep.subr.bf16.mxu0 %v1176_v60  ;;  %v1196_v57 = vpack.c.bf16 %v165_v52, %v161_v51  ;;  %v164_v59 = vld [vmem:[%s2704_s5 + $0x3e0] sm:$0xff]  ;;  %v162_v60 = vld [vmem:[%s2704_s5 + $0x3d0] sm:$0xff]  ;;  %v1292_v61 = vpack.c.bf16 %v167_v54, %v163_v53  ;;  %v169_v63 = vld [vmem:[%s2704_s5 + $0x408] sm:$0xff] }
  0x2c   :  { %1273 = vmatprep.subr.bf16.mxu1 %v1272_v0  ;;  %v166_v62 = vld [vmem:[%s2704_s5 + $0x3f0] sm:$0xff]  ;;  %v173_v0 = vld [vmem:[%s2704_s5 + $0x428] sm:$0xff]  ;;  %v171_v1 = vld [vmem:[%s2704_s5 + $0x418] sm:$0xff]  ;;  %v1198_v3 = vpack.c.bf16 %v164_v59, %v160_v58 }
  0x2d   :  { %v175_v2 = vld [vmem:[%s2704_s5 + $0x438] sm:$0xff]  ;;  %v1294_v4 = vpack.c.bf16 %v166_v62, %v162_v60  ;;  %v1200_v5 = vpack.c.bf16 %v173_v0, %v169_v63  ;;  %v172_v7 = vld [vmem:[%s2704_s5 + $0x420] sm:$0xff]  ;;  %v174_v10 = vld [vmem:[%s2704_s5 + $0x430] sm:$0xff] }
  0x2e   :  { %1179 = vmatpush1.bf16.msra.mxu0 %v1178_v6  ;;  %v168_v6 = vld [vmem:[%s2704_s5 + $0x400] sm:$0xff]  ;;  %v177_v11 = vld [vmem:[%s2704_s5 + $0x448] sm:$0xff]  ;;  %v183_v14 = vld [vmem:[%s2704_s5 + $0x478] sm:$0xff] }
  0x2f   :  { %1275 = vmatpush1.bf16.msra.mxu1 %v1274_v8  ;;  %1181 = vmatprep.subr.bf16.mxu0 %v1180_v9  ;;  %v170_v8 = vld [vmem:[%s2704_s5 + $0x410] sm:$0xff]  ;;  %v1296_v9 = vpack.c.bf16 %v175_v2, %v171_v1  ;;  %v181_v12 = vld [vmem:[%s2704_s5 + $0x468] sm:$0xff]  ;;  %v38_v15 = vld [vmem:[%s2699_s0] sm:$0xff]  ;;  %v1202_v16 = vpack.c.bf16 %v172_v7, %v168_v6 }
  0x30   :  { %1277 = vmatprep.subr.bf16.mxu1 %v1276_v13  ;;  %v179_v13 = vld [vmem:[%s2704_s5 + $0x458] sm:$0xff]  ;;  %v1298_v17 = vpack.c.bf16 %v174_v10, %v170_v8  ;;  %v1204_v18 = vpack.c.bf16 %v181_v12, %v177_v11  ;;  %v182_v23 = vld [vmem:[%s2704_s5 + $0x470] sm:$0xff]  ;;  %v185_v24 = vld [vmem:[%s2704_s5 + $0x488] sm:$0xff] }
  0x31   :  { %v1300_v22 = vpack.c.bf16 %v183_v14, %v179_v13  ;;  %v187_v26 = vld [vmem:[%s2704_s5 + $0x498] sm:$0xff]  ;;  %v190_v35 = vld [vmem:[%s2704_s5 + $0x4b0] sm:$0xff]  ;;  %v193_v36 = vld [vmem:[%s2704_s5 + $0x4c8] sm:$0xff] }
  0x32   :  { %1183 = vmatpush1.bf16.msra.mxu0 %v1182_v19  ;;  %v176_v19 = vld [vmem:[%s2704_s5 + $0x440] sm:$0xff]  ;;  %v191_v27 = vld [vmem:[%s2704_s5 + $0x4b8] sm:$0xff]  ;;  %v194_v46 = vld [vmem:[%s2704_s5 + $0x4d0] sm:$0xff] }
  0x33   :  { %1279 = vmatpush1.bf16.msra.mxu1 %v1278_v20  ;;  %1185 = vmatprep.subr.bf16.mxu0 %v1184_v21  ;;  %v180_v20 = vld [vmem:[%s2704_s5 + $0x460] sm:$0xff]  ;;  %v178_v21 = vld [vmem:[%s2704_s5 + $0x450] sm:$0xff]  ;;  %v1304_v34 = vpack.c.bf16 %v191_v27, %v187_v26  ;;  %v195_v39 = vld [vmem:[%s2704_s5 + $0x4d8] sm:$0xff] }
  0x34   :  { %1281 = vmatprep.subr.bf16.mxu1 %v1280_v25  ;;  %v189_v25 = vld [vmem:[%s2704_s5 + $0x4a8] sm:$0xff]  ;;  %v1206_v28 = vpack.c.bf16 %v180_v20, %v176_v19  ;;  %v1302_v29 = vpack.c.bf16 %v182_v23, %v178_v21  ;;  %v199_v40 = vld [vmem:[%s2704_s5 + $0x4f8] sm:$0xff]  ;;  %v198_v48 = vld [vmem:[%s2704_s5 + $0x4f0] sm:$0xff] }
  0x35   :  { %v1208_v30 = vpack.c.bf16 %v189_v25, %v185_v24  ;;  %v1308_v47 = vpack.c.bf16 %v199_v40, %v195_v39  ;;  %v205_v50 = vld [vmem:[%s2704_s5 + $0x528] sm:$0xff]  ;;  %v203_v51 = vld [vmem:[%s2704_s5 + $0x518] sm:$0xff]  ;;  %v200_v54 = vld [vmem:[%s2704_s5 + $0x500] sm:$0xff] }
  0x36   :  { %1187 = vmatpush1.bf16.msra.mxu0 %v1186_v31  ;;  %v184_v31 = vld [vmem:[%s2704_s5 + $0x480] sm:$0xff]  ;;  %v207_v52 = vld [vmem:[%s2704_s5 + $0x538] sm:$0xff]  ;;  %v202_v58 = vld [vmem:[%s2704_s5 + $0x510] sm:$0xff] }
  0x37   :  { %1283 = vmatpush1.bf16.msra.mxu1 %v1282_v32  ;;  %1189 = vmatprep.subr.bf16.mxu0 %v1188_v33  ;;  %v188_v32 = vld [vmem:[%s2704_s5 + $0x4a0] sm:$0xff]  ;;  %v186_v33 = vld [vmem:[%s2704_s5 + $0x490] sm:$0xff] }
  0x38   :  { %1285 = vmatprep.subr.bf16.mxu1 %v1284_v37  ;;  %v197_v37 = vld [vmem:[%s2704_s5 + $0x4e8] sm:$0xff]  ;;  %v1210_v41 = vpack.c.bf16 %v188_v32, %v184_v31  ;;  %v1306_v42 = vpack.c.bf16 %v190_v35, %v186_v33 }
  0x3a   :  { %1191 = vmatpush1.bf16.msra.mxu0 %v1190_v43  ;;  %v1212_v43 = vpack.c.bf16 %v197_v37, %v193_v36 }
  0x3b   :  { %1287 = vmatpush1.bf16.msra.mxu1 %v1286_v44  ;;  %1193 = vmatprep.subr.bf16.mxu0 %v1192_v45  ;;  %v192_v44 = vld [vmem:[%s2704_s5 + $0x4c0] sm:$0xff] }
  0x3c   :  { %1289 = vmatprep.subr.bf16.mxu1 %v1288_v49  ;;  %v196_v45 = vld [vmem:[%s2704_s5 + $0x4e0] sm:$0xff]  ;;  %v201_v49 = vld [vmem:[%s2704_s5 + $0x508] sm:$0xff] }
  0x3d   :  { %v1214_v53 = vpack.c.bf16 %v196_v45, %v192_v44 }
  0x3e   :  { %1195 = vmatpush1.bf16.msra.mxu0 %v1194_v55  ;;  %v1310_v55 = vpack.c.bf16 %v198_v48, %v194_v46 }
  0x3f   :  { %1291 = vmatpush1.bf16.msra.mxu1 %v1290_v56  ;;  %1197 = vmatprep.subr.bf16.mxu0 %v1196_v57  ;;  %v1216_v56 = vpack.c.bf16 %v205_v50, %v201_v49  ;;  %v204_v57 = vld [vmem:[%s2704_s5 + $0x520] sm:$0xff] }
  0x40   :  { %1293 = vmatprep.subr.bf16.mxu1 %v1292_v61 }
  0x42   :  { %1199 = vmatpush1.bf16.msra.mxu0 %v1198_v3 }
  0x43   :  { %1295 = vmatpush1.bf16.msra.mxu1 %v1294_v4  ;;  %1201 = vmatprep.subr.bf16.mxu0 %v1200_v5 }
  0x44   :  { %1297 = vmatprep.subr.bf16.mxu1 %v1296_v9 }
  0x45   :  { %321 = vmatmul.mubr.f32.vlgmr.msra.gmra.mrb[0].mxu0 %v38_v15 }
  0x46   :  { %1203 = vmatpush1.bf16.msra.mxu0 %v1202_v16  ;;  %463 = vmatmul.mubr.f32.vlgmr.msra.gmra.mrb[0].mxu1 %v38_v15 }
  0x47   :  { %1299 = vmatpush1.bf16.msra.mxu1 %v1298_v17  ;;  %1205 = vmatprep.subr.bf16.mxu0 %v1204_v18 }
  0x48   :  { %1301 = vmatprep.subr.bf16.mxu1 %v1300_v22  ;;  %391 = vmatprep.mubr.f32.mxu0 %v1554_v38 }
  0x49   :  { %533 = vmatprep.mubr.f32.mxu1 %v1554_v38 }
  0x4a   :  { %1207 = vmatpush1.bf16.msra.mxu0 %v1206_v28 }
  0x4b   :  { %1303 = vmatpush1.bf16.msra.mxu1 %v1302_v29  ;;  %1209 = vmatprep.subr.bf16.mxu0 %v1208_v30 }
  0x4c   :  { %1305 = vmatprep.subr.bf16.mxu1 %v1304_v34 }
  0x4e   :  { %1211 = vmatpush1.bf16.msra.mxu0 %v1210_v41 }
  0x4f   :  { %1307 = vmatpush1.bf16.msra.mxu1 %v1306_v42  ;;  %1213 = vmatprep.subr.bf16.mxu0 %v1212_v43 }
  0x50   :  { %19 = vsyncpa [#allocation5], 0  ;;  %1309 = vmatprep.subr.bf16.mxu1 %v1308_v47  ;;  %v1312_v59 = vpack.c.bf16 %v207_v52, %v203_v51  ;;  %v206_v60 = vld [vmem:[%s2704_s5 + $0x530] sm:$0xff]  ;;  %v209_v61 = vld [vmem:[%s2704_s5 + $0x548] sm:$0xff]  ;;  %v1218_v1 = vpack.c.bf16 %v204_v57, %v200_v54  ;;  %vm1056_vm0 = vcmask 1041409   ;;  %vm1058_vm1 = vcmask 1042434  }
  0x51   :  { %v213_v62 = vld [vmem:[%s2704_s5 + $0x568] sm:$0xff]  ;;  %v211_v63 = vld [vmem:[%s2704_s5 + $0x558] sm:$0xff]  ;;  %v1314_v2 = vpack.c.bf16 %v206_v60, %v202_v58  ;;  %v208_v4 = vld [vmem:[%s2704_s5 + $0x540] sm:$0xff]  ;;  %vm1060_vm2 = vcmask 1043459   ;;  %vm1062_vm3 = vcmask 1044484   ;;  %vm1064_vm4 = vcmask 1045509  }
  0x52   :  { %v215_v0 = vld [vmem:[%s2704_s5 + $0x578] sm:$0xff]  ;;  %1215 = vmatpush1.bf16.msra.mxu0 %v1214_v53  ;;  %v1220_v3 = vpack.c.bf16 %v213_v62, %v209_v61  ;;  %v212_v5 = vld [vmem:[%s2704_s5 + $0x560] sm:$0xff]  ;;  %v210_v6 = vld [vmem:[%s2704_s5 + $0x550] sm:$0xff]  ;;  %vm1066_vm5 = vcmask 1046534   ;;  %vm1068_vm6 = vcmask 1047559   ;;  %vm1072_vm8 = vcmask 64512  }
  0x53   :  { %1311 = vmatpush1.bf16.msra.mxu1 %v1310_v55  ;;  %1217 = vmatprep.subr.bf16.mxu0 %v1216_v56  ;;  %v1316_v7 = vpack.c.bf16 %v215_v0, %v211_v63  ;;  %v214_v8 = vld [vmem:[%s2704_s5 + $0x570] sm:$0xff]  ;;  %v217_v9 = vld [vmem:[%s2704_s5 + $0x588] sm:$0xff]  ;;  %v219_v11 = vld [vmem:[%s2704_s5 + $0x598] sm:$0xff]  ;;  %v1222_v13 = vpack.c.bf16 %v212_v5, %v208_v4 }
  0x54   :  { %1313 = vmatprep.subr.bf16.mxu1 %v1312_v59  ;;  %v221_v10 = vld [vmem:[%s2704_s5 + $0x5a8] sm:$0xff]  ;;  %v223_v12 = vld [vmem:[%s2704_s5 + $0x5b8] sm:$0xff]  ;;  %v1318_v14 = vpack.c.bf16 %v214_v8, %v210_v6  ;;  %v216_v16 = vld [vmem:[%s2704_s5 + $0x580] sm:$0xff] }
  0x55   :  { %v1224_v15 = vpack.c.bf16 %v221_v10, %v217_v9  ;;  %v220_v17 = vld [vmem:[%s2704_s5 + $0x5a0] sm:$0xff]  ;;  %v218_v18 = vld [vmem:[%s2704_s5 + $0x590] sm:$0xff]  ;;  %v1320_v19 = vpack.c.bf16 %v223_v12, %v219_v11  ;;  %v225_v21 = vld [vmem:[%s2704_s5 + $0x5c8] sm:$0xff] }
  0x56   :  { %1219 = vmatpush1.bf16.msra.mxu0 %v1218_v1  ;;  %v222_v20 = vld [vmem:[%s2704_s5 + $0x5b0] sm:$0xff]  ;;  %v229_v22 = vld [vmem:[%s2704_s5 + $0x5e8] sm:$0xff]  ;;  %v227_v23 = vld [vmem:[%s2704_s5 + $0x5d8] sm:$0xff]  ;;  %v1226_v25 = vpack.c.bf16 %v220_v17, %v216_v16 }
  0x57   :  { %1315 = vmatpush1.bf16.msra.mxu1 %v1314_v2  ;;  %1221 = vmatprep.subr.bf16.mxu0 %v1220_v3  ;;  %v231_v24 = vld [vmem:[%s2704_s5 + $0x5f8] sm:$0xff]  ;;  %v1322_v26 = vpack.c.bf16 %v222_v20, %v218_v18  ;;  %v1228_v27 = vpack.c.bf16 %v229_v22, %v225_v21  ;;  %v224_v28 = vld [vmem:[%s2704_s5 + $0x5c0] sm:$0xff]  ;;  %v226_v30 = vld [vmem:[%s2704_s5 + $0x5d0] sm:$0xff] }
  0x58   :  { %1317 = vmatprep.subr.bf16.mxu1 %v1316_v7  ;;  %v228_v29 = vld [vmem:[%s2704_s5 + $0x5e0] sm:$0xff]  ;;  %v1324_v31 = vpack.c.bf16 %v231_v24, %v227_v23  ;;  %v230_v32 = vld [vmem:[%s2704_s5 + $0x5f0] sm:$0xff]  ;;  %v567_v33 = vld [vmem:[%s2706_s7 + $0x8] sm:$0xff] }
  0x59   :  { %v571_v34 = vld [vmem:[%s2706_s7 + $0x28] sm:$0xff]  ;;  %v569_v35 = vld [vmem:[%s2706_s7 + $0x18] sm:$0xff]  ;;  %v1230_v37 = vpack.c.bf16 %v228_v29, %v224_v28  ;;  %v1326_v38 = vpack.c.bf16 %v230_v32, %v226_v30  ;;  %v566_v40 = vld [vmem:[%s2706_s7] sm:$0xff] }
  0x5a   :  { %1223 = vmatpush1.bf16.msra.mxu0 %v1222_v13  ;;  %v573_v36 = vld [vmem:[%s2706_s7 + $0x38] sm:$0xff]  ;;  %v1328_v39 = vpack.c.bf16 %v571_v34, %v567_v33  ;;  %v570_v41 = vld [vmem:[%s2706_s7 + $0x20] sm:$0xff]  ;;  %v568_v42 = vld [vmem:[%s2706_s7 + $0x10] sm:$0xff] }
  0x5b   :  { %1319 = vmatpush1.bf16.msra.mxu1 %v1318_v14  ;;  %1225 = vmatprep.subr.bf16.mxu0 %v1224_v15  ;;  %v1392_v43 = vpack.c.bf16 %v573_v36, %v569_v35  ;;  %v572_v44 = vld [vmem:[%s2706_s7 + $0x30] sm:$0xff]  ;;  %v575_v45 = vld [vmem:[%s2706_s7 + $0x48] sm:$0xff]  ;;  %v577_v47 = vld [vmem:[%s2706_s7 + $0x58] sm:$0xff]  ;;  %v1330_v50 = vpack.c.bf16 %v570_v41, %v566_v40 }
  0x5c   :  { %1321 = vmatprep.subr.bf16.mxu1 %v1320_v19  ;;  %v579_v46 = vld [vmem:[%s2706_s7 + $0x68] sm:$0xff]  ;;  %v581_v48 = vld [vmem:[%s2706_s7 + $0x78] sm:$0xff]  ;;  %v233_v49 = vld [vmem:[%s2700_s1] sm:$0xff]  ;;  %v1394_v51 = vpack.c.bf16 %v572_v44, %v568_v42 }
  0x5d   :  { %v1332_v52 = vpack.c.bf16 %v579_v46, %v575_v45  ;;  %v574_v53 = vld [vmem:[%s2706_s7 + $0x40] sm:$0xff]  ;;  %v576_v55 = vld [vmem:[%s2706_s7 + $0x50] sm:$0xff]  ;;  %v1396_v56 = vpack.c.bf16 %v581_v48, %v577_v47  ;;  %v583_v58 = vld [vmem:[%s2706_s7 + $0x88] sm:$0xff] }
  0x5e   :  { %1227 = vmatpush1.bf16.msra.mxu0 %v1226_v25  ;;  %v578_v54 = vld [vmem:[%s2706_s7 + $0x60] sm:$0xff]  ;;  %v580_v57 = vld [vmem:[%s2706_s7 + $0x70] sm:$0xff]  ;;  %v587_v59 = vld [vmem:[%s2706_s7 + $0xa8] sm:$0xff] }
  0x5f   :  { %1323 = vmatpush1.bf16.msra.mxu1 %v1322_v26  ;;  %1229 = vmatprep.subr.bf16.mxu0 %v1228_v27  ;;  %v585_v60 = vld [vmem:[%s2706_s7 + $0x98] sm:$0xff]  ;;  %v1334_v62 = vpack.c.bf16 %v578_v54, %v574_v53  ;;  %v1398_v63 = vpack.c.bf16 %v580_v57, %v576_v55  ;;  %v1336_v0 = vpack.c.bf16 %v587_v59, %v583_v58  ;;  %v582_v1 = vld [vmem:[%s2706_s7 + $0x80] sm:$0xff]  ;;  %v584_v3 = vld [vmem:[%s2706_s7 + $0x90] sm:$0xff] }
  0x60   :  { %1325 = vmatprep.subr.bf16.mxu1 %v1324_v31  ;;  %v589_v61 = vld [vmem:[%s2706_s7 + $0xb8] sm:$0xff]  ;;  %v586_v2 = vld [vmem:[%s2706_s7 + $0xa0] sm:$0xff]  ;;  %v588_v5 = vld [vmem:[%s2706_s7 + $0xb0] sm:$0xff] }
  0x61   :  { %v1400_v4 = vpack.c.bf16 %v589_v61, %v585_v60  ;;  %v591_v6 = vld [vmem:[%s2706_s7 + $0xc8] sm:$0xff]  ;;  %v593_v8 = vld [vmem:[%s2706_s7 + $0xd8] sm:$0xff]  ;;  %v1338_v10 = vpack.c.bf16 %v586_v2, %v582_v1  ;;  %v1402_v11 = vpack.c.bf16 %v588_v5, %v584_v3  ;;  %v590_v13 = vld [vmem:[%s2706_s7 + $0xc0] sm:$0xff] }
  0x62   :  { %1231 = vmatpush1.bf16.msra.mxu0 %v1230_v37  ;;  %v595_v7 = vld [vmem:[%s2706_s7 + $0xe8] sm:$0xff]  ;;  %v597_v9 = vld [vmem:[%s2706_s7 + $0xf8] sm:$0xff]  ;;  %v594_v14 = vld [vmem:[%s2706_s7 + $0xe0] sm:$0xff] }
  0x63   :  { %1327 = vmatpush1.bf16.msra.mxu1 %v1326_v38  ;;  %1329 = vmatprep.subr.bf16.mxu0 %v1328_v39  ;;  %v1340_v12 = vpack.c.bf16 %v595_v7, %v591_v6  ;;  %v592_v15 = vld [vmem:[%s2706_s7 + $0xd0] sm:$0xff]  ;;  %v1404_v16 = vpack.c.bf16 %v597_v9, %v593_v8  ;;  %v599_v18 = vld [vmem:[%s2706_s7 + $0x108] sm:$0xff]  ;;  %v601_v20 = vld [vmem:[%s2706_s7 + $0x118] sm:$0xff]  ;;  %v1342_v22 = vpack.c.bf16 %v594_v14, %v590_v13 }
  0x64   :  { %1393 = vmatprep.subr.bf16.mxu1 %v1392_v43  ;;  %v596_v17 = vld [vmem:[%s2706_s7 + $0xf0] sm:$0xff]  ;;  %v603_v19 = vld [vmem:[%s2706_s7 + $0x128] sm:$0xff]  ;;  %v605_v21 = vld [vmem:[%s2706_s7 + $0x138] sm:$0xff] }
  0x65   :  { %392 = vmatmul.mubr.f32.vlgmr.msra.gmra.mrb[0].mxu0 %v233_v49  ;;  %v1406_v23 = vpack.c.bf16 %v596_v17, %v592_v15  ;;  %v1344_v24 = vpack.c.bf16 %v603_v19, %v599_v18  ;;  %v1408_v25 = vpack.c.bf16 %v605_v21, %v601_v20  ;;  %v598_v26 = vld [vmem:[%s2706_s7 + $0x100] sm:$0xff]  ;;  %v600_v28 = vld [vmem:[%s2706_s7 + $0x110] sm:$0xff]  ;;  %v607_v32 = vld [vmem:[%s2706_s7 + $0x148] sm:$0xff] }
  0x66   :  { %534 = vmatmul.mubr.f32.vlgmr.msra.gmra.mrb[0].mxu1 %v233_v49  ;;  %1331 = vmatpush1.bf16.msra.mxu0 %v1330_v50  ;;  %v602_v27 = vld [vmem:[%s2706_s7 + $0x120] sm:$0xff]  ;;  %v604_v30 = vld [vmem:[%s2706_s7 + $0x130] sm:$0xff]  ;;  %v611_v33 = vld [vmem:[%s2706_s7 + $0x168] sm:$0xff] }
  0x67   :  { %1395 = vmatpush1.bf16.msra.mxu1 %v1394_v51  ;;  %1333 = vmatprep.subr.bf16.mxu0 %v1332_v52  ;;  %v1346_v29 = vpack.c.bf16 %v602_v27, %v598_v26  ;;  %v1410_v31 = vpack.c.bf16 %v604_v30, %v600_v28  ;;  %v609_v34 = vld [vmem:[%s2706_s7 + $0x158] sm:$0xff]  ;;  %v1348_v35 = vpack.c.bf16 %v611_v33, %v607_v32  ;;  %v606_v37 = vld [vmem:[%s2706_s7 + $0x140] sm:$0xff]  ;;  %v608_v41 = vld [vmem:[%s2706_s7 + $0x150] sm:$0xff] }
  0x68   :  { %1397 = vmatprep.subr.bf16.mxu1 %v1396_v56  ;;  %v613_v36 = vld [vmem:[%s2706_s7 + $0x178] sm:$0xff]  ;;  %v610_v38 = vld [vmem:[%s2706_s7 + $0x160] sm:$0xff]  ;;  %v612_v42 = vld [vmem:[%s2706_s7 + $0x170] sm:$0xff] }
  0x69   :  { %v1412_v39 = vpack.c.bf16 %v613_v36, %v609_v34  ;;  %v1350_v40 = vpack.c.bf16 %v610_v38, %v606_v37  ;;  %v1414_v43 = vpack.c.bf16 %v612_v42, %v608_v41  ;;  %v615_v44 = vld [vmem:[%s2706_s7 + $0x188] sm:$0xff]  ;;  %v617_v46 = vld [vmem:[%s2706_s7 + $0x198] sm:$0xff]  ;;  %v614_v49 = vld [vmem:[%s2706_s7 + $0x180] sm:$0xff] }
  0x6a   :  { %1335 = vmatpush1.bf16.msra.mxu0 %v1334_v62  ;;  %v619_v45 = vld [vmem:[%s2706_s7 + $0x1a8] sm:$0xff]  ;;  %v621_v48 = vld [vmem:[%s2706_s7 + $0x1b8] sm:$0xff]  ;;  %v618_v50 = vld [vmem:[%s2706_s7 + $0x1a0] sm:$0xff] }
  0x6b   :  { %1399 = vmatpush1.bf16.msra.mxu1 %v1398_v63  ;;  %1337 = vmatprep.subr.bf16.mxu0 %v1336_v0  ;;  %v1352_v47 = vpack.c.bf16 %v619_v45, %v615_v44  ;;  %v1416_v51 = vpack.c.bf16 %v621_v48, %v617_v46  ;;  %v1354_v52 = vpack.c.bf16 %v618_v50, %v614_v49  ;;  %v616_v53 = vld [vmem:[%s2706_s7 + $0x190] sm:$0xff]  ;;  %v623_v56 = vld [vmem:[%s2706_s7 + $0x1c8] sm:$0xff]  ;;  %v625_v58 = vld [vmem:[%s2706_s7 + $0x1d8] sm:$0xff] }
  0x6c   :  { %1401 = vmatprep.subr.bf16.mxu1 %v1400_v4  ;;  %v620_v54 = vld [vmem:[%s2706_s7 + $0x1b0] sm:$0xff]  ;;  %v627_v57 = vld [vmem:[%s2706_s7 + $0x1e8] sm:$0xff]  ;;  %v629_v60 = vld [vmem:[%s2706_s7 + $0x1f8] sm:$0xff] }
  0x6d   :  { %v1418_v55 = vpack.c.bf16 %v620_v54, %v616_v53  ;;  %v1356_v59 = vpack.c.bf16 %v627_v57, %v623_v56  ;;  %v622_v61 = vld [vmem:[%s2706_s7 + $0x1c0] sm:$0xff]  ;;  %v1420_v63 = vpack.c.bf16 %v629_v60, %v625_v58  ;;  %v624_v1 = vld [vmem:[%s2706_s7 + $0x1d0] sm:$0xff]  ;;  %v631_v4 = vld [vmem:[%s2706_s7 + $0x208] sm:$0xff] }
  0x6e   :  { %1339 = vmatpush1.bf16.msra.mxu0 %v1338_v10  ;;  %v626_v62 = vld [vmem:[%s2706_s7 + $0x1e0] sm:$0xff]  ;;  %v628_v2 = vld [vmem:[%s2706_s7 + $0x1f0] sm:$0xff]  ;;  %v635_v5 = vld [vmem:[%s2706_s7 + $0x228] sm:$0xff] }
  0x6f   :  { %1403 = vmatpush1.bf16.msra.mxu1 %v1402_v11  ;;  %1341 = vmatprep.subr.bf16.mxu0 %v1340_v12  ;;  %v1358_v0 = vpack.c.bf16 %v626_v62, %v622_v61  ;;  %v1422_v3 = vpack.c.bf16 %v628_v2, %v624_v1  ;;  %v633_v6 = vld [vmem:[%s2706_s7 + $0x218] sm:$0xff]  ;;  %v1360_v7 = vpack.c.bf16 %v635_v5, %v631_v4  ;;  %v630_v9 = vld [vmem:[%s2706_s7 + $0x200] sm:$0xff]  ;;  %v632_v13 = vld [vmem:[%s2706_s7 + $0x210] sm:$0xff] }
  0x70   :  { %1405 = vmatprep.subr.bf16.mxu1 %v1404_v16  ;;  %v637_v8 = vld [vmem:[%s2706_s7 + $0x238] sm:$0xff]  ;;  %v634_v10 = vld [vmem:[%s2706_s7 + $0x220] sm:$0xff]  ;;  %v636_v14 = vld [vmem:[%s2706_s7 + $0x230] sm:$0xff] }
  0x71   :  { %v1424_v11 = vpack.c.bf16 %v637_v8, %v633_v6  ;;  %v1362_v12 = vpack.c.bf16 %v634_v10, %v630_v9  ;;  %v1426_v15 = vpack.c.bf16 %v636_v14, %v632_v13  ;;  %v639_v16 = vld [vmem:[%s2706_s7 + $0x248] sm:$0xff]  ;;  %v641_v18 = vld [vmem:[%s2706_s7 + $0x258] sm:$0xff]  ;;  %v638_v21 = vld [vmem:[%s2706_s7 + $0x240] sm:$0xff] }
  0x72   :  { %1343 = vmatpush1.bf16.msra.mxu0 %v1342_v22  ;;  %v643_v17 = vld [vmem:[%s2706_s7 + $0x268] sm:$0xff]  ;;  %v645_v20 = vld [vmem:[%s2706_s7 + $0x278] sm:$0xff]  ;;  %v642_v22 = vld [vmem:[%s2706_s7 + $0x260] sm:$0xff] }
  0x73   :  { %1407 = vmatpush1.bf16.msra.mxu1 %v1406_v23  ;;  %1345 = vmatprep.subr.bf16.mxu0 %v1344_v24  ;;  %v1364_v19 = vpack.c.bf16 %v643_v17, %v639_v16  ;;  %v1428_v23 = vpack.c.bf16 %v645_v20, %v641_v18  ;;  %v1366_v24 = vpack.c.bf16 %v642_v22, %v638_v21  ;;  %v644_v26 = vld [vmem:[%s2706_s7 + $0x270] sm:$0xff]  ;;  %v647_v28 = vld [vmem:[%s2706_s7 + $0x288] sm:$0xff]  ;;  %v649_v30 = vld [vmem:[%s2706_s7 + $0x298] sm:$0xff] }
  0x74   :  { %1409 = vmatprep.subr.bf16.mxu1 %v1408_v25  ;;  %v640_v25 = vld [vmem:[%s2706_s7 + $0x250] sm:$0xff]  ;;  %v653_v32 = vld [vmem:[%s2706_s7 + $0x2b8] sm:$0xff]  ;;  %v646_v33 = vld [vmem:[%s2706_s7 + $0x280] sm:$0xff] }
  0x75   :  { %v1430_v27 = vpack.c.bf16 %v644_v26, %v640_v25  ;;  %v650_v34 = vld [vmem:[%s2706_s7 + $0x2a0] sm:$0xff]  ;;  %v648_v37 = vld [vmem:[%s2706_s7 + $0x290] sm:$0xff]  ;;  %v659_v41 = vld [vmem:[%s2706_s7 + $0x2e8] sm:$0xff] }
  0x76   :  { %1347 = vmatpush1.bf16.msra.mxu0 %v1346_v29  ;;  %v651_v29 = vld [vmem:[%s2706_s7 + $0x2a8] sm:$0xff]  ;;  %v1370_v36 = vpack.c.bf16 %v650_v34, %v646_v33  ;;  %v652_v38 = vld [vmem:[%s2706_s7 + $0x2b0] sm:$0xff]  ;;  %v657_v42 = vld [vmem:[%s2706_s7 + $0x2d8] sm:$0xff] }
  0x77   :  { %1411 = vmatpush1.bf16.msra.mxu1 %v1410_v31  ;;  %1349 = vmatprep.subr.bf16.mxu0 %v1348_v35  ;;  %v1368_v31 = vpack.c.bf16 %v651_v29, %v647_v28  ;;  %v1432_v35 = vpack.c.bf16 %v653_v32, %v649_v30  ;;  %v661_v44 = vld [vmem:[%s2706_s7 + $0x2f8] sm:$0xff]  ;;  %v654_v45 = vld [vmem:[%s2706_s7 + $0x2c0] sm:$0xff]  ;;  %v656_v49 = vld [vmem:[%s2706_s7 + $0x2d0] sm:$0xff] }
  0x78   :  { %1413 = vmatprep.subr.bf16.mxu1 %v1412_v39  ;;  %v1434_v39 = vpack.c.bf16 %v652_v38, %v648_v37  ;;  %v658_v46 = vld [vmem:[%s2706_s7 + $0x2e0] sm:$0xff]  ;;  %v660_v50 = vld [vmem:[%s2706_s7 + $0x2f0] sm:$0xff]  ;;  %v667_v53 = vld [vmem:[%s2706_s7 + $0x328] sm:$0xff]  ;;  %v236_v37 = vlaneseq }
  0x79   :  { %v1374_v48 = vpack.c.bf16 %v658_v46, %v654_v45  ;;  %v669_v56 = vld [vmem:[%s2706_s7 + $0x338] sm:$0xff]  ;;  %v662_v57 = vld [vmem:[%s2706_s7 + $0x300] sm:$0xff]  ;;  %v664_v60 = vld [vmem:[%s2706_s7 + $0x310] sm:$0xff] }
  0x7a   :  { %1351 = vmatpush1.bf16.msra.mxu0 %v1350_v40  ;;  %v655_v40 = vld [vmem:[%s2706_s7 + $0x2c8] sm:$0xff]  ;;  %v668_v61 = vld [vmem:[%s2706_s7 + $0x330] sm:$0xff]  ;;  %v673_v2 = vld [vmem:[%s2706_s7 + $0x358] sm:$0xff]  ;;  %v2598_v38 = vshrl.u32 %v236_v37, 7 }
  0x7b   :  { %1415 = vmatpush1.bf16.msra.mxu1 %v1414_v43  ;;  %1353 = vmatprep.subr.bf16.mxu0 %v1352_v47  ;;  %v1372_v43 = vpack.c.bf16 %v659_v41, %v655_v40  ;;  %v1436_v47 = vpack.c.bf16 %v661_v44, %v657_v42  ;;  %v675_v1 = vld [vmem:[%s2706_s7 + $0x368] sm:$0xff]  ;;  %v677_v4 = vld [vmem:[%s2706_s7 + $0x378] sm:$0xff]  ;;  %v670_v5 = vld [vmem:[%s2706_s7 + $0x340] sm:$0xff] }
  0x7c   :  { %1417 = vmatprep.subr.bf16.mxu1 %v1416_v51  ;;  %v1438_v51 = vpack.c.bf16 %v660_v50, %v656_v49  ;;  %v674_v6 = vld [vmem:[%s2706_s7 + $0x360] sm:$0xff]  ;;  %v672_v9 = vld [vmem:[%s2706_s7 + $0x350] sm:$0xff]  ;;  %v683_v13 = vld [vmem:[%s2706_s7 + $0x3a8] sm:$0xff]  ;;  %v242_v41 = vsub.s32 1, %v2598_v38  ;;  %v250_v45 = vsub.s32 3, %v2598_v38 }
  0x7d   :  { %v1382_v8 = vpack.c.bf16 %v674_v6, %v670_v5  ;;  %v676_v10 = vld [vmem:[%s2706_s7 + $0x370] sm:$0xff]  ;;  %v681_v14 = vld [vmem:[%s2706_s7 + $0x398] sm:$0xff]  ;;  %v678_v18 = vld [vmem:[%s2706_s7 + $0x380] sm:$0xff] }
  0x7e   :  { %1355 = vmatpush1.bf16.msra.mxu0 %v1354_v52  ;;  %v663_v52 = vld [vmem:[%s2706_s7 + $0x308] sm:$0xff]  ;;  %v680_v20 = vld [vmem:[%s2706_s7 + $0x390] sm:$0xff]  ;;  %v693_v28 = vld [vmem:[%s2706_s7 + $0x3f8] sm:$0xff] }
  0x7f   :  { %1419 = vmatpush1.bf16.msra.mxu1 %v1418_v55  ;;  %1357 = vmatprep.subr.bf16.mxu0 %v1356_v59  ;;  %v1376_v54 = vpack.c.bf16 %v667_v53, %v663_v52  ;;  %v665_v55 = vld [vmem:[%s2706_s7 + $0x318] sm:$0xff]  ;;  %v666_v59 = vld [vmem:[%s2706_s7 + $0x320] sm:$0xff]  ;;  %v684_v22 = vld [vmem:[%s2706_s7 + $0x3b0] sm:$0xff] }
  0x80   :  { %1421 = vmatprep.subr.bf16.mxu1 %v1420_v63  ;;  %v1440_v58 = vpack.c.bf16 %v669_v56, %v665_v55  ;;  %v1378_v62 = vpack.c.bf16 %v666_v59, %v662_v57  ;;  %v1442_v63 = vpack.c.bf16 %v668_v61, %v664_v60  ;;  %v1450_v25 = vpack.c.bf16 %v684_v22, %v680_v20  ;;  %v686_v29 = vld [vmem:[%s2706_s7 + $0x3c0] sm:$0xff]  ;;  %v688_v32 = vld [vmem:[%s2706_s7 + $0x3d0] sm:$0xff]  ;;  %v1131_v34 = vld [vmem:[%s2700_s1 + $0x8] sm:$0xff] }
  0x81   :  { %v692_v33 = vld [vmem:[%s2706_s7 + $0x3f0] sm:$0xff]  ;;  %784 = vmatprep.mubr.f32.mxu0 %v1131_v34  ;;  %855 = vmatprep.mubr.f32.mxu1 %v1131_v34  ;;  %v232_v40 = vld [vmem:[%s2705_s6] sm:$0xf]  ;;  %s1557_s6 = smov [#allocation4]  }
  0x82   :  { %1359 = vmatpush1.bf16.msra.mxu0 %v1358_v0  ;;  %v671_v0 = vld [vmem:[%s2706_s7 + $0x348] sm:$0xff]  ;;  %v251_v53 = vrot.slane %v232_v40, %v250_v45  ;;  %s1105_s26 = sshll.u32 %s1557_s6, 4  ;;  %s2664_s26 = int_to_ptr.vmem [resolvable:$true] %s1105_s26 }
  0x83   :  { %1423 = vmatpush1.bf16.msra.mxu1 %v1422_v3  ;;  %1361 = vmatprep.subr.bf16.mxu0 %v1360_v7  ;;  %v1380_v3 = vpack.c.bf16 %v675_v1, %v671_v0  ;;  %v1444_v7 = vpack.c.bf16 %v677_v4, %v673_v2  ;;  %v234_v1 = vld [vmem:[%s2701_s2] sm:$0xff] }
  0x84   :  { %1425 = vmatprep.subr.bf16.mxu1 %v1424_v11  ;;  %v679_v11 = vld [vmem:[%s2706_s7 + $0x388] sm:$0xff] }
  0x85   :  { %v1384_v16 = vpack.c.bf16 %v683_v13, %v679_v11  ;;  %v694_v11 = vld [vmem:[%s2707_s8] sm:$0xf] }
  0x86   :  { %1363 = vmatpush1.bf16.msra.mxu0 %v1362_v12  ;;  %v1446_v12 = vpack.c.bf16 %v676_v10, %v672_v9  ;;  %v707_v13 = vrot.slane %v694_v11, %v242_v41  ;;  %v715_v22 = vrot.slane %v694_v11, %v250_v45 }
  0x87   :  { %1427 = vmatpush1.bf16.msra.mxu1 %v1426_v15  ;;  %1365 = vmatprep.subr.bf16.mxu0 %v1364_v19  ;;  %v685_v15 = vld [vmem:[%s2706_s7 + $0x3b8] sm:$0xff]  ;;  %v682_v19 = vld [vmem:[%s2706_s7 + $0x3a0] sm:$0xff] }
  0x88   :  { %1429 = vmatprep.subr.bf16.mxu1 %v1428_v23  ;;  %v1448_v17 = vpack.c.bf16 %v685_v15, %v681_v14  ;;  %v1386_v21 = vpack.c.bf16 %v682_v19, %v678_v18  ;;  %v687_v23 = vld [vmem:[%s2706_s7 + $0x3c8] sm:$0xff] }
  0x8a   :  { %1367 = vmatpush1.bf16.msra.mxu0 %v1366_v24  ;;  %v691_v24 = vld [vmem:[%s2706_s7 + $0x3e8] sm:$0xff] }
  0x8b   :  { %1431 = vmatpush1.bf16.msra.mxu1 %v1430_v27  ;;  %1369 = vmatprep.subr.bf16.mxu0 %v1368_v31  ;;  %v1388_v26 = vpack.c.bf16 %v691_v24, %v687_v23  ;;  %v689_v27 = vld [vmem:[%s2706_s7 + $0x3d8] sm:$0xff]  ;;  %v690_v31 = vld [vmem:[%s2706_s7 + $0x3e0] sm:$0xff] }
  0x8c   :  { %1433 = vmatprep.subr.bf16.mxu1 %v1432_v35  ;;  %v1452_v30 = vpack.c.bf16 %v693_v28, %v689_v27  ;;  %v1390_v35 = vpack.c.bf16 %v690_v31, %v686_v29 }
  0x8e   :  { %1371 = vmatpush1.bf16.msra.mxu0 %v1370_v36  ;;  %v1454_v36 = vpack.c.bf16 %v692_v33, %v688_v32  ;;  %v1132_v33 = vld [vmem:[%s2701_s2 + $0x8] sm:$0xff] }
  0x8f   :  { %1435 = vmatpush1.bf16.msra.mxu1 %v1434_v39  ;;  %1373 = vmatprep.subr.bf16.mxu0 %v1372_v43  ;;  %v2601_v39 = vsub.s32 0, %v2598_v38  ;;  %v243_v43 = vrot.slane %v232_v40, %v242_v41 }
  0x90   :  { %1437 = vmatprep.subr.bf16.mxu1 %v1436_v47 }
  0x91   :  { %v239_v42 = vrot.slane %v232_v40, %v2601_v39 }
  0x92   :  { %1375 = vmatpush1.bf16.msra.mxu0 %v1374_v48 }
  0x93   :  { %1439 = vmatpush1.bf16.msra.mxu1 %v1438_v51  ;;  %1377 = vmatprep.subr.bf16.mxu0 %v1376_v54  ;;  %v246_v54 = vsub.s32 2, %v2598_v38 }
  0x94   :  { %1441 = vmatprep.subr.bf16.mxu1 %v1440_v58 }
  0x95   :  { %v247_v56 = vrot.slane %v232_v40, %v246_v54  ;;  %v711_v24 = vrot.slane %v694_v11, %v246_v54 }
  0x96   :  { %1379 = vmatpush1.bf16.msra.mxu0 %v1378_v62 }
  0x97   :  { %1443 = vmatpush1.bf16.msra.mxu1 %v1442_v63  ;;  %1381 = vmatprep.subr.bf16.mxu0 %v1380_v3 }
  0x98   :  { %1445 = vmatprep.subr.bf16.mxu1 %v1444_v7 }
  0x9a   :  { %1383 = vmatpush1.bf16.msra.mxu0 %v1382_v8 }
  0x9b   :  { %1447 = vmatpush1.bf16.msra.mxu1 %v1446_v12  ;;  %1385 = vmatprep.subr.bf16.mxu0 %v1384_v16  ;;  %v703_v12 = vrot.slane %v694_v11, %v2601_v39 }
  0x9c   :  { %1449 = vmatprep.subr.bf16.mxu1 %v1448_v17 }
  0x9e   :  { %1387 = vmatpush1.bf16.msra.mxu0 %v1386_v21 }
  0x9f   :  { %1451 = vmatpush1.bf16.msra.mxu1 %v1450_v25  ;;  %1389 = vmatprep.subr.bf16.mxu0 %v1388_v26 }
  0xa0   :  { %1453 = vmatprep.subr.bf16.mxu1 %v1452_v30 }
  0xa2   :  { %1391 = vmatpush1.bf16.msra.mxu0 %v1390_v35 }
  0xa3   :  { %1455 = vmatpush1.bf16.msra.mxu1 %v1454_v36 }
 0x138   :  { %v393_v44 = vpop.f32.mrb[0].mxu0 }
 0x139   :  { %v1456_v46 = vadd.f32 %v393_v44, %v239_v42  ;;  %v535_v47 = vpop.f32.mrb[0].mxu1  ;;  %v395_v48 = vpop.f32.mrb[1].mxu0 }
 0x13a   :  { %v1457_v49 = vadd.f32 %v395_v48, %v243_v43  ;;  %v537_v50 = vpop.f32.mrb[1].mxu1  ;;  %v1458_v58 = vadd.f32 %v535_v47, %v247_v56  ;;  %v1555_v43 = vmov 1966171168  }
 0x13b   :  { %v1128_v51 = vmul.f32 -1.442695, %v1456_v46  ;;  %v1459_v55 = vadd.f32 %v537_v50, %v251_v53  ;;  %v901_v44 = vunpack.c.l.s4 %v1555_v43 }
 0x13c   :  { %v1129_v52 = vmul.f32 -1.442695, %v1457_v49 }
 0x13d   :  { %1470 = vpow2.f32 %v1128_v51  ;;  %v1130_v57 = vmul.f32 -1.442695, %v1459_v55  ;;  %v902_v45 = vunpack.c.0.s8 %v901_v44  ;;  %v890_v55 = vld [vmem:[%s2702_s3] sm:$0xff] }
 0x13e   :  { %1472 = vpow2.f32 %v1129_v52 }
 0x13f   :  { %1474 = vpow2.f32 %v1130_v57  ;;  %v905_v47 = vsub.s32 %v902_v45, %v2598_v38 }
 0x140   :  { %1476 = vtanh.f32 %v1458_v58 }
 0x147   :  { %v1471_v59 = vpop.eup %1470 }
 0x148   :  { %v1473_v60 = vpop.eup %1472  ;;  %v543_v61 = vadd.f32 1.0, %v1471_v59  ;;  %v892_v59 = vld [vmem:[%s2702_s3 + $0x10] sm:$0xff] }
 0x149   :  { %v549_v62 = vadd.f32 1.0, %v1473_v60  ;;  %v1475_v63 = vpop.eup %1474 }
 0x14a   :  { %1478 = vrcp.f32 %v543_v61  ;;  %v1477_v0 = vpop.eup %1476  ;;  %v556_v5 = vadd.f32 1.0, %v1475_v63 }
 0x14b   :  { %1480 = vrcp.f32 %v549_v62 }
 0x14c   :  { %1482 = vrcp.f32 %v556_v5 }
 0x154   :  { %v1479_v2 = vpop.eup %1478 }
 0x155   :  { %v1481_v3 = vpop.eup %1480  ;;  %v560_v4 = vmul.f32 %v1479_v2, %v1477_v0  ;;  %v891_v2 = vld [vmem:[%s2702_s3 + $0x8] sm:$0xff] }
 0x156   :  { %v559_v6 = vmul.f32 %v1481_v3, %v234_v1  ;;  %v1483_v8 = vpop.eup %1482 }
 0x158   :  { %v561_v7 = vadd.f32 %v560_v4, %v559_v6  ;;  %v893_v6 = vld [vmem:[%s2702_s3 + $0x18] sm:$0xff] }
 0x15a   :  { %565 = vst [vmem:[#allocation4] sm:$0xff] %v561_v7  ;;  %1484 = vtanh.f32 %v561_v7 }
 0x164   :  { %v1485_v9 = vpop.eup %1484 }
 0x165   :  { %v563_v10 = vmul.f32 %v1485_v9, %v1483_v8 }
 0x167   :  { %785 = vmatmul.mubr.f32.vlgmr.msra.gmra.mrb[2].mxu0 %v563_v10  ;;  %564 = vst [vmem:[#allocation2] sm:$0xff] %v563_v10  ;;  %856 = vmatmul.mubr.f32.vlgmr.msra.gmra.mrb[2].mxu1 %v563_v10  ;;  %v894_v10 = vld [vmem:[%s2702_s3 + $0x20] sm:$0xff] }
 0x23a   :  { %v786_v14 = vpop.f32.mrb[2].mxu0  ;;  %v857_v15 = vpop.f32.mrb[2].mxu1 }
 0x23b   :  { %v787_v16 = vadd.f32 %v786_v14, %v703_v12  ;;  %v788_v17 = vpop.f32.mrb[3].mxu0  ;;  %v859_v18 = vpop.f32.mrb[3].mxu1  ;;  %v858_v26 = vadd.f32 %v857_v15, %v711_v24  ;;  %v895_v14 = vld [vmem:[%s2702_s3 + $0x28] sm:$0xff] }
 0x23c   :  { %v789_v19 = vadd.f32 %v788_v17, %v707_v13  ;;  %v860_v23 = vadd.f32 %v859_v18, %v715_v22  ;;  %v896_v17 = vld [vmem:[%s2702_s3 + $0x30] sm:$0xff] }
 0x23d   :  { %v1133_v20 = vmul.f32 -1.442695, %v787_v16 }
 0x23e   :  { %v1134_v21 = vmul.f32 -1.442695, %v789_v19  ;;  %v1135_v25 = vmul.f32 -1.442695, %v860_v23  ;;  %v1023_v23 = vand.u32 127, %v236_v37 }
 0x23f   :  { %1486 = vpow2.f32 %v1133_v20  ;;  %v897_v20 = vld [vmem:[%s2702_s3 + $0x38] sm:$0xff] }
 0x240   :  { %1488 = vpow2.f32 %v1134_v21 }
 0x241   :  { %1490 = vpow2.f32 %v1135_v25  ;;  %v1026_v25 = vsub.s32 %v1023_v23, %v2598_v38 }
 0x242   :  { %1492 = vtanh.f32 %v858_v26 }
 0x249   :  { %v1487_v27 = vpop.eup %1486 }
 0x24a   :  { %v1489_v28 = vpop.eup %1488  ;;  %v865_v29 = vadd.f32 1.0, %v1487_v27 }
 0x24b   :  { %v871_v30 = vadd.f32 1.0, %v1489_v28  ;;  %v1491_v31 = vpop.eup %1490 }
 0x24c   :  { %1494 = vrcp.f32 %v865_v29  ;;  %v1493_v32 = vpop.eup %1492  ;;  %v878_v40 = vadd.f32 1.0, %v1491_v31 }
 0x24d   :  { %1496 = vrcp.f32 %v871_v30 }
 0x24e   :  { %1498 = vrcp.f32 %v878_v40 }
 0x256   :  { %v1495_v34 = vpop.eup %1494 }
 0x257   :  { %v1497_v35 = vpop.eup %1496  ;;  %v882_v36 = vmul.f32 %v1495_v34, %v1493_v32 }
 0x258   :  { %v881_v41 = vmul.f32 %v1497_v35, %v1132_v33  ;;  %v1499_v46 = vpop.eup %1498 }
 0x25a   :  { %v883_v42 = vadd.f32 %v882_v36, %v881_v41 }
 0x25c   :  { %1500 = vtanh.f32 %v883_v42  ;;  %889 = vst [vmem:[#allocation4 + $0x8] sm:$0xff] %v883_v42  ;;  %v1012_v42 = vld [vmem:[%s2703_s4] sm:$0xff]  ;;  %s1556_s4 = smov [#allocation2]  }
 0x25d   :  { %vm1013_vm7 = vcmp.eq.s32.totalorder %v1012_v42, 0  ;;  %s1093_s1 = sshll.u32 %s1556_s4, 4  ;;  %s1094_s1 = int_to_ptr.vmem [resolvable:$true] %s1093_s1 }
 0x25e   :  { %s1506_s27 = scalar_lea.vmem %s1094_s1, 256  ;;  %p1511_p1 = scmp.lt.s32.totalorder %s1094_s1, %s1094_s1 }
 0x25f   :  { %p1507_p0 = scmp.ne.s32.totalorder %s1094_s1, %s1506_s27  ;;  %p1512_p2 = scmp.lt.s32.totalorder %s1506_s27, %s1506_s27 }
 0x261   :  { %p1513_p3 = por %p1512_p2, %p1511_p1 }
 0x263   :  { %p1514_p4 = pnand %p1513_p3, %p1507_p0 }
 0x266   :  { %v1501_v48 = vpop.eup %1500 }
 0x267   :  { %v885_v49 = vmul.f32 %v1501_v48, %v1499_v46 }
 0x269   :  { %v906_v50 = vrot.slane %v885_v49, %v905_v47  ;;  %887 = vst [vmem:[#allocation2 + $0x8] sm:$0xff] %v885_v49  ;;  %v899_v51 = vcombine.high %v885_v49, %v885_v49 }
 0x26b   :  { %v922_v52 = vrot.slane %v906_v50, %v905_v47  ;;  %v914_v53 = vcombine.high %v906_v50, %v906_v50  ;;  %v913_v54 = vrot.slane %v899_v51, %v905_v47 }
 0x26d   :  { %v951_v56 = vrot.slane %v922_v52, %v2601_v39  ;;  %v944_v57 = vcombine.high %v922_v52, %v922_v52  ;;  %v936_v58 = vrot.slane %v914_v53, %v905_v47  ;;  %v929_v60 = vrot.slane %v913_v54, %v905_v47 }
 0x26e   :  { %v915_v61 = vcombine.high %v913_v54, %v913_v54 }
 0x26f   :  { %v988_v62 = vmul.f32 %v951_v56, %v890_v55  ;;  %v959_v63 = vrot.slane %v944_v57, %v2601_v39  ;;  %v955_v0 = vrot.slane %v936_v58, %v2601_v39  ;;  %v946_v1 = vcombine.high %v936_v58, %v936_v58 }
 0x270   :  { %v943_v5 = vrot.slane %v915_v61, %v905_v47  ;;  %v967_v8 = vrot.slane %v929_v60, %v2601_v39  ;;  %v945_v9 = vcombine.high %v929_v60, %v929_v60 }
 0x271   :  { %996 = vadd.xlane.f32.xlu0 %v988_v62  ;;  %v990_v3 = vmul.f32 %v959_v63, %v892_v59  ;;  %v963_v4 = vrot.slane %v946_v1, %v2601_v39  ;;  %v989_v7 = vmul.f32 %v955_v0, %v891_v2 }
 0x272   :  { %v971_v12 = vrot.slane %v943_v5, %v2601_v39  ;;  %v947_v13 = vcombine.high %v943_v5, %v943_v5  ;;  %v992_v15 = vmul.f32 %v967_v8, %v894_v10  ;;  %v975_v16 = vrot.slane %v945_v9, %v2601_v39 }
 0x273   :  { %1000 = vadd.xlane.f32.xlu1 %v990_v3  ;;  %v991_v11 = vmul.f32 %v963_v4, %v893_v6 }
 0x274   :  { %v993_v18 = vmul.f32 %v971_v12, %v895_v14  ;;  %v979_v19 = vrot.slane %v947_v13, %v2601_v39  ;;  %v994_v21 = vmul.f32 %v975_v16, %v896_v17 }
 0x275   :  { %998 = vadd.xlane.f32.xlu0 %v989_v7 }
 0x276   :  { %v995_v22 = vmul.f32 %v979_v19, %v897_v20 }
 0x277   :  { %1002 = vadd.xlane.f32.xlu1 %v991_v11 }
 0x279   :  { %1004 = vadd.xlane.f32.xlu0 %v992_v15 }
 0x27b   :  { %1006 = vadd.xlane.f32.xlu1 %v993_v18 }
 0x27d   :  { %1008 = vadd.xlane.f32.xlu0 %v994_v21 }
 0x27f   :  { %1010 = vadd.xlane.f32.xlu1 %v995_v22 }
 0x2fe   :  { %v997_v24 = vpop.xlane.xlu0 %996 }
 0x2ff   :  { %v1027_v28 = vrot.slane %v997_v24, %v1026_v25 }
 0x300   :  { %v1001_v26 = vpop.xlane.xlu1 %1000 }
 0x301   :  { %v1035_v39 = vrot.slane %v1001_v26, %v1026_v25 }
 0x302   :  { %v999_v27 = vpop.xlane.xlu0 %998 }
 0x303   :  { %v1031_v29 = vrot.slane %v999_v27, %v1026_v25 }
 0x304   :  { %v1003_v30 = vpop.xlane.xlu1 %1002 }
 0x305   :  { %v1057_v31 = vsel %vm1056_vm0, %v1031_v29, %v1027_v28  ;;  %v1039_v32 = vrot.slane %v1003_v30, %v1026_v25 }
 0x306   :  { %v1059_v33 = vsel %vm1058_vm1, %v1035_v39, %v1057_v31  ;;  %v1005_v34 = vpop.xlane.xlu0 %1004 }
 0x307   :  { %v1061_v35 = vsel %vm1060_vm2, %v1039_v32, %v1059_v33  ;;  %v1043_v36 = vrot.slane %v1005_v34, %v1026_v25 }
 0x308   :  { %v1007_v37 = vpop.xlane.xlu1 %1006 }
 0x309   :  { %v1063_v40 = vsel %vm1062_vm3, %v1043_v36, %v1061_v35  ;;  %v1047_v38 = vrot.slane %v1007_v37, %v1026_v25 }
 0x30a   :  { %v1009_v41 = vpop.xlane.xlu0 %1008 }
 0x30b   :  { %v1065_v43 = vsel %vm1064_vm4, %v1047_v38, %v1063_v40  ;;  %v1051_v44 = vrot.slane %v1009_v41, %v1026_v25 }
 0x30c   :  { %v1011_v45 = vpop.xlane.xlu1 %1010 }
 0x30d   :  { %v1067_v46 = vsel %vm1066_vm5, %v1051_v44, %v1065_v43  ;;  %v1055_v47 = vrot.slane %v1011_v45, %v1026_v25 }
 0x30f   :  { %v1069_v48 = vsel %vm1068_vm6, %v1055_v47, %v1067_v46 }
 0x310   :  { %v1071_v49 = vsel %vm1013_vm7, -1e+30, %v1069_v48 }
 0x311   :  { %v1073_v50 = vsel %vm1072_vm8, %v1071_v49, -inf  ;;  %1085 = vst.msk [vmem:[%s2710_s11] sm:$0xff] %vm1072_vm8, %v1071_v49 }
 0x312   :  { %1074 = vmax.xlane.f32.xlu0 %v1073_v50 }
 0x39f   :  { %v1075_v51 = vpop.xlane.xlu0 %1074 }
 0x3a0   :  { %v1076_v52 = vsub.f32 %v1071_v49, %v1075_v51 }
 0x3a2   :  { %v1077_v53 = vmul.f32 1.442695, %v1076_v52 }
 0x3a4   :  { %1502 = vpow2.f32 %v1077_v53 }
 0x3ae   :  { %v1503_v54 = vpop.eup %1502 }
 0x3af   :  { %v1079_v55 = vsel %vm1072_vm8, %v1503_v54, 0.0 }
 0x3b0   :  { %1080 = vadd.xlane.f32.xlu1 %v1079_v55 }
 0x3b1   :  { %1517 = shalt.err (!%p1514_p4)
}
 0x3b2   :  { %s1518_s28 = scalar_lea.hbm %s2708_s9, 256 }
 0x3b3   :  { %p1519_p5 = scmp.ne.s32.totalorder %s2708_s9, %s1518_s28  ;;  %p1522_p6 = scmp.lt.u32.totalorder %s1518_s28, %s2708_s9 }
 0x3b5   :  { %p1524_p7 = pnand %p1522_p6, %p1519_p5 }
 0x3b7   :  { %1527 = shalt.err (!%p1524_p7)
}
 0x3b8   :  { %s1558_s14 = smov 128   ;;  %s1559_s5 = smov 8  }
 0x3b9   :  { %1099 = dma.vmem_to_hbm [thread:$0]  %s1094_s1, 256, %s2708_s9, [#allocation3], %s1558_s14, %s1558_s14, %s1559_s5  }
 0x3ba   :  { %s1528_s17 = scalar_lea.vmem %s2664_s26, 256  ;;  %p1533_p9 = scmp.lt.s32.totalorder %s2664_s26, %s2664_s26 }
 0x3bb   :  { %p1529_p8 = scmp.ne.s32.totalorder %s2664_s26, %s1528_s17  ;;  %p1534_p10 = scmp.lt.s32.totalorder %s1528_s17, %s1528_s17 }
 0x3bd   :  { %p1535_p11 = por %p1534_p10, %p1533_p9 }
 0x3bf   :  { %p1536_p12 = pnand %p1535_p11, %p1529_p8 }
 0x3c1   :  { %1539 = shalt.err (!%p1536_p12)
}
 0x3c2   :  { %s1540_s20 = scalar_lea.hbm %s2709_s10, 256 }
 0x3c3   :  { %p1541_p13 = scmp.ne.s32.totalorder %s2709_s10, %s1540_s20  ;;  %p1544_p0 = scmp.lt.u32.totalorder %s1540_s20, %s2709_s10 }
 0x3c5   :  { %p1546_p1 = pnand %p1544_p0, %p1541_p13 }
 0x3c7   :  { %1549 = shalt.err (!%p1546_p1)
}
 0x3c8   :  { %1111 = dma.vmem_to_hbm [thread:$0]  %s2664_s26, 256, %s2709_s10, [#allocation5], %s1558_s14, %s1558_s14, %s1559_s5  }
 0x43d   :  { %v1081_v56 = vpop.xlane.xlu1 %1080 }
 0x43e   :  { %1504 = vlog2.f32 %v1081_v56 }
 0x448   :  { %v1505_v57 = vpop.eup %1504 }
 0x449   :  { %v1083_v58 = vmul.f32 0.6931472, %v1505_v57 }
 0x44b   :  { %v1084_v59 = vadd.f32 %v1083_v58, %v1075_v51 }
 0x44d   :  { %v1086_v60 = vsub.f32 %v1071_v49, %v1084_v59 }
 0x44f   :  { %1087 = vst.msk [vmem:[%s2711_s12] sm:$0xff] %vm1072_vm8, %v1086_v60 }
 0x450   :  { %1550 = dma.done.wait [#allocation3], 256  }
 0x451   :  { %1551 = vsyncadd [#allocation3], 4294967040 }
 0x452   :  { %1552 = dma.done.wait [#allocation5], 256  }
 0x453   :  { %1553 = vsyncadd [#allocation5], 4294967040 }
 0x454   :  { %1126 = vsyncpa [#allocation3], 1 }
 0x455   :  { %1127 = vsyncpa [#allocation5], 1 }

</bundles_post_ra>
